<compile_context>
chip_gen: v7x
topology: tpu7x:2x2x1
jax: 0.10.0
libtpu: 0.0.40
codegen_flags: <defaults>
</compile_context>

<pallas_src>
import functools

import jax
import jax.numpy as jnp
from jax.experimental import pallas as pl
from jax.experimental.pallas import tpu as pltpu


_VMEM_LIMIT = 48 * 1024 * 1024   # budgeted under v7x's 64 MiB physical VMEM


# ----------------------------- Pallas kernels ------------------------------ #

def _dense_kernel(x_ref, w_ref, b_ref, o_ref, acc_ref, *, activation):
    """Tiled out = act(x @ w + b).  Grid = (M/TM, N/TN, K/TK), K innermost."""
    k = pl.program_id(2)

    @pl.when(k == 0)
    def _():
        acc_ref[...] = jnp.zeros_like(acc_ref)

    acc_ref[...] += jnp.dot(x_ref[...], w_ref[...],
                            preferred_element_type=jnp.float32)

    @pl.when(k == pl.num_programs(2) - 1)
    def _():
        acc = acc_ref[...] + b_ref[...].astype(jnp.float32)
        if activation == "gelu":
            acc = 0.5 * acc * (1.0 + jnp.tanh(
                0.7978845608028654 * (acc + 0.044715 * acc * acc * acc)))
        o_ref[...] = acc.astype(o_ref.dtype)


def _layernorm_kernel(x_ref, g_ref, b_ref, o_ref, *, eps):
    """Standalone LayerNorm over the last axis (used for embeddings)."""
    x = x_ref[...].astype(jnp.float32)
    mean = jnp.mean(x, axis=-1, keepdims=True)
    c = x - mean
    var = jnp.mean(c * c, axis=-1, keepdims=True)
    y = c * jax.lax.rsqrt(var + eps)
    o_ref[...] = (y * g_ref[...].astype(jnp.float32)
                  + b_ref[...].astype(jnp.float32)).astype(o_ref.dtype)


def _attn_block_kernel(x_ref, wqkv_ref, bqkv_ref, wo_ref, bo_ref, g_ref, bt_ref,
                       o_ref, *, heads, dh, scale, eps):
    """Fused attention sub-block for one batch element.

    out = LayerNorm(AttnOutProj(MHSA(x @ Wqkv + bqkv)) + bo + x)
    x block: (1, S, H) lane-dense.  Weights are VMEM-resident (constant
    index_map across the batch grid).
    """
    H = heads * dh
    x = x_ref[0]                                                  # (S, H) bf16

    # Fused QKV projection (one MXU matmul, fp32 accumulation).
    qkv = (jnp.dot(x, wqkv_ref[...], preferred_element_type=jnp.float32)
           + bqkv_ref[...].astype(jnp.float32))                   # (S, 3H) f32

    # Per-head scaled-dot-product attention (heads unrolled; S is small).
    outs = []
    for h in range(heads):
        q = qkv[:, h * dh:(h + 1) * dh] * scale
        k = qkv[:, H + h * dh:H + (h + 1) * dh]
        v = qkv[:, 2 * H + h * dh:2 * H + (h + 1) * dh]
        s = jax.lax.dot_general(q, k, (((1,), (1,)), ((), ())),
                                preferred_element_type=jnp.float32)  # (S, S)
        m = jnp.max(s, axis=-1, keepdims=True)
        p = jnp.exp(s - m)
        p = p * pl.reciprocal(jnp.sum(p, axis=-1, keepdims=True), approx=True)
        outs.append(jnp.dot(p, v, preferred_element_type=jnp.float32))
    ctx = jnp.concatenate(outs, axis=-1).astype(jnp.bfloat16)     # (S, H)

    # Output projection + residual + LayerNorm (all fused, fp32 stats).
    y = (jnp.dot(ctx, wo_ref[...], preferred_element_type=jnp.float32)
         + bo_ref[...].astype(jnp.float32)
         + x.astype(jnp.float32))
    mean = jnp.mean(y, axis=-1, keepdims=True)
    c = y - mean
    var = jnp.mean(c * c, axis=-1, keepdims=True)
    yn = c * jax.lax.rsqrt(var + eps)
    o_ref[0] = (yn * g_ref[...].astype(jnp.float32)
                + bt_ref[...].astype(jnp.float32)).astype(o_ref.dtype)


def _ffn_block_kernel(x_ref, w1_ref, b1_ref, w2_ref, b2_ref, g_ref, bt_ref,
                      o_ref, *, eps):
    """Fused FFN sub-block for one row tile.

    out = LayerNorm(GELU(x @ W1 + b1) @ W2 + b2 + x)
    """
    x = x_ref[...]                                                # (TM, H) bf16
    h = (jnp.dot(x, w1_ref[...], preferred_element_type=jnp.float32)
         + b1_ref[...].astype(jnp.float32))                       # (TM, I) f32
    h = 0.5 * h * (1.0 + jnp.tanh(
        0.7978845608028654 * (h + 0.044715 * h * h * h)))
    y = (jnp.dot(h.astype(jnp.bfloat16), w2_ref[...],
                 preferred_element_type=jnp.float32)
         + b2_ref[...].astype(jnp.float32)
         + x.astype(jnp.float32))                                 # (TM, H) f32
    mean = jnp.mean(y, axis=-1, keepdims=True)
    c = y - mean
    var = jnp.mean(c * c, axis=-1, keepdims=True)
    yn = c * jax.lax.rsqrt(var + eps)
    o_ref[...] = (yn * g_ref[...].astype(jnp.float32)
                  + bt_ref[...].astype(jnp.float32)).astype(o_ref.dtype)


# ------------------------------ kernel wrappers ----------------------------- #

def _fit_tile(dim, target, align):
    """Largest t <= min(dim, target) with dim % t == 0 and t aligned (or full)."""
    if dim <= target:
        return dim
    t = (target // align) * align
    while t >= align:
        if dim % t == 0:
            return t
        t -= align
    return dim


def pallas_dense(x, w, b, activation=None):
    M, K = x.shape
    N = w.shape[1]
    TM = _fit_tile(M, 256, 8)
    TN = _fit_tile(N, 512, 128)
    TK = _fit_tile(K, 512, 128)
    kernel = functools.partial(_dense_kernel, activation=activation)
    bytes_accessed = (M * K + K * N + M * N) * x.dtype.itemsize
    return pl.pallas_call(
        kernel,
        out_shape=jax.ShapeDtypeStruct((M, N), x.dtype),
        grid=(M // TM, N // TN, K // TK),
        in_specs=[
            pl.BlockSpec((TM, TK), lambda i, j, k: (i, k)),
            pl.BlockSpec((TK, TN), lambda i, j, k: (k, j)),
            pl.BlockSpec((1, TN), lambda i, j, k: (0, j)),
        ],
        out_specs=pl.BlockSpec((TM, TN), lambda i, j, k: (i, j)),
        scratch_shapes=[pltpu.VMEM((TM, TN), jnp.float32)],
        compiler_params=pltpu.CompilerParams(
            dimension_semantics=("parallel", "parallel", "arbitrary"),
            vmem_limit_bytes=_VMEM_LIMIT),
        cost_estimate=pl.CostEstimate(flops=2 * M * N * K, transcendentals=0,
                                      bytes_accessed=bytes_accessed),
    )(x, w, b)


def pallas_layernorm(x, gamma, beta, eps=1e-12):
    M, H = x.shape
    TM = _fit_tile(M, 512, 8)
    kernel = functools.partial(_layernorm_kernel, eps=eps)
    return pl.pallas_call(
        kernel,
        out_shape=jax.ShapeDtypeStruct((M, H), x.dtype),
        grid=(M // TM,),
        in_specs=[
            pl.BlockSpec((TM, H), lambda i: (i, 0)),
            pl.BlockSpec((1, H), lambda i: (0, 0)),
            pl.BlockSpec((1, H), lambda i: (0, 0)),
        ],
        out_specs=pl.BlockSpec((TM, H), lambda i: (i, 0)),
        compiler_params=pltpu.CompilerParams(
            dimension_semantics=("parallel",),
            vmem_limit_bytes=_VMEM_LIMIT),
    )(x, gamma, beta)


def pallas_attention_block(x, wqkv, bqkv, wo, bo, gamma, beta, heads, eps=1e-12):
    """x: (B, S, H) -> LayerNorm(OutProj(MHSA(x)) + x), one kernel, grid=(B,)."""
    B, S, H = x.shape
    threeH = wqkv.shape[1]
    dh = H // heads
    kernel = functools.partial(_attn_block_kernel, heads=heads, dh=dh,
                               scale=1.0 / (dh ** 0.5), eps=eps)
    flops_per_b = 2 * S * threeH * H + heads * 4 * S * S * dh + 2 * S * H * H
    bytes_accessed = (B * S * H * 2 + H * threeH + H * H) * x.dtype.itemsize
    return pl.pallas_call(
        kernel,
        out_shape=jax.ShapeDtypeStruct((B, S, H), x.dtype),
        grid=(B,),
        in_specs=[
            pl.BlockSpec((1, S, H), lambda b: (b, 0, 0)),
            pl.BlockSpec((H, threeH), lambda b: (0, 0)),
            pl.BlockSpec((1, threeH), lambda b: (0, 0)),
            pl.BlockSpec((H, H), lambda b: (0, 0)),
            pl.BlockSpec((1, H), lambda b: (0, 0)),
            pl.BlockSpec((1, H), lambda b: (0, 0)),
            pl.BlockSpec((1, H), lambda b: (0, 0)),
        ],
        out_specs=pl.BlockSpec((1, S, H), lambda b: (b, 0, 0)),
        compiler_params=pltpu.CompilerParams(
            dimension_semantics=("parallel",),
            vmem_limit_bytes=_VMEM_LIMIT),
        cost_estimate=pl.CostEstimate(flops=B * flops_per_b,
                                      transcendentals=B * heads * S * S,
                                      bytes_accessed=bytes_accessed),
    )(x, wqkv, bqkv, wo, bo, gamma, beta)


def pallas_ffn_block(x, w1, b1, w2, b2, gamma, beta, eps=1e-12):
    """x: (M, H) -> LayerNorm(GELU(x@W1+b1)@W2 + b2 + x), one kernel."""
    M, H = x.shape
    I = w1.shape[1]
    TM = _fit_tile(M, 256, 8)
    kernel = functools.partial(_ffn_block_kernel, eps=eps)
    bytes_accessed = (2 * M * H + H * I + I * H) * x.dtype.itemsize
    return pl.pallas_call(
        kernel,
        out_shape=jax.ShapeDtypeStruct((M, H), x.dtype),
        grid=(M // TM,),
        in_specs=[
            pl.BlockSpec((TM, H), lambda i: (i, 0)),
            pl.BlockSpec((H, I), lambda i: (0, 0)),
            pl.BlockSpec((1, I), lambda i: (0, 0)),
            pl.BlockSpec((I, H), lambda i: (0, 0)),
            pl.BlockSpec((1, H), lambda i: (0, 0)),
            pl.BlockSpec((1, H), lambda i: (0, 0)),
            pl.BlockSpec((1, H), lambda i: (0, 0)),
        ],
        out_specs=pl.BlockSpec((TM, H), lambda i: (i, 0)),
        compiler_params=pltpu.CompilerParams(
            dimension_semantics=("parallel",),
            vmem_limit_bytes=_VMEM_LIMIT),
        cost_estimate=pl.CostEstimate(flops=4 * M * H * I,
                                      transcendentals=M * I,
                                      bytes_accessed=bytes_accessed),
    )(x, w1, b1, w2, b2, gamma, beta)


# ------------------------------- BERT-NER model ----------------------------- #

CFG = dict(
    vocab=128,
    max_pos=64,
    hidden=128,
    heads=4,
    intermediate=512,
    layers=2,
    num_classes=9,
    num_classes_padded=128,   # lane-dense classification head; sliced back to 9
)


def init_params(key, cfg):
    H, I = cfg["hidden"], cfg["intermediate"]
    NC, NCP = cfg["num_classes"], cfg["num_classes_padded"]
    keys = iter(jax.random.split(key, 128))
    std = 0.02

    def w(shape):
        # bf16 weights (MXU dtype); accumulation stays fp32 inside kernels.
        return (std * jax.random.normal(next(keys), shape)).astype(jnp.bfloat16)

    def fzeros(shape):
        return jnp.zeros(shape, jnp.float32)

    cls_w = jnp.pad(w((H, NC)).astype(jnp.float32), ((0, 0), (0, NCP - NC)))
    p = {
        "word_emb": w((cfg["vocab"], H)),
        "pos_emb": w((cfg["max_pos"], H)),
        "type_emb": w((2, H)),
        "emb_ln_g": jnp.ones((1, H), jnp.float32),
        "emb_ln_b": fzeros((1, H)),
        "cls_w": cls_w.astype(jnp.bfloat16),
        "cls_b": fzeros((1, NCP)),
        "layers": [],
    }
    for _ in range(cfg["layers"]):
        # Fused QKV weight: (H, 3H) = [wq | wk | wv].
        wqkv = jnp.concatenate([w((H, H)), w((H, H)), w((H, H))], axis=1)
        p["layers"].append({
            "wqkv": wqkv, "bqkv": fzeros((1, 3 * H)),
            "wo": w((H, H)), "bo": fzeros((1, H)),
            "ln1_g": jnp.ones((1, H), jnp.float32), "ln1_b": fzeros((1, H)),
            "w1": w((H, I)), "b1": fzeros((1, I)),
            "w2": w((I, H)), "b2": fzeros((1, H)),
            "ln2_g": jnp.ones((1, H), jnp.float32), "ln2_b": fzeros((1, H)),
        })
    return p


def bert_layer(x2, lp, B, S, cfg):
    """x2: (B*S, H) -> (B*S, H).  Two fused pallas_calls per layer."""
    H = cfg["hidden"]
    heads = cfg["heads"]

    # Attention sub-block: QKV proj + MHSA + out proj + residual + LN, fused.
    x3 = pallas_attention_block(x2.reshape(B, S, H), lp["wqkv"], lp["bqkv"],
                                lp["wo"], lp["bo"], lp["ln1_g"], lp["ln1_b"],
                                heads)
    x2 = x3.reshape(B * S, H)

    # FFN sub-block: GELU matmul + second matmul + residual + LN, fused.
    x2 = pallas_ffn_block(x2, lp["w1"], lp["b1"], lp["w2"], lp["b2"],
                          lp["ln2_g"], lp["ln2_b"])
    return x2


def bert_ner_forward(tokens, params, cfg):
    """tokens: int32 (B, S) -> logits (B, S, num_classes)."""
    B, S = tokens.shape
    H = cfg["hidden"]

    # Embedding lookup (glue, plain JAX gather) + position / token-type embeds.
    emb = (jnp.take(params["word_emb"], tokens, axis=0)
           + params["pos_emb"][:S][None, :, :]
           + params["type_emb"][0][None, None, :])              # (B, S, H) bf16
    x2 = emb.reshape(B * S, H).astype(jnp.bfloat16)
    x2 = pallas_layernorm(x2, params["emb_ln_g"], params["emb_ln_b"])

    for lp in params["layers"]:
        x2 = bert_layer(x2, lp, B, S, cfg)

    # Classification head (nn.Linear(embedding_dim, num_classes)),
    # lane-padded to 128 outputs then sliced back.
    logits = pallas_dense(x2, params["cls_w"], params["cls_b"])  # (B*S, 128)
    logits = logits[:, :cfg["num_classes"]].astype(jnp.float32)
    return logits.reshape(B, S, cfg["num_classes"])


# ----------------------------------- main ----------------------------------- #

if __name__ == "__main__":
    key = jax.random.PRNGKey(0)
    k_tok, k_par = jax.random.split(key)

    B, S = 2, 8
    tokens = jax.random.randint(k_tok, (B, S), 0, CFG["vocab"], dtype=jnp.int32)
    params = init_params(k_par, CFG)

    fwd = jax.jit(functools.partial(bert_ner_forward, cfg=CFG))
    logits = fwd(tokens, params)
    jax.block_until_ready(logits)
    assert logits.shape == (B, S, CFG["num_classes"])
    assert bool(jnp.all(jnp.isfinite(logits)))
    print("KERNEL_OK")
</pallas_src>

<mosaic_0001>
module attributes {stable_mosaic.version = 11 : i64} {
  func.func @_layernorm_kernel(%arg0: i32, %arg1: memref<16x128xbf16, #tpu.memory_space<vmem>>, %arg2: memref<1x128xf32, #tpu.memory_space<vmem>>, %arg3: memref<1x128xf32, #tpu.memory_space<vmem>>, %arg4: memref<16x128xbf16, #tpu.memory_space<vmem>>) attributes {dimension_semantics = [#tpu.dimension_semantics<parallel>], iteration_bounds = array<i64: 1>, scalar_prefetch = 0 : i64, scratch_operands = 0 : i64, tpu.core_type = #tpu.core_type<tc>, window_params = [{transform_indices = @transform_0, window_bounds = array<i64: 16, 128>}, {pipeline_mode = #tpu.pipeline_mode<synchronous>, transform_indices = @transform_1, window_bounds = array<i64: 1, 128>}, {pipeline_mode = #tpu.pipeline_mode<synchronous>, transform_indices = @transform_2, window_bounds = array<i64: 1, 128>}, {transform_indices = @transform_3, window_bounds = array<i64: 16, 128>}]} {
    %c0 = arith.constant 0 : index
    %c0_0 = arith.constant 0 : index
    %0 = vector.load %arg1[%c0, %c0_0] : memref<16x128xbf16, #tpu.memory_space<vmem>>, vector<16x128xbf16>
    %1 = arith.extf %0 : vector<16x128xbf16> to vector<16x128xf32>
    %cst = arith.constant dense<0.000000e+00> : vector<16xf32>
    %2 = vector.multi_reduction <add>, %1, %cst [1] : vector<16x128xf32> to vector<16xf32>
    %3 = vector.shape_cast %2 : vector<16xf32> to vector<16x1xf32>
    %cst_1 = arith.constant 1.280000e+02 : f32
    %4 = vector.broadcast %cst_1 : f32 to vector<16x1xf32>
    %5 = arith.divf %3, %4 : vector<16x1xf32>
    %6 = vector.broadcast %5 : vector<16x1xf32> to vector<16x128xf32>
    %7 = arith.subf %1, %6 : vector<16x128xf32>
    %8 = arith.mulf %7, %7 : vector<16x128xf32>
    %cst_2 = arith.constant dense<0.000000e+00> : vector<16xf32>
    %9 = vector.multi_reduction <add>, %8, %cst_2 [1] : vector<16x128xf32> to vector<16xf32>
    %10 = vector.shape_cast %9 : vector<16xf32> to vector<16x1xf32>
    %cst_3 = arith.constant 1.280000e+02 : f32
    %11 = vector.broadcast %cst_3 : f32 to vector<16x1xf32>
    %12 = arith.divf %10, %11 : vector<16x1xf32>
    %cst_4 = arith.constant 9.99999996E-13 : f32
    %13 = vector.broadcast %cst_4 : f32 to vector<16x1xf32>
    %14 = arith.addf %12, %13 : vector<16x1xf32>
    %15 = math.rsqrt %14 : vector<16x1xf32>
    %16 = vector.broadcast %15 : vector<16x1xf32> to vector<16x128xf32>
    %17 = arith.mulf %7, %16 : vector<16x128xf32>
    %c0_5 = arith.constant 0 : index
    %c0_6 = arith.constant 0 : index
    %18 = vector.load %arg2[%c0_5, %c0_6] : memref<1x128xf32, #tpu.memory_space<vmem>>, vector<1x128xf32>
    %19 = vector.broadcast %18 : vector<1x128xf32> to vector<16x128xf32>
    %20 = arith.mulf %17, %19 : vector<16x128xf32>
    %c0_7 = arith.constant 0 : index
    %c0_8 = arith.constant 0 : index
    %21 = vector.load %arg3[%c0_7, %c0_8] : memref<1x128xf32, #tpu.memory_space<vmem>>, vector<1x128xf32>
    %22 = vector.broadcast %21 : vector<1x128xf32> to vector<16x128xf32>
    %23 = arith.addf %20, %22 : vector<16x128xf32>
    %24 = arith.truncf %23 : vector<16x128xf32> to vector<16x128xbf16>
    %c0_9 = arith.constant 0 : index
    %c0_10 = arith.constant 0 : index
    %25 = vector.load %arg4[%c0_9, %c0_10] : memref<16x128xbf16, #tpu.memory_space<vmem>>, vector<16x128xbf16>
    tpu.vector_store %arg4[%c0_9, %c0_10], %24 {strides = array<i32>} : memref<16x128xbf16, #tpu.memory_space<vmem>>, vector<16x128xbf16>,
    return
  }
  func.func @transform_0(%arg0: i32) -> (i32, i32) {
    %c0_i32 = arith.constant 0 : i32
    %c0_i32_0 = arith.constant 0 : i32
    return %arg0, %c0_i32 : i32, i32
  }
  func.func @transform_1(%arg0: i32) -> (i32, i32) {
    %c0_i32 = arith.constant 0 : i32
    %c0_i32_0 = arith.constant 0 : i32
    %c0_i32_1 = arith.constant 0 : i32
    return %c0_i32, %c0_i32_0 : i32, i32
  }
  func.func @transform_2(%arg0: i32) -> (i32, i32) {
    %c0_i32 = arith.constant 0 : i32
    %c0_i32_0 = arith.constant 0 : i32
    %c0_i32_1 = arith.constant 0 : i32
    return %c0_i32, %c0_i32_0 : i32, i32
  }
  func.func @transform_3(%arg0: i32) -> (i32, i32) {
    %c0_i32 = arith.constant 0 : i32
    %c0_i32_0 = arith.constant 0 : i32
    return %arg0, %c0_i32 : i32, i32
  }
}

module attributes {stable_mosaic.version = 11 : i64} {
  func.func @_attn_block_kernel(%arg0: i32, %arg1: memref<1x8x128xbf16, #tpu.memory_space<vmem>>, %arg2: memref<128x384xbf16, #tpu.memory_space<vmem>>, %arg3: memref<1x384xf32, #tpu.memory_space<vmem>>, %arg4: memref<128x128xbf16, #tpu.memory_space<vmem>>, %arg5: memref<1x128xf32, #tpu.memory_space<vmem>>, %arg6: memref<1x128xf32, #tpu.memory_space<vmem>>, %arg7: memref<1x128xf32, #tpu.memory_space<vmem>>, %arg8: memref<1x8x128xbf16, #tpu.memory_space<vmem>>) attributes {dimension_semantics = [#tpu.dimension_semantics<parallel>], iteration_bounds = array<i64: 2>, scalar_prefetch = 0 : i64, scratch_operands = 0 : i64, tpu.core_type = #tpu.core_type<tc>, window_params = [{transform_indices = @transform_0, window_bounds = array<i64: 1, 8, 128>}, {pipeline_mode = #tpu.pipeline_mode<synchronous>, transform_indices = @transform_1, window_bounds = array<i64: 128, 384>}, {pipeline_mode = #tpu.pipeline_mode<synchronous>, transform_indices = @transform_2, window_bounds = array<i64: 1, 384>}, {pipeline_mode = #tpu.pipeline_mode<synchronous>, transform_indices = @transform_3, window_bounds = array<i64: 128, 128>}, {pipeline_mode = #tpu.pipeline_mode<synchronous>, transform_indices = @transform_4, window_bounds = array<i64: 1, 128>}, {pipeline_mode = #tpu.pipeline_mode<synchronous>, transform_indices = @transform_5, window_bounds = array<i64: 1, 128>}, {pipeline_mode = #tpu.pipeline_mode<synchronous>, transform_indices = @transform_6, window_bounds = array<i64: 1, 128>}, {transform_indices = @transform_7, window_bounds = array<i64: 1, 8, 128>}]} {
    %c0 = arith.constant 0 : index
    %c0_0 = arith.constant 0 : index
    %c0_1 = arith.constant 0 : index
    %0 = vector.load %arg1[%c0, %c0_0, %c0_1] : memref<1x8x128xbf16, #tpu.memory_space<vmem>>, vector<1x8x128xbf16>
    %1 = vector.shape_cast %0 : vector<1x8x128xbf16> to vector<8x128xbf16>
    %c0_2 = arith.constant 0 : index
    %c0_3 = arith.constant 0 : index
    %2 = vector.load %arg2[%c0_2, %c0_3] : memref<128x384xbf16, #tpu.memory_space<vmem>>, vector<128x384xbf16>
    %cst = arith.constant dense<0.000000e+00> : vector<8x384xf32>
    %3 = tpu.matmul %1, %2, %cst {dimension_numbers = #tpu.dot_dimension_numbers<[1], [0], [0], [1], [0, 0, 1, 1], [], []>} : vector<8x128xbf16>, vector<128x384xbf16>, vector<8x384xf32> -> vector<8x384xf32>
    %c0_4 = arith.constant 0 : index
    %c0_5 = arith.constant 0 : index
    %4 = vector.load %arg3[%c0_4, %c0_5] : memref<1x384xf32, #tpu.memory_space<vmem>>, vector<1x384xf32>
    %5 = vector.broadcast %4 : vector<1x384xf32> to vector<8x384xf32>
    %6 = arith.addf %3, %5 : vector<8x384xf32>
    %7 = vector.extract_strided_slice %6 {offsets = [0, 0], sizes = [8, 32], strides = [1, 1]} : vector<8x384xf32> to vector<8x32xf32>
    %cst_6 = arith.constant 0.176776692 : f32
    %8 = vector.broadcast %cst_6 : f32 to vector<8x32xf32>
    %9 = arith.mulf %7, %8 : vector<8x32xf32>
    %10 = vector.extract_strided_slice %6 {offsets = [0, 128], sizes = [8, 32], strides = [1, 1]} : vector<8x384xf32> to vector<8x32xf32>
    %11 = vector.extract_strided_slice %6 {offsets = [0, 256], sizes = [8, 32], strides = [1, 1]} : vector<8x384xf32> to vector<8x32xf32>
    %cst_7 = arith.constant dense<0.000000e+00> : vector<8x8xf32>
    %12 = tpu.matmul %9, %10, %cst_7 {dimension_numbers = #tpu.dot_dimension_numbers<[1], [1], [0], [0], [0, 0, 1, 0], [], []>} : vector<8x32xf32>, vector<8x32xf32>, vector<8x8xf32> -> vector<8x8xf32>
    %cst_8 = arith.constant dense<0xFF800000> : vector<8xf32>
    %13 = vector.multi_reduction <maximumf>, %12, %cst_8 [1] : vector<8x8xf32> to vector<8xf32>
    %14 = vector.shape_cast %13 : vector<8xf32> to vector<8x1xf32>
    %15 = vector.broadcast %14 : vector<8x1xf32> to vector<8x8xf32>
    %16 = arith.subf %12, %15 : vector<8x8xf32>
    %17 = math.exp %16 : vector<8x8xf32>
    %cst_9 = arith.constant dense<0.000000e+00> : vector<8xf32>
    %18 = vector.multi_reduction <add>, %17, %cst_9 [1] : vector<8x8xf32> to vector<8xf32>
    %19 = vector.shape_cast %18 : vector<8xf32> to vector<8x1xf32>
    %20 = tpu.reciprocal %19 {approx = true} : vector<8x1xf32> -> vector<8x1xf32>
    %21 = vector.broadcast %20 : vector<8x1xf32> to vector<8x8xf32>
    %22 = arith.mulf %17, %21 : vector<8x8xf32>
    %cst_10 = arith.constant dense<0.000000e+00> : vector<8x32xf32>
    %23 = tpu.matmul %22, %11, %cst_10 {dimension_numbers = #tpu.dot_dimension_numbers<[1], [0], [0], [1], [0, 0, 1, 1], [], []>} : vector<8x8xf32>, vector<8x32xf32>, vector<8x32xf32> -> vector<8x32xf32>
    %24 = vector.extract_strided_slice %6 {offsets = [0, 32], sizes = [8, 32], strides = [1, 1]} : vector<8x384xf32> to vector<8x32xf32>
    %cst_11 = arith.constant 0.176776692 : f32
    %25 = vector.broadcast %cst_11 : f32 to vector<8x32xf32>
    %26 = arith.mulf %24, %25 : vector<8x32xf32>
    %27 = vector.extract_strided_slice %6 {offsets = [0, 160], sizes = [8, 32], strides = [1, 1]} : vector<8x384xf32> to vector<8x32xf32>
    %28 = vector.extract_strided_slice %6 {offsets = [0, 288], sizes = [8, 32], strides = [1, 1]} : vector<8x384xf32> to vector<8x32xf32>
    %cst_12 = arith.constant dense<0.000000e+00> : vector<8x8xf32>
    %29 = tpu.matmul %26, %27, %cst_12 {dimension_numbers = #tpu.dot_dimension_numbers<[1], [1], [0], [0], [0, 0, 1, 0], [], []>} : vector<8x32xf32>, vector<8x32xf32>, vector<8x8xf32> -> vector<8x8xf32>
    %cst_13 = arith.constant dense<0xFF800000> : vector<8xf32>
    %30 = vector.multi_reduction <maximumf>, %29, %cst_13 [1] : vector<8x8xf32> to vector<8xf32>
    %31 = vector.shape_cast %30 : vector<8xf32> to vector<8x1xf32>
    %32 = vector.broadcast %31 : vector<8x1xf32> to vector<8x8xf32>
    %33 = arith.subf %29, %32 : vector<8x8xf32>
    %34 = math.exp %33 : vector<8x8xf32>
    %cst_14 = arith.constant dense<0.000000e+00> : vector<8xf32>
    %35 = vector.multi_reduction <add>, %34, %cst_14 [1] : vector<8x8xf32> to vector<8xf32>
    %36 = vector.shape_cast %35 : vector<8xf32> to vector<8x1xf32>
    %37 = tpu.reciprocal %36 {approx = true} : vector<8x1xf32> -> vector<8x1xf32>
    %38 = vector.broadcast %37 : vector<8x1xf32> to vector<8x8xf32>
    %39 = arith.mulf %34, %38 : vector<8x8xf32>
    %cst_15 = arith.constant dense<0.000000e+00> : vector<8x32xf32>
    %40 = tpu.matmul %39, %28, %cst_15 {dimension_numbers = #tpu.dot_dimension_numbers<[1], [0], [0], [1], [0, 0, 1, 1], [], []>} : vector<8x8xf32>, vector<8x32xf32>, vector<8x32xf32> -> vector<8x32xf32>
    %41 = vector.extract_strided_slice %6 {offsets = [0, 64], sizes = [8, 32], strides = [1, 1]} : vector<8x384xf32> to vector<8x32xf32>
    %cst_16 = arith.constant 0.176776692 : f32
    %42 = vector.broadcast %cst_16 : f32 to vector<8x32xf32>
    %43 = arith.mulf %41, %42 : vector<8x32xf32>
    %44 = vector.extract_strided_slice %6 {offsets = [0, 192], sizes = [8, 32], strides = [1, 1]} : vector<8x384xf32> to vector<8x32xf32>
    %45 = vector.extract_strided_slice %6 {offsets = [0, 320], sizes = [8, 32], strides = [1, 1]} : vector<8x384xf32> to vector<8x32xf32>
    %cst_17 = arith.constant dense<0.000000e+00> : vector<8x8xf32>
    %46 = tpu.matmul %43, %44, %cst_17 {dimension_numbers = #tpu.dot_dimension_numbers<[1], [1], [0], [0], [0, 0, 1, 0], [], []>} : vector<8x32xf32>, vector<8x32xf32>, vector<8x8xf32> -> vector<8x8xf32>
    %cst_18 = arith.constant dense<0xFF800000> : vector<8xf32>
    %47 = vector.multi_reduction <maximumf>, %46, %cst_18 [1] : vector<8x8xf32> to vector<8xf32>
    %48 = vector.shape_cast %47 : vector<8xf32> to vector<8x1xf32>
    %49 = vector.broadcast %48 : vector<8x1xf32> to vector<8x8xf32>
    %50 = arith.subf %46, %49 : vector<8x8xf32>
    %51 = math.exp %50 : vector<8x8xf32>
    %cst_19 = arith.constant dense<0.000000e+00> : vector<8xf32>
    %52 = vector.multi_reduction <add>, %51, %cst_19 [1] : vector<8x8xf32> to vector<8xf32>
    %53 = vector.shape_cast %52 : vector<8xf32> to vector<8x1xf32>
    %54 = tpu.reciprocal %53 {approx = true} : vector<8x1xf32> -> vector<8x1xf32>
    %55 = vector.broadcast %54 : vector<8x1xf32> to vector<8x8xf32>
    %56 = arith.mulf %51, %55 : vector<8x8xf32>
    %cst_20 = arith.constant dense<0.000000e+00> : vector<8x32xf32>
    %57 = tpu.matmul %56, %45, %cst_20 {dimension_numbers = #tpu.dot_dimension_numbers<[1], [0], [0], [1], [0, 0, 1, 1], [], []>} : vector<8x8xf32>, vector<8x32xf32>, vector<8x32xf32> -> vector<8x32xf32>
    %58 = vector.extract_strided_slice %6 {offsets = [0, 96], sizes = [8, 32], strides = [1, 1]} : vector<8x384xf32> to vector<8x32xf32>
    %cst_21 = arith.constant 0.176776692 : f32
    %59 = vector.broadcast %cst_21 : f32 to vector<8x32xf32>
    %60 = arith.mulf %58, %59 : vector<8x32xf32>
    %61 = vector.extract_strided_slice %6 {offsets = [0, 224], sizes = [8, 32], strides = [1, 1]} : vector<8x384xf32> to vector<8x32xf32>
    %62 = vector.extract_strided_slice %6 {offsets = [0, 352], sizes = [8, 32], strides = [1, 1]} : vector<8x384xf32> to vector<8x32xf32>
    %cst_22 = arith.constant dense<0.000000e+00> : vector<8x8xf32>
    %63 = tpu.matmul %60, %61, %cst_22 {dimension_numbers = #tpu.dot_dimension_numbers<[1], [1], [0], [0], [0, 0, 1, 0], [], []>} : vector<8x32xf32>, vector<8x32xf32>, vector<8x8xf32> -> vector<8x8xf32>
    %cst_23 = arith.constant dense<0xFF800000> : vector<8xf32>
    %64 = vector.multi_reduction <maximumf>, %63, %cst_23 [1] : vector<8x8xf32> to vector<8xf32>
    %65 = vector.shape_cast %64 : vector<8xf32> to vector<8x1xf32>
    %66 = vector.broadcast %65 : vector<8x1xf32> to vector<8x8xf32>
    %67 = arith.subf %63, %66 : vector<8x8xf32>
    %68 = math.exp %67 : vector<8x8xf32>
    %cst_24 = arith.constant dense<0.000000e+00> : vector<8xf32>
    %69 = vector.multi_reduction <add>, %68, %cst_24 [1] : vector<8x8xf32> to vector<8xf32>
    %70 = vector.shape_cast %69 : vector<8xf32> to vector<8x1xf32>
    %71 = tpu.reciprocal %70 {approx = true} : vector<8x1xf32> -> vector<8x1xf32>
    %72 = vector.broadcast %71 : vector<8x1xf32> to vector<8x8xf32>
    %73 = arith.mulf %68, %72 : vector<8x8xf32>
    %cst_25 = arith.constant dense<0.000000e+00> : vector<8x32xf32>
    %74 = tpu.matmul %73, %62, %cst_25 {dimension_numbers = #tpu.dot_dimension_numbers<[1], [0], [0], [1], [0, 0, 1, 1], [], []>} : vector<8x8xf32>, vector<8x32xf32>, vector<8x32xf32> -> vector<8x32xf32>
    %75 = tpu.concatenate %23, %40, %57, %74 in 1 : vector<8x32xf32>, vector<8x32xf32>, vector<8x32xf32>, vector<8x32xf32> -> vector<8x128xf32>
    %76 = arith.truncf %75 : vector<8x128xf32> to vector<8x128xbf16>
    %c0_26 = arith.constant 0 : index
    %c0_27 = arith.constant 0 : index
    %77 = vector.load %arg4[%c0_26, %c0_27] : memref<128x128xbf16, #tpu.memory_space<vmem>>, vector<128x128xbf16>
    %cst_28 = arith.constant dense<0.000000e+00> : vector<8x128xf32>
    %78 = tpu.matmul %76, %77, %cst_28 {dimension_numbers = #tpu.dot_dimension_numbers<[1], [0], [0], [1], [0, 0, 1, 1], [], []>} : vector<8x128xbf16>, vector<128x128xbf16>, vector<8x128xf32> -> vector<8x128xf32>
    %c0_29 = arith.constant 0 : index
    %c0_30 = arith.constant 0 : index
    %79 = vector.load %arg5[%c0_29, %c0_30] : memref<1x128xf32, #tpu.memory_space<vmem>>, vector<1x128xf32>
    %80 = vector.broadcast %79 : vector<1x128xf32> to vector<8x128xf32>
    %81 = arith.addf %78, %80 : vector<8x128xf32>
    %82 = arith.extf %1 : vector<8x128xbf16> to vector<8x128xf32>
    %83 = arith.addf %81, %82 : vector<8x128xf32>
    %cst_31 = arith.constant dense<0.000000e+00> : vector<8xf32>
    %84 = vector.multi_reduction <add>, %83, %cst_31 [1] : vector<8x128xf32> to vector<8xf32>
    %85 = vector.shape_cast %84 : vector<8xf32> to vector<8x1xf32>
    %cst_32 = arith.constant 1.280000e+02 : f32
    %86 = vector.broadcast %cst_32 : f32 to vector<8x1xf32>
    %87 = arith.divf %85, %86 : vector<8x1xf32>
    %88 = vector.broadcast %87 : vector<8x1xf32> to vector<8x128xf32>
    %89 = arith.subf %83, %88 : vector<8x128xf32>
    %90 = arith.mulf %89, %89 : vector<8x128xf32>
    %cst_33 = arith.constant dense<0.000000e+00> : vector<8xf32>
    %91 = vector.multi_reduction <add>, %90, %cst_33 [1] : vector<8x128xf32> to vector<8xf32>
    %92 = vector.shape_cast %91 : vector<8xf32> to vector<8x1xf32>
    %cst_34 = arith.constant 1.280000e+02 : f32
    %93 = vector.broadcast %cst_34 : f32 to vector<8x1xf32>
    %94 = arith.divf %92, %93 : vector<8x1xf32>
    %cst_35 = arith.constant 9.99999996E-13 : f32
    %95 = vector.broadcast %cst_35 : f32 to vector<8x1xf32>
    %96 = arith.addf %94, %95 : vector<8x1xf32>
    %97 = math.rsqrt %96 : vector<8x1xf32>
    %98 = vector.broadcast %97 : vector<8x1xf32> to vector<8x128xf32>
    %99 = arith.mulf %89, %98 : vector<8x128xf32>
    %c0_36 = arith.constant 0 : index
    %c0_37 = arith.constant 0 : index
    %100 = vector.load %arg6[%c0_36, %c0_37] : memref<1x128xf32, #tpu.memory_space<vmem>>, vector<1x128xf32>
    %101 = vector.broadcast %100 : vector<1x128xf32> to vector<8x128xf32>
    %102 = arith.mulf %99, %101 : vector<8x128xf32>
    %c0_38 = arith.constant 0 : index
    %c0_39 = arith.constant 0 : index
    %103 = vector.load %arg7[%c0_38, %c0_39] : memref<1x128xf32, #tpu.memory_space<vmem>>, vector<1x128xf32>
    %104 = vector.broadcast %103 : vector<1x128xf32> to vector<8x128xf32>
    %105 = arith.addf %102, %104 : vector<8x128xf32>
    %106 = arith.truncf %105 : vector<8x128xf32> to vector<8x128xbf16>
    %c0_40 = arith.constant 0 : index
    %c0_41 = arith.constant 0 : index
    %c0_42 = arith.constant 0 : index
    %107 = vector.load %arg8[%c0_40, %c0_41, %c0_42] : memref<1x8x128xbf16, #tpu.memory_space<vmem>>, vector<1x8x128xbf16>
    %108 = vector.shape_cast %107 : vector<1x8x128xbf16> to vector<8x128xbf16>
    %109 = vector.shape_cast %106 : vector<8x128xbf16> to vector<1x8x128xbf16>
    tpu.vector_store %arg8[%c0_40, %c0_41, %c0_42], %109 {strides = array<i32>} : memref<1x8x128xbf16, #tpu.memory_space<vmem>>, vector<1x8x128xbf16>,
    return
  }
  func.func @transform_0(%arg0: i32) -> (i32, i32, i32) {
    %c0_i32 = arith.constant 0 : i32
    %c0_i32_0 = arith.constant 0 : i32
    %c0_i32_1 = arith.constant 0 : i32
    return %arg0, %c0_i32, %c0_i32_0 : i32, i32, i32
  }
  func.func @transform_1(%arg0: i32) -> (i32, i32) {
    %c0_i32 = arith.constant 0 : i32
    %c0_i32_0 = arith.constant 0 : i32
    %c0_i32_1 = arith.constant 0 : i32
    return %c0_i32, %c0_i32_0 : i32, i32
  }
  func.func @transform_2(%arg0: i32) -> (i32, i32) {
    %c0_i32 = arith.constant 0 : i32
    %c0_i32_0 = arith.constant 0 : i32
    %c0_i32_1 = arith.constant 0 : i32
    return %c0_i32, %c0_i32_0 : i32, i32
  }
  func.func @transform_3(%arg0: i32) -> (i32, i32) {
    %c0_i32 = arith.constant 0 : i32
    %c0_i32_0 = arith.constant 0 : i32
    %c0_i32_1 = arith.constant 0 : i32
    return %c0_i32, %c0_i32_0 : i32, i32
  }
  func.func @transform_4(%arg0: i32) -> (i32, i32) {
    %c0_i32 = arith.constant 0 : i32
    %c0_i32_0 = arith.constant 0 : i32
    %c0_i32_1 = arith.constant 0 : i32
    return %c0_i32, %c0_i32_0 : i32, i32
  }
  func.func @transform_5(%arg0: i32) -> (i32, i32) {
    %c0_i32 = arith.constant 0 : i32
    %c0_i32_0 = arith.constant 0 : i32
    %c0_i32_1 = arith.constant 0 : i32
    return %c0_i32, %c0_i32_0 : i32, i32
  }
  func.func @transform_6(%arg0: i32) -> (i32, i32) {
    %c0_i32 = arith.constant 0 : i32
    %c0_i32_0 = arith.constant 0 : i32
    %c0_i32_1 = arith.constant 0 : i32
    return %c0_i32, %c0_i32_0 : i32, i32
  }
  func.func @transform_7(%arg0: i32) -> (i32, i32, i32) {
    %c0_i32 = arith.constant 0 : i32
    %c0_i32_0 = arith.constant 0 : i32
    %c0_i32_1 = arith.constant 0 : i32
    return %arg0, %c0_i32, %c0_i32_0 : i32, i32, i32
  }
}

module attributes {stable_mosaic.version = 11 : i64} {
  func.func @_ffn_block_kernel(%arg0: i32, %arg1: memref<16x128xbf16, #tpu.memory_space<vmem>>, %arg2: memref<128x512xbf16, #tpu.memory_space<vmem>>, %arg3: memref<1x512xf32, #tpu.memory_space<vmem>>, %arg4: memref<512x128xbf16, #tpu.memory_space<vmem>>, %arg5: memref<1x128xf32, #tpu.memory_space<vmem>>, %arg6: memref<1x128xf32, #tpu.memory_space<vmem>>, %arg7: memref<1x128xf32, #tpu.memory_space<vmem>>, %arg8: memref<16x128xbf16, #tpu.memory_space<vmem>>) attributes {dimension_semantics = [#tpu.dimension_semantics<parallel>], iteration_bounds = array<i64: 1>, scalar_prefetch = 0 : i64, scratch_operands = 0 : i64, tpu.core_type = #tpu.core_type<tc>, window_params = [{transform_indices = @transform_0, window_bounds = array<i64: 16, 128>}, {pipeline_mode = #tpu.pipeline_mode<synchronous>, transform_indices = @transform_1, window_bounds = array<i64: 128, 512>}, {pipeline_mode = #tpu.pipeline_mode<synchronous>, transform_indices = @transform_2, window_bounds = array<i64: 1, 512>}, {pipeline_mode = #tpu.pipeline_mode<synchronous>, transform_indices = @transform_3, window_bounds = array<i64: 512, 128>}, {pipeline_mode = #tpu.pipeline_mode<synchronous>, transform_indices = @transform_4, window_bounds = array<i64: 1, 128>}, {pipeline_mode = #tpu.pipeline_mode<synchronous>, transform_indices = @transform_5, window_bounds = array<i64: 1, 128>}, {pipeline_mode = #tpu.pipeline_mode<synchronous>, transform_indices = @transform_6, window_bounds = array<i64: 1, 128>}, {transform_indices = @transform_7, window_bounds = array<i64: 16, 128>}]} {
    %c0 = arith.constant 0 : index
    %c0_0 = arith.constant 0 : index
    %0 = vector.load %arg1[%c0, %c0_0] : memref<16x128xbf16, #tpu.memory_space<vmem>>, vector<16x128xbf16>
    %c0_1 = arith.constant 0 : index
    %c0_2 = arith.constant 0 : index
    %1 = vector.load %arg2[%c0_1, %c0_2] : memref<128x512xbf16, #tpu.memory_space<vmem>>, vector<128x512xbf16>
    %cst = arith.constant dense<0.000000e+00> : vector<16x512xf32>
    %2 = tpu.matmul %0, %1, %cst {dimension_numbers = #tpu.dot_dimension_numbers<[1], [0], [0], [1], [0, 0, 1, 1], [], []>} : vector<16x128xbf16>, vector<128x512xbf16>, vector<16x512xf32> -> vector<16x512xf32>
    %c0_3 = arith.constant 0 : index
    %c0_4 = arith.constant 0 : index
    %3 = vector.load %arg3[%c0_3, %c0_4] : memref<1x512xf32, #tpu.memory_space<vmem>>, vector<1x512xf32>
    %4 = vector.broadcast %3 : vector<1x512xf32> to vector<16x512xf32>
    %5 = arith.addf %2, %4 : vector<16x512xf32>
    %cst_5 = arith.constant 5.000000e-01 : f32
    %6 = vector.broadcast %cst_5 : f32 to vector<16x512xf32>
    %7 = arith.mulf %6, %5 : vector<16x512xf32>
    %cst_6 = arith.constant 4.471500e-02 : f32
    %8 = vector.broadcast %cst_6 : f32 to vector<16x512xf32>
    %9 = arith.mulf %8, %5 : vector<16x512xf32>
    %10 = arith.mulf %9, %5 : vector<16x512xf32>
    %11 = arith.mulf %10, %5 : vector<16x512xf32>
    %12 = arith.addf %5, %11 : vector<16x512xf32>
    %cst_7 = arith.constant 0.797884583 : f32
    %13 = vector.broadcast %cst_7 : f32 to vector<16x512xf32>
    %14 = arith.mulf %13, %12 : vector<16x512xf32>
    %15 = math.tanh %14 : vector<16x512xf32>
    %cst_8 = arith.constant 1.000000e+00 : f32
    %16 = vector.broadcast %cst_8 : f32 to vector<16x512xf32>
    %17 = arith.addf %16, %15 : vector<16x512xf32>
    %18 = arith.mulf %7, %17 : vector<16x512xf32>
    %19 = arith.truncf %18 : vector<16x512xf32> to vector<16x512xbf16>
    %c0_9 = arith.constant 0 : index
    %c0_10 = arith.constant 0 : index
    %20 = vector.load %arg4[%c0_9, %c0_10] : memref<512x128xbf16, #tpu.memory_space<vmem>>, vector<512x128xbf16>
    %cst_11 = arith.constant dense<0.000000e+00> : vector<16x128xf32>
    %21 = tpu.matmul %19, %20, %cst_11 {dimension_numbers = #tpu.dot_dimension_numbers<[1], [0], [0], [1], [0, 0, 1, 1], [], []>} : vector<16x512xbf16>, vector<512x128xbf16>, vector<16x128xf32> -> vector<16x128xf32>
    %c0_12 = arith.constant 0 : index
    %c0_13 = arith.constant 0 : index
    %22 = vector.load %arg5[%c0_12, %c0_13] : memref<1x128xf32, #tpu.memory_space<vmem>>, vector<1x128xf32>
    %23 = vector.broadcast %22 : vector<1x128xf32> to vector<16x128xf32>
    %24 = arith.addf %21, %23 : vector<16x128xf32>
    %25 = arith.extf %0 : vector<16x128xbf16> to vector<16x128xf32>
    %26 = arith.addf %24, %25 : vector<16x128xf32>
    %cst_14 = arith.constant dense<0.000000e+00> : vector<16xf32>
    %27 = vector.multi_reduction <add>, %26, %cst_14 [1] : vector<16x128xf32> to vector<16xf32>
    %28 = vector.shape_cast %27 : vector<16xf32> to vector<16x1xf32>
    %cst_15 = arith.constant 1.280000e+02 : f32
    %29 = vector.broadcast %cst_15 : f32 to vector<16x1xf32>
    %30 = arith.divf %28, %29 : vector<16x1xf32>
    %31 = vector.broadcast %30 : vector<16x1xf32> to vector<16x128xf32>
    %32 = arith.subf %26, %31 : vector<16x128xf32>
    %33 = arith.mulf %32, %32 : vector<16x128xf32>
    %cst_16 = arith.constant dense<0.000000e+00> : vector<16xf32>
    %34 = vector.multi_reduction <add>, %33, %cst_16 [1] : vector<16x128xf32> to vector<16xf32>
    %35 = vector.shape_cast %34 : vector<16xf32> to vector<16x1xf32>
    %cst_17 = arith.constant 1.280000e+02 : f32
    %36 = vector.broadcast %cst_17 : f32 to vector<16x1xf32>
    %37 = arith.divf %35, %36 : vector<16x1xf32>
    %cst_18 = arith.constant 9.99999996E-13 : f32
    %38 = vector.broadcast %cst_18 : f32 to vector<16x1xf32>
    %39 = arith.addf %37, %38 : vector<16x1xf32>
    %40 = math.rsqrt %39 : vector<16x1xf32>
    %41 = vector.broadcast %40 : vector<16x1xf32> to vector<16x128xf32>
    %42 = arith.mulf %32, %41 : vector<16x128xf32>
    %c0_19 = arith.constant 0 : index
    %c0_20 = arith.constant 0 : index
    %43 = vector.load %arg6[%c0_19, %c0_20] : memref<1x128xf32, #tpu.memory_space<vmem>>, vector<1x128xf32>
    %44 = vector.broadcast %43 : vector<1x128xf32> to vector<16x128xf32>
    %45 = arith.mulf %42, %44 : vector<16x128xf32>
    %c0_21 = arith.constant 0 : index
    %c0_22 = arith.constant 0 : index
    %46 = vector.load %arg7[%c0_21, %c0_22] : memref<1x128xf32, #tpu.memory_space<vmem>>, vector<1x128xf32>
    %47 = vector.broadcast %46 : vector<1x128xf32> to vector<16x128xf32>
    %48 = arith.addf %45, %47 : vector<16x128xf32>
    %49 = arith.truncf %48 : vector<16x128xf32> to vector<16x128xbf16>
    %c0_23 = arith.constant 0 : index
    %c0_24 = arith.constant 0 : index
    %50 = vector.load %arg8[%c0_23, %c0_24] : memref<16x128xbf16, #tpu.memory_space<vmem>>, vector<16x128xbf16>
    tpu.vector_store %arg8[%c0_23, %c0_24], %49 {strides = array<i32>} : memref<16x128xbf16, #tpu.memory_space<vmem>>, vector<16x128xbf16>,
    return
  }
  func.func @transform_0(%arg0: i32) -> (i32, i32) {
    %c0_i32 = arith.constant 0 : i32
    %c0_i32_0 = arith.constant 0 : i32
    return %arg0, %c0_i32 : i32, i32
  }
  func.func @transform_1(%arg0: i32) -> (i32, i32) {
    %c0_i32 = arith.constant 0 : i32
    %c0_i32_0 = arith.constant 0 : i32
    %c0_i32_1 = arith.constant 0 : i32
    return %c0_i32, %c0_i32_0 : i32, i32
  }
  func.func @transform_2(%arg0: i32) -> (i32, i32) {
    %c0_i32 = arith.constant 0 : i32
    %c0_i32_0 = arith.constant 0 : i32
    %c0_i32_1 = arith.constant 0 : i32
    return %c0_i32, %c0_i32_0 : i32, i32
  }
  func.func @transform_3(%arg0: i32) -> (i32, i32) {
    %c0_i32 = arith.constant 0 : i32
    %c0_i32_0 = arith.constant 0 : i32
    %c0_i32_1 = arith.constant 0 : i32
    return %c0_i32, %c0_i32_0 : i32, i32
  }
  func.func @transform_4(%arg0: i32) -> (i32, i32) {
    %c0_i32 = arith.constant 0 : i32
    %c0_i32_0 = arith.constant 0 : i32
    %c0_i32_1 = arith.constant 0 : i32
    return %c0_i32, %c0_i32_0 : i32, i32
  }
  func.func @transform_5(%arg0: i32) -> (i32, i32) {
    %c0_i32 = arith.constant 0 : i32
    %c0_i32_0 = arith.constant 0 : i32
    %c0_i32_1 = arith.constant 0 : i32
    return %c0_i32, %c0_i32_0 : i32, i32
  }
  func.func @transform_6(%arg0: i32) -> (i32, i32) {
    %c0_i32 = arith.constant 0 : i32
    %c0_i32_0 = arith.constant 0 : i32
    %c0_i32_1 = arith.constant 0 : i32
    return %c0_i32, %c0_i32_0 : i32, i32
  }
  func.func @transform_7(%arg0: i32) -> (i32, i32) {
    %c0_i32 = arith.constant 0 : i32
    %c0_i32_0 = arith.constant 0 : i32
    return %arg0, %c0_i32 : i32, i32
  }
}

module attributes {stable_mosaic.version = 11 : i64} {
  func.func @_attn_block_kernel(%arg0: i32, %arg1: memref<1x8x128xbf16, #tpu.memory_space<vmem>>, %arg2: memref<128x384xbf16, #tpu.memory_space<vmem>>, %arg3: memref<1x384xf32, #tpu.memory_space<vmem>>, %arg4: memref<128x128xbf16, #tpu.memory_space<vmem>>, %arg5: memref<1x128xf32, #tpu.memory_space<vmem>>, %arg6: memref<1x128xf32, #tpu.memory_space<vmem>>, %arg7: memref<1x128xf32, #tpu.memory_space<vmem>>, %arg8: memref<1x8x128xbf16, #tpu.memory_space<vmem>>) attributes {dimension_semantics = [#tpu.dimension_semantics<parallel>], iteration_bounds = array<i64: 2>, scalar_prefetch = 0 : i64, scratch_operands = 0 : i64, tpu.core_type = #tpu.core_type<tc>, window_params = [{transform_indices = @transform_0, window_bounds = array<i64: 1, 8, 128>}, {pipeline_mode = #tpu.pipeline_mode<synchronous>, transform_indices = @transform_1, window_bounds = array<i64: 128, 384>}, {pipeline_mode = #tpu.pipeline_mode<synchronous>, transform_indices = @transform_2, window_bounds = array<i64: 1, 384>}, {pipeline_mode = #tpu.pipeline_mode<synchronous>, transform_indices = @transform_3, window_bounds = array<i64: 128, 128>}, {pipeline_mode = #tpu.pipeline_mode<synchronous>, transform_indices = @transform_4, window_bounds = array<i64: 1, 128>}, {pipeline_mode = #tpu.pipeline_mode<synchronous>, transform_indices = @transform_5, window_bounds = array<i64: 1, 128>}, {pipeline_mode = #tpu.pipeline_mode<synchronous>, transform_indices = @transform_6, window_bounds = array<i64: 1, 128>}, {transform_indices = @transform_7, window_bounds = array<i64: 1, 8, 128>}]} {
    %c0 = arith.constant 0 : index
    %c0_0 = arith.constant 0 : index
    %c0_1 = arith.constant 0 : index
    %0 = vector.load %arg1[%c0, %c0_0, %c0_1] : memref<1x8x128xbf16, #tpu.memory_space<vmem>>, vector<1x8x128xbf16>
    %1 = vector.shape_cast %0 : vector<1x8x128xbf16> to vector<8x128xbf16>
    %c0_2 = arith.constant 0 : index
    %c0_3 = arith.constant 0 : index
    %2 = vector.load %arg2[%c0_2, %c0_3] : memref<128x384xbf16, #tpu.memory_space<vmem>>, vector<128x384xbf16>
    %cst = arith.constant dense<0.000000e+00> : vector<8x384xf32>
    %3 = tpu.matmul %1, %2, %cst {dimension_numbers = #tpu.dot_dimension_numbers<[1], [0], [0], [1], [0, 0, 1, 1], [], []>} : vector<8x128xbf16>, vector<128x384xbf16>, vector<8x384xf32> -> vector<8x384xf32>
    %c0_4 = arith.constant 0 : index
    %c0_5 = arith.constant 0 : index
    %4 = vector.load %arg3[%c0_4, %c0_5] : memref<1x384xf32, #tpu.memory_space<vmem>>, vector<1x384xf32>
    %5 = vector.broadcast %4 : vector<1x384xf32> to vector<8x384xf32>
    %6 = arith.addf %3, %5 : vector<8x384xf32>
    %7 = vector.extract_strided_slice %6 {offsets = [0, 0], sizes = [8, 32], strides = [1, 1]} : vector<8x384xf32> to vector<8x32xf32>
    %cst_6 = arith.constant 0.176776692 : f32
    %8 = vector.broadcast %cst_6 : f32 to vector<8x32xf32>
    %9 = arith.mulf %7, %8 : vector<8x32xf32>
    %10 = vector.extract_strided_slice %6 {offsets = [0, 128], sizes = [8, 32], strides = [1, 1]} : vector<8x384xf32> to vector<8x32xf32>
    %11 = vector.extract_strided_slice %6 {offsets = [0, 256], sizes = [8, 32], strides = [1, 1]} : vector<8x384xf32> to vector<8x32xf32>
    %cst_7 = arith.constant dense<0.000000e+00> : vector<8x8xf32>
    %12 = tpu.matmul %9, %10, %cst_7 {dimension_numbers = #tpu.dot_dimension_numbers<[1], [1], [0], [0], [0, 0, 1, 0], [], []>} : vector<8x32xf32>, vector<8x32xf32>, vector<8x8xf32> -> vector<8x8xf32>
    %cst_8 = arith.constant dense<0xFF800000> : vector<8xf32>
    %13 = vector.multi_reduction <maximumf>, %12, %cst_8 [1] : vector<8x8xf32> to vector<8xf32>
    %14 = vector.shape_cast %13 : vector<8xf32> to vector<8x1xf32>
    %15 = vector.broadcast %14 : vector<8x1xf32> to vector<8x8xf32>
    %16 = arith.subf %12, %15 : vector<8x8xf32>
    %17 = math.exp %16 : vector<8x8xf32>
    %cst_9 = arith.constant dense<0.000000e+00> : vector<8xf32>
    %18 = vector.multi_reduction <add>, %17, %cst_9 [1] : vector<8x8xf32> to vector<8xf32>
    %19 = vector.shape_cast %18 : vector<8xf32> to vector<8x1xf32>
    %20 = tpu.reciprocal %19 {approx = true} : vector<8x1xf32> -> vector<8x1xf32>
    %21 = vector.broadcast %20 : vector<8x1xf32> to vector<8x8xf32>
    %22 = arith.mulf %17, %21 : vector<8x8xf32>
    %cst_10 = arith.constant dense<0.000000e+00> : vector<8x32xf32>
    %23 = tpu.matmul %22, %11, %cst_10 {dimension_numbers = #tpu.dot_dimension_numbers<[1], [0], [0], [1], [0, 0, 1, 1], [], []>} : vector<8x8xf32>, vector<8x32xf32>, vector<8x32xf32> -> vector<8x32xf32>
    %24 = vector.extract_strided_slice %6 {offsets = [0, 32], sizes = [8, 32], strides = [1, 1]} : vector<8x384xf32> to vector<8x32xf32>
    %cst_11 = arith.constant 0.176776692 : f32
    %25 = vector.broadcast %cst_11 : f32 to vector<8x32xf32>
    %26 = arith.mulf %24, %25 : vector<8x32xf32>
    %27 = vector.extract_strided_slice %6 {offsets = [0, 160], sizes = [8, 32], strides = [1, 1]} : vector<8x384xf32> to vector<8x32xf32>
    %28 = vector.extract_strided_slice %6 {offsets = [0, 288], sizes = [8, 32], strides = [1, 1]} : vector<8x384xf32> to vector<8x32xf32>
    %cst_12 = arith.constant dense<0.000000e+00> : vector<8x8xf32>
    %29 = tpu.matmul %26, %27, %cst_12 {dimension_numbers = #tpu.dot_dimension_numbers<[1], [1], [0], [0], [0, 0, 1, 0], [], []>} : vector<8x32xf32>, vector<8x32xf32>, vector<8x8xf32> -> vector<8x8xf32>
    %cst_13 = arith.constant dense<0xFF800000> : vector<8xf32>
    %30 = vector.multi_reduction <maximumf>, %29, %cst_13 [1] : vector<8x8xf32> to vector<8xf32>
    %31 = vector.shape_cast %30 : vector<8xf32> to vector<8x1xf32>
    %32 = vector.broadcast %31 : vector<8x1xf32> to vector<8x8xf32>
    %33 = arith.subf %29, %32 : vector<8x8xf32>
    %34 = math.exp %33 : vector<8x8xf32>
    %cst_14 = arith.constant dense<0.000000e+00> : vector<8xf32>
    %35 = vector.multi_reduction <add>, %34, %cst_14 [1] : vector<8x8xf32> to vector<8xf32>
    %36 = vector.shape_cast %35 : vector<8xf32> to vector<8x1xf32>
    %37 = tpu.reciprocal %36 {approx = true} : vector<8x1xf32> -> vector<8x1xf32>
    %38 = vector.broadcast %37 : vector<8x1xf32> to vector<8x8xf32>
    %39 = arith.mulf %34, %38 : vector<8x8xf32>
    %cst_15 = arith.constant dense<0.000000e+00> : vector<8x32xf32>
    %40 = tpu.matmul %39, %28, %cst_15 {dimension_numbers = #tpu.dot_dimension_numbers<[1], [0], [0], [1], [0, 0, 1, 1], [], []>} : vector<8x8xf32>, vector<8x32xf32>, vector<8x32xf32> -> vector<8x32xf32>
    %41 = vector.extract_strided_slice %6 {offsets = [0, 64], sizes = [8, 32], strides = [1, 1]} : vector<8x384xf32> to vector<8x32xf32>
    %cst_16 = arith.constant 0.176776692 : f32
    %42 = vector.broadcast %cst_16 : f32 to vector<8x32xf32>
    %43 = arith.mulf %41, %42 : vector<8x32xf32>
    %44 = vector.extract_strided_slice %6 {offsets = [0, 192], sizes = [8, 32], strides = [1, 1]} : vector<8x384xf32> to vector<8x32xf32>
    %45 = vector.extract_strided_slice %6 {offsets = [0, 320], sizes = [8, 32], strides = [1, 1]} : vector<8x384xf32> to vector<8x32xf32>
    %cst_17 = arith.constant dense<0.000000e+00> : vector<8x8xf32>
    %46 = tpu.matmul %43, %44, %cst_17 {dimension_numbers = #tpu.dot_dimension_numbers<[1], [1], [0], [0], [0, 0, 1, 0], [], []>} : vector<8x32xf32>, vector<8x32xf32>, vector<8x8xf32> -> vector<8x8xf32>
    %cst_18 = arith.constant dense<0xFF800000> : vector<8xf32>
    %47 = vector.multi_reduction <maximumf>, %46, %cst_18 [1] : vector<8x8xf32> to vector<8xf32>
    %48 = vector.shape_cast %47 : vector<8xf32> to vector<8x1xf32>
    %49 = vector.broadcast %48 : vector<8x1xf32> to vector<8x8xf32>
    %50 = arith.subf %46, %49 : vector<8x8xf32>
    %51 = math.exp %50 : vector<8x8xf32>
    %cst_19 = arith.constant dense<0.000000e+00> : vector<8xf32>
    %52 = vector.multi_reduction <add>, %51, %cst_19 [1] : vector<8x8xf32> to vector<8xf32>
    %53 = vector.shape_cast %52 : vector<8xf32> to vector<8x1xf32>
    %54 = tpu.reciprocal %53 {approx = true} : vector<8x1xf32> -> vector<8x1xf32>
    %55 = vector.broadcast %54 : vector<8x1xf32> to vector<8x8xf32>
    %56 = arith.mulf %51, %55 : vector<8x8xf32>
    %cst_20 = arith.constant dense<0.000000e+00> : vector<8x32xf32>
    %57 = tpu.matmul %56, %45, %cst_20 {dimension_numbers = #tpu.dot_dimension_numbers<[1], [0], [0], [1], [0, 0, 1, 1], [], []>} : vector<8x8xf32>, vector<8x32xf32>, vector<8x32xf32> -> vector<8x32xf32>
    %58 = vector.extract_strided_slice %6 {offsets = [0, 96], sizes = [8, 32], strides = [1, 1]} : vector<8x384xf32> to vector<8x32xf32>
    %cst_21 = arith.constant 0.176776692 : f32
    %59 = vector.broadcast %cst_21 : f32 to vector<8x32xf32>
    %60 = arith.mulf %58, %59 : vector<8x32xf32>
    %61 = vector.extract_strided_slice %6 {offsets = [0, 224], sizes = [8, 32], strides = [1, 1]} : vector<8x384xf32> to vector<8x32xf32>
    %62 = vector.extract_strided_slice %6 {offsets = [0, 352], sizes = [8, 32], strides = [1, 1]} : vector<8x384xf32> to vector<8x32xf32>
    %cst_22 = arith.constant dense<0.000000e+00> : vector<8x8xf32>
    %63 = tpu.matmul %60, %61, %cst_22 {dimension_numbers = #tpu.dot_dimension_numbers<[1], [1], [0], [0], [0, 0, 1, 0], [], []>} : vector<8x32xf32>, vector<8x32xf32>, vector<8x8xf32> -> vector<8x8xf32>
    %cst_23 = arith.constant dense<0xFF800000> : vector<8xf32>
    %64 = vector.multi_reduction <maximumf>, %63, %cst_23 [1] : vector<8x8xf32> to vector<8xf32>
    %65 = vector.shape_cast %64 : vector<8xf32> to vector<8x1xf32>
    %66 = vector.broadcast %65 : vector<8x1xf32> to vector<8x8xf32>
    %67 = arith.subf %63, %66 : vector<8x8xf32>
    %68 = math.exp %67 : vector<8x8xf32>
    %cst_24 = arith.constant dense<0.000000e+00> : vector<8xf32>
    %69 = vector.multi_reduction <add>, %68, %cst_24 [1] : vector<8x8xf32> to vector<8xf32>
    %70 = vector.shape_cast %69 : vector<8xf32> to vector<8x1xf32>
    %71 = tpu.reciprocal %70 {approx = true} : vector<8x1xf32> -> vector<8x1xf32>
    %72 = vector.broadcast %71 : vector<8x1xf32> to vector<8x8xf32>
    %73 = arith.mulf %68, %72 : vector<8x8xf32>
    %cst_25 = arith.constant dense<0.000000e+00> : vector<8x32xf32>
    %74 = tpu.matmul %73, %62, %cst_25 {dimension_numbers = #tpu.dot_dimension_numbers<[1], [0], [0], [1], [0, 0, 1, 1], [], []>} : vector<8x8xf32>, vector<8x32xf32>, vector<8x32xf32> -> vector<8x32xf32>
    %75 = tpu.concatenate %23, %40, %57, %74 in 1 : vector<8x32xf32>, vector<8x32xf32>, vector<8x32xf32>, vector<8x32xf32> -> vector<8x128xf32>
    %76 = arith.truncf %75 : vector<8x128xf32> to vector<8x128xbf16>
    %c0_26 = arith.constant 0 : index
    %c0_27 = arith.constant 0 : index
    %77 = vector.load %arg4[%c0_26, %c0_27] : memref<128x128xbf16, #tpu.memory_space<vmem>>, vector<128x128xbf16>
    %cst_28 = arith.constant dense<0.000000e+00> : vector<8x128xf32>
    %78 = tpu.matmul %76, %77, %cst_28 {dimension_numbers = #tpu.dot_dimension_numbers<[1], [0], [0], [1], [0, 0, 1, 1], [], []>} : vector<8x128xbf16>, vector<128x128xbf16>, vector<8x128xf32> -> vector<8x128xf32>
    %c0_29 = arith.constant 0 : index
    %c0_30 = arith.constant 0 : index
    %79 = vector.load %arg5[%c0_29, %c0_30] : memref<1x128xf32, #tpu.memory_space<vmem>>, vector<1x128xf32>
    %80 = vector.broadcast %79 : vector<1x128xf32> to vector<8x128xf32>
    %81 = arith.addf %78, %80 : vector<8x128xf32>
    %82 = arith.extf %1 : vector<8x128xbf16> to vector<8x128xf32>
    %83 = arith.addf %81, %82 : vector<8x128xf32>
    %cst_31 = arith.constant dense<0.000000e+00> : vector<8xf32>
    %84 = vector.multi_reduction <add>, %83, %cst_31 [1] : vector<8x128xf32> to vector<8xf32>
    %85 = vector.shape_cast %84 : vector<8xf32> to vector<8x1xf32>
    %cst_32 = arith.constant 1.280000e+02 : f32
    %86 = vector.broadcast %cst_32 : f32 to vector<8x1xf32>
    %87 = arith.divf %85, %86 : vector<8x1xf32>
    %88 = vector.broadcast %87 : vector<8x1xf32> to vector<8x128xf32>
    %89 = arith.subf %83, %88 : vector<8x128xf32>
    %90 = arith.mulf %89, %89 : vector<8x128xf32>
    %cst_33 = arith.constant dense<0.000000e+00> : vector<8xf32>
    %91 = vector.multi_reduction <add>, %90, %cst_33 [1] : vector<8x128xf32> to vector<8xf32>
    %92 = vector.shape_cast %91 : vector<8xf32> to vector<8x1xf32>
    %cst_34 = arith.constant 1.280000e+02 : f32
    %93 = vector.broadcast %cst_34 : f32 to vector<8x1xf32>
    %94 = arith.divf %92, %93 : vector<8x1xf32>
    %cst_35 = arith.constant 9.99999996E-13 : f32
    %95 = vector.broadcast %cst_35 : f32 to vector<8x1xf32>
    %96 = arith.addf %94, %95 : vector<8x1xf32>
    %97 = math.rsqrt %96 : vector<8x1xf32>
    %98 = vector.broadcast %97 : vector<8x1xf32> to vector<8x128xf32>
    %99 = arith.mulf %89, %98 : vector<8x128xf32>
    %c0_36 = arith.constant 0 : index
    %c0_37 = arith.constant 0 : index
    %100 = vector.load %arg6[%c0_36, %c0_37] : memref<1x128xf32, #tpu.memory_space<vmem>>, vector<1x128xf32>
    %101 = vector.broadcast %100 : vector<1x128xf32> to vector<8x128xf32>
    %102 = arith.mulf %99, %101 : vector<8x128xf32>
    %c0_38 = arith.constant 0 : index
    %c0_39 = arith.constant 0 : index
    %103 = vector.load %arg7[%c0_38, %c0_39] : memref<1x128xf32, #tpu.memory_space<vmem>>, vector<1x128xf32>
    %104 = vector.broadcast %103 : vector<1x128xf32> to vector<8x128xf32>
    %105 = arith.addf %102, %104 : vector<8x128xf32>
    %106 = arith.truncf %105 : vector<8x128xf32> to vector<8x128xbf16>
    %c0_40 = arith.constant 0 : index
    %c0_41 = arith.constant 0 : index
    %c0_42 = arith.constant 0 : index
    %107 = vector.load %arg8[%c0_40, %c0_41, %c0_42] : memref<1x8x128xbf16, #tpu.memory_space<vmem>>, vector<1x8x128xbf16>
    %108 = vector.shape_cast %107 : vector<1x8x128xbf16> to vector<8x128xbf16>
    %109 = vector.shape_cast %106 : vector<8x128xbf16> to vector<1x8x128xbf16>
    tpu.vector_store %arg8[%c0_40, %c0_41, %c0_42], %109 {strides = array<i32>} : memref<1x8x128xbf16, #tpu.memory_space<vmem>>, vector<1x8x128xbf16>,
    return
  }
  func.func @transform_0(%arg0: i32) -> (i32, i32, i32) {
    %c0_i32 = arith.constant 0 : i32
    %c0_i32_0 = arith.constant 0 : i32
    %c0_i32_1 = arith.constant 0 : i32
    return %arg0, %c0_i32, %c0_i32_0 : i32, i32, i32
  }
  func.func @transform_1(%arg0: i32) -> (i32, i32) {
    %c0_i32 = arith.constant 0 : i32
    %c0_i32_0 = arith.constant 0 : i32
    %c0_i32_1 = arith.constant 0 : i32
    return %c0_i32, %c0_i32_0 : i32, i32
  }
  func.func @transform_2(%arg0: i32) -> (i32, i32) {
    %c0_i32 = arith.constant 0 : i32
    %c0_i32_0 = arith.constant 0 : i32
    %c0_i32_1 = arith.constant 0 : i32
    return %c0_i32, %c0_i32_0 : i32, i32
  }
  func.func @transform_3(%arg0: i32) -> (i32, i32) {
    %c0_i32 = arith.constant 0 : i32
    %c0_i32_0 = arith.constant 0 : i32
    %c0_i32_1 = arith.constant 0 : i32
    return %c0_i32, %c0_i32_0 : i32, i32
  }
  func.func @transform_4(%arg0: i32) -> (i32, i32) {
    %c0_i32 = arith.constant 0 : i32
    %c0_i32_0 = arith.constant 0 : i32
    %c0_i32_1 = arith.constant 0 : i32
    return %c0_i32, %c0_i32_0 : i32, i32
  }
  func.func @transform_5(%arg0: i32) -> (i32, i32) {
    %c0_i32 = arith.constant 0 : i32
    %c0_i32_0 = arith.constant 0 : i32
    %c0_i32_1 = arith.constant 0 : i32
    return %c0_i32, %c0_i32_0 : i32, i32
  }
  func.func @transform_6(%arg0: i32) -> (i32, i32) {
    %c0_i32 = arith.constant 0 : i32
    %c0_i32_0 = arith.constant 0 : i32
    %c0_i32_1 = arith.constant 0 : i32
    return %c0_i32, %c0_i32_0 : i32, i32
  }
  func.func @transform_7(%arg0: i32) -> (i32, i32, i32) {
    %c0_i32 = arith.constant 0 : i32
    %c0_i32_0 = arith.constant 0 : i32
    %c0_i32_1 = arith.constant 0 : i32
    return %arg0, %c0_i32, %c0_i32_0 : i32, i32, i32
  }
}

module attributes {stable_mosaic.version = 11 : i64} {
  func.func @_ffn_block_kernel(%arg0: i32, %arg1: memref<16x128xbf16, #tpu.memory_space<vmem>>, %arg2: memref<128x512xbf16, #tpu.memory_space<vmem>>, %arg3: memref<1x512xf32, #tpu.memory_space<vmem>>, %arg4: memref<512x128xbf16, #tpu.memory_space<vmem>>, %arg5: memref<1x128xf32, #tpu.memory_space<vmem>>, %arg6: memref<1x128xf32, #tpu.memory_space<vmem>>, %arg7: memref<1x128xf32, #tpu.memory_space<vmem>>, %arg8: memref<16x128xbf16, #tpu.memory_space<vmem>>) attributes {dimension_semantics = [#tpu.dimension_semantics<parallel>], iteration_bounds = array<i64: 1>, scalar_prefetch = 0 : i64, scratch_operands = 0 : i64, tpu.core_type = #tpu.core_type<tc>, window_params = [{transform_indices = @transform_0, window_bounds = array<i64: 16, 128>}, {pipeline_mode = #tpu.pipeline_mode<synchronous>, transform_indices = @transform_1, window_bounds = array<i64: 128, 512>}, {pipeline_mode = #tpu.pipeline_mode<synchronous>, transform_indices = @transform_2, window_bounds = array<i64: 1, 512>}, {pipeline_mode = #tpu.pipeline_mode<synchronous>, transform_indices = @transform_3, window_bounds = array<i64: 512, 128>}, {pipeline_mode = #tpu.pipeline_mode<synchronous>, transform_indices = @transform_4, window_bounds = array<i64: 1, 128>}, {pipeline_mode = #tpu.pipeline_mode<synchronous>, transform_indices = @transform_5, window_bounds = array<i64: 1, 128>}, {pipeline_mode = #tpu.pipeline_mode<synchronous>, transform_indices = @transform_6, window_bounds = array<i64: 1, 128>}, {transform_indices = @transform_7, window_bounds = array<i64: 16, 128>}]} {
    %c0 = arith.constant 0 : index
    %c0_0 = arith.constant 0 : index
    %0 = vector.load %arg1[%c0, %c0_0] : memref<16x128xbf16, #tpu.memory_space<vmem>>, vector<16x128xbf16>
    %c0_1 = arith.constant 0 : index
    %c0_2 = arith.constant 0 : index
    %1 = vector.load %arg2[%c0_1, %c0_2] : memref<128x512xbf16, #tpu.memory_space<vmem>>, vector<128x512xbf16>
    %cst = arith.constant dense<0.000000e+00> : vector<16x512xf32>
    %2 = tpu.matmul %0, %1, %cst {dimension_numbers = #tpu.dot_dimension_numbers<[1], [0], [0], [1], [0, 0, 1, 1], [], []>} : vector<16x128xbf16>, vector<128x512xbf16>, vector<16x512xf32> -> vector<16x512xf32>
    %c0_3 = arith.constant 0 : index
    %c0_4 = arith.constant 0 : index
    %3 = vector.load %arg3[%c0_3, %c0_4] : memref<1x512xf32, #tpu.memory_space<vmem>>, vector<1x512xf32>
    %4 = vector.broadcast %3 : vector<1x512xf32> to vector<16x512xf32>
    %5 = arith.addf %2, %4 : vector<16x512xf32>
    %cst_5 = arith.constant 5.000000e-01 : f32
    %6 = vector.broadcast %cst_5 : f32 to vector<16x512xf32>
    %7 = arith.mulf %6, %5 : vector<16x512xf32>
    %cst_6 = arith.constant 4.471500e-02 : f32
    %8 = vector.broadcast %cst_6 : f32 to vector<16x512xf32>
    %9 = arith.mulf %8, %5 : vector<16x512xf32>
    %10 = arith.mulf %9, %5 : vector<16x512xf32>
    %11 = arith.mulf %10, %5 : vector<16x512xf32>
    %12 = arith.addf %5, %11 : vector<16x512xf32>
    %cst_7 = arith.constant 0.797884583 : f32
    %13 = vector.broadcast %cst_7 : f32 to vector<16x512xf32>
    %14 = arith.mulf %13, %12 : vector<16x512xf32>
    %15 = math.tanh %14 : vector<16x512xf32>
    %cst_8 = arith.constant 1.000000e+00 : f32
    %16 = vector.broadcast %cst_8 : f32 to vector<16x512xf32>
    %17 = arith.addf %16, %15 : vector<16x512xf32>
    %18 = arith.mulf %7, %17 : vector<16x512xf32>
    %19 = arith.truncf %18 : vector<16x512xf32> to vector<16x512xbf16>
    %c0_9 = arith.constant 0 : index
    %c0_10 = arith.constant 0 : index
    %20 = vector.load %arg4[%c0_9, %c0_10] : memref<512x128xbf16, #tpu.memory_space<vmem>>, vector<512x128xbf16>
    %cst_11 = arith.constant dense<0.000000e+00> : vector<16x128xf32>
    %21 = tpu.matmul %19, %20, %cst_11 {dimension_numbers = #tpu.dot_dimension_numbers<[1], [0], [0], [1], [0, 0, 1, 1], [], []>} : vector<16x512xbf16>, vector<512x128xbf16>, vector<16x128xf32> -> vector<16x128xf32>
    %c0_12 = arith.constant 0 : index
    %c0_13 = arith.constant 0 : index
    %22 = vector.load %arg5[%c0_12, %c0_13] : memref<1x128xf32, #tpu.memory_space<vmem>>, vector<1x128xf32>
    %23 = vector.broadcast %22 : vector<1x128xf32> to vector<16x128xf32>
    %24 = arith.addf %21, %23 : vector<16x128xf32>
    %25 = arith.extf %0 : vector<16x128xbf16> to vector<16x128xf32>
    %26 = arith.addf %24, %25 : vector<16x128xf32>
    %cst_14 = arith.constant dense<0.000000e+00> : vector<16xf32>
    %27 = vector.multi_reduction <add>, %26, %cst_14 [1] : vector<16x128xf32> to vector<16xf32>
    %28 = vector.shape_cast %27 : vector<16xf32> to vector<16x1xf32>
    %cst_15 = arith.constant 1.280000e+02 : f32
    %29 = vector.broadcast %cst_15 : f32 to vector<16x1xf32>
    %30 = arith.divf %28, %29 : vector<16x1xf32>
    %31 = vector.broadcast %30 : vector<16x1xf32> to vector<16x128xf32>
    %32 = arith.subf %26, %31 : vector<16x128xf32>
    %33 = arith.mulf %32, %32 : vector<16x128xf32>
    %cst_16 = arith.constant dense<0.000000e+00> : vector<16xf32>
    %34 = vector.multi_reduction <add>, %33, %cst_16 [1] : vector<16x128xf32> to vector<16xf32>
    %35 = vector.shape_cast %34 : vector<16xf32> to vector<16x1xf32>
    %cst_17 = arith.constant 1.280000e+02 : f32
    %36 = vector.broadcast %cst_17 : f32 to vector<16x1xf32>
    %37 = arith.divf %35, %36 : vector<16x1xf32>
    %cst_18 = arith.constant 9.99999996E-13 : f32
    %38 = vector.broadcast %cst_18 : f32 to vector<16x1xf32>
    %39 = arith.addf %37, %38 : vector<16x1xf32>
    %40 = math.rsqrt %39 : vector<16x1xf32>
    %41 = vector.broadcast %40 : vector<16x1xf32> to vector<16x128xf32>
    %42 = arith.mulf %32, %41 : vector<16x128xf32>
    %c0_19 = arith.constant 0 : index
    %c0_20 = arith.constant 0 : index
    %43 = vector.load %arg6[%c0_19, %c0_20] : memref<1x128xf32, #tpu.memory_space<vmem>>, vector<1x128xf32>
    %44 = vector.broadcast %43 : vector<1x128xf32> to vector<16x128xf32>
    %45 = arith.mulf %42, %44 : vector<16x128xf32>
    %c0_21 = arith.constant 0 : index
    %c0_22 = arith.constant 0 : index
    %46 = vector.load %arg7[%c0_21, %c0_22] : memref<1x128xf32, #tpu.memory_space<vmem>>, vector<1x128xf32>
    %47 = vector.broadcast %46 : vector<1x128xf32> to vector<16x128xf32>
    %48 = arith.addf %45, %47 : vector<16x128xf32>
    %49 = arith.truncf %48 : vector<16x128xf32> to vector<16x128xbf16>
    %c0_23 = arith.constant 0 : index
    %c0_24 = arith.constant 0 : index
    %50 = vector.load %arg8[%c0_23, %c0_24] : memref<16x128xbf16, #tpu.memory_space<vmem>>, vector<16x128xbf16>
    tpu.vector_store %arg8[%c0_23, %c0_24], %49 {strides = array<i32>} : memref<16x128xbf16, #tpu.memory_space<vmem>>, vector<16x128xbf16>,
    return
  }
  func.func @transform_0(%arg0: i32) -> (i32, i32) {
    %c0_i32 = arith.constant 0 : i32
    %c0_i32_0 = arith.constant 0 : i32
    return %arg0, %c0_i32 : i32, i32
  }
  func.func @transform_1(%arg0: i32) -> (i32, i32) {
    %c0_i32 = arith.constant 0 : i32
    %c0_i32_0 = arith.constant 0 : i32
    %c0_i32_1 = arith.constant 0 : i32
    return %c0_i32, %c0_i32_0 : i32, i32
  }
  func.func @transform_2(%arg0: i32) -> (i32, i32) {
    %c0_i32 = arith.constant 0 : i32
    %c0_i32_0 = arith.constant 0 : i32
    %c0_i32_1 = arith.constant 0 : i32
    return %c0_i32, %c0_i32_0 : i32, i32
  }
  func.func @transform_3(%arg0: i32) -> (i32, i32) {
    %c0_i32 = arith.constant 0 : i32
    %c0_i32_0 = arith.constant 0 : i32
    %c0_i32_1 = arith.constant 0 : i32
    return %c0_i32, %c0_i32_0 : i32, i32
  }
  func.func @transform_4(%arg0: i32) -> (i32, i32) {
    %c0_i32 = arith.constant 0 : i32
    %c0_i32_0 = arith.constant 0 : i32
    %c0_i32_1 = arith.constant 0 : i32
    return %c0_i32, %c0_i32_0 : i32, i32
  }
  func.func @transform_5(%arg0: i32) -> (i32, i32) {
    %c0_i32 = arith.constant 0 : i32
    %c0_i32_0 = arith.constant 0 : i32
    %c0_i32_1 = arith.constant 0 : i32
    return %c0_i32, %c0_i32_0 : i32, i32
  }
  func.func @transform_6(%arg0: i32) -> (i32, i32) {
    %c0_i32 = arith.constant 0 : i32
    %c0_i32_0 = arith.constant 0 : i32
    %c0_i32_1 = arith.constant 0 : i32
    return %c0_i32, %c0_i32_0 : i32, i32
  }
  func.func @transform_7(%arg0: i32) -> (i32, i32) {
    %c0_i32 = arith.constant 0 : i32
    %c0_i32_0 = arith.constant 0 : i32
    return %arg0, %c0_i32 : i32, i32
  }
}

module attributes {stable_mosaic.version = 11 : i64} {
  func.func @_dense_kernel(%arg0: i32, %arg1: i32, %arg2: i32, %arg3: memref<16x128xbf16, #tpu.memory_space<vmem>>, %arg4: memref<128x128xbf16, #tpu.memory_space<vmem>>, %arg5: memref<1x128xf32, #tpu.memory_space<vmem>>, %arg6: memref<16x128xbf16, #tpu.memory_space<vmem>>, %arg7: memref<16x128xf32, #tpu.memory_space<vmem>>) attributes {dimension_semantics = [#tpu.dimension_semantics<parallel>, #tpu.dimension_semantics<parallel>, #tpu.dimension_semantics<arbitrary>], iteration_bounds = array<i64: 1, 1, 1>, scalar_prefetch = 0 : i64, scratch_operands = 1 : i64, tpu.core_type = #tpu.core_type<tc>, window_params = [{transform_indices = @transform_0, window_bounds = array<i64: 16, 128>}, {transform_indices = @transform_1, window_bounds = array<i64: 128, 128>}, {transform_indices = @transform_2, window_bounds = array<i64: 1, 128>}, {transform_indices = @transform_3, window_bounds = array<i64: 16, 128>}]} {
    %c0_i32 = arith.constant 0 : i32
    %0 = arith.cmpi eq, %arg2, %c0_i32 : i32
    %1 = arith.extui %0 : i1 to i32
    %c0_i32_0 = arith.constant 0 : i32
    %2 = arith.cmpi ne, %1, %c0_i32_0 : i32
    scf.if %2 {
      %cst_10 = arith.constant 0.000000e+00 : f32
      %12 = vector.broadcast %cst_10 : f32 to vector<16x128xf32>
      %c0_11 = arith.constant 0 : index
      %c0_12 = arith.constant 0 : index
      %13 = vector.load %arg7[%c0_11, %c0_12] : memref<16x128xf32, #tpu.memory_space<vmem>>, vector<16x128xf32>
      tpu.vector_store %arg7[%c0_11, %c0_12], %12 {strides = array<i32>} : memref<16x128xf32, #tpu.memory_space<vmem>>, vector<16x128xf32>,
    } else {
    }
    %c0 = arith.constant 0 : index
    %c0_1 = arith.constant 0 : index
    %3 = vector.load %arg7[%c0, %c0_1] : memref<16x128xf32, #tpu.memory_space<vmem>>, vector<16x128xf32>
    %c0_2 = arith.constant 0 : index
    %c0_3 = arith.constant 0 : index
    %4 = vector.load %arg3[%c0_2, %c0_3] : memref<16x128xbf16, #tpu.memory_space<vmem>>, vector<16x128xbf16>
    %c0_4 = arith.constant 0 : index
    %c0_5 = arith.constant 0 : index
    %5 = vector.load %arg4[%c0_4, %c0_5] : memref<128x128xbf16, #tpu.memory_space<vmem>>, vector<128x128xbf16>
    %cst = arith.constant dense<0.000000e+00> : vector<16x128xf32>
    %6 = tpu.matmul %4, %5, %cst {dimension_numbers = #tpu.dot_dimension_numbers<[1], [0], [0], [1], [0, 0, 1, 1], [], []>} : vector<16x128xbf16>, vector<128x128xbf16>, vector<16x128xf32> -> vector<16x128xf32>
    %7 = arith.addf %3, %6 : vector<16x128xf32>
    %c0_6 = arith.constant 0 : index
    %c0_7 = arith.constant 0 : index
    %8 = vector.load %arg7[%c0_6, %c0_7] : memref<16x128xf32, #tpu.memory_space<vmem>>, vector<16x128xf32>
    tpu.vector_store %arg7[%c0_6, %c0_7], %7 {strides = array<i32>} : memref<16x128xf32, #tpu.memory_space<vmem>>, vector<16x128xf32>,
    %c0_i32_8 = arith.constant 0 : i32
    %9 = arith.cmpi eq, %arg2, %c0_i32_8 : i32
    %10 = arith.extui %9 : i1 to i32
    %c0_i32_9 = arith.constant 0 : i32
    %11 = arith.cmpi ne, %10, %c0_i32_9 : i32
    scf.if %11 {
      %c0_10 = arith.constant 0 : index
      %c0_11 = arith.constant 0 : index
      %12 = vector.load %arg7[%c0_10, %c0_11] : memref<16x128xf32, #tpu.memory_space<vmem>>, vector<16x128xf32>
      %c0_12 = arith.constant 0 : index
      %c0_13 = arith.constant 0 : index
      %13 = vector.load %arg5[%c0_12, %c0_13] : memref<1x128xf32, #tpu.memory_space<vmem>>, vector<1x128xf32>
      %14 = vector.broadcast %13 : vector<1x128xf32> to vector<16x128xf32>
      %15 = arith.addf %12, %14 : vector<16x128xf32>
      %16 = arith.truncf %15 : vector<16x128xf32> to vector<16x128xbf16>
      %c0_14 = arith.constant 0 : index
      %c0_15 = arith.constant 0 : index
      %17 = vector.load %arg6[%c0_14, %c0_15] : memref<16x128xbf16, #tpu.memory_space<vmem>>, vector<16x128xbf16>
      tpu.vector_store %arg6[%c0_14, %c0_15], %16 {strides = array<i32>} : memref<16x128xbf16, #tpu.memory_space<vmem>>, vector<16x128xbf16>,
    } else {
    }
    return
  }
  func.func @transform_0(%arg0: i32, %arg1: i32, %arg2: i32) -> (i32, i32) {
    %c0_i32 = arith.constant 0 : i32
    return %arg0, %arg2 : i32, i32
  }
  func.func @transform_1(%arg0: i32, %arg1: i32, %arg2: i32) -> (i32, i32) {
    %c0_i32 = arith.constant 0 : i32
    return %arg2, %arg1 : i32, i32
  }
  func.func @transform_2(%arg0: i32, %arg1: i32, %arg2: i32) -> (i32, i32) {
    %c0_i32 = arith.constant 0 : i32
    %c0_i32_0 = arith.constant 0 : i32
    return %c0_i32, %arg1 : i32, i32
  }
  func.func @transform_3(%arg0: i32, %arg1: i32, %arg2: i32) -> (i32, i32) {
    %c0_i32 = arith.constant 0 : i32
    return %arg0, %arg1 : i32, i32
  }
}

</mosaic_0001>

<bundles_post_ra>
// kernel: bert_ner_forward.6
= control target key start
LH: loop header
LB: loop body
LE: loop exit
PB: predicated region body
PF: predicated region fallthrough
CT: control target
= control target key end

     0   :  { %8 = vsyncpa [#allocation3], 0  ;;  %s220_s0 = inlined_call_operand.vmem [shape: bf16[16,128], index: 0, kind: input, shape index: {}]   ;;  %s221_s1 = inlined_call_operand.hbm [shape: f32[1,128], index: 1, kind: input, shape index: {}]   ;;  %s222_s2 = inlined_call_operand.hbm [shape: f32[1,128], index: 2, kind: input, shape index: {}]   ;;  %s223_s3 = inlined_call_operand.vmem [shape: bf16[16,128], index: 3, kind: output, shape index: {}]  }
   0x1   :  { %9 = vsyncpa [#allocation5], 0  ;;  %s168_s12 = smov [#allocation2]   ;;  %s169_s14 = smov [#allocation4]  }
   0x2   :  { %s18_s13 = sshll.u32 %s168_s12, 4  ;;  %s28_s15 = sshll.u32 %s169_s14, 4  ;;  %s19_s13 = int_to_ptr.vmem [resolvable:$true] %s18_s13  ;;  %s29_s15 = int_to_ptr.vmem [resolvable:$true] %s28_s15 }
   0x3   :  { %s120_s18 = scalar_lea.hbm %s221_s1, 16 }
   0x4   :  { %p121_p0 = scmp.ne.s32.totalorder %s221_s1, %s120_s18  ;;  %p124_p1 = scmp.lt.u32.totalorder %s120_s18, %s221_s1 }
   0x6   :  { %p126_p2 = pnand %p124_p1, %p121_p0 }
   0x8   :  { %129 = shalt.err (!%p126_p2)
}
   0x9   :  { %s130_s23 = scalar_lea.vmem %s19_s13, 16  ;;  %s134_s24 = scalar_lea.vmem %s19_s13, 32 }
   0xa   :  { %p131_p3 = scmp.ne.s32.totalorder %s19_s13, %s130_s23  ;;  %p135_p4 = scmp.lt.s32.totalorder %s19_s13, %s19_s13 }
   0xb   :  { %p136_p5 = scmp.lt.s32.totalorder %s134_s24, %s130_s23 }
   0xd   :  { %p137_p6 = por %p136_p5, %p135_p4 }
   0xf   :  { %p138_p7 = pnand %p137_p6, %p131_p3 }
  0x11   :  { %141 = shalt.err (!%p138_p7)
}
  0x12   :  { %21 = dma.hbm_to_vmem [thread:$0]  %s221_s1, 16, %s19_s13, [#allocation3]  }
  0x13   :  { %s142_s29 = scalar_lea.hbm %s222_s2, 16 }
  0x14   :  { %p143_p8 = scmp.ne.s32.totalorder %s222_s2, %s142_s29  ;;  %p146_p9 = scmp.lt.u32.totalorder %s142_s29, %s222_s2 }
  0x16   :  { %p148_p10 = pnand %p146_p9, %p143_p8 }
  0x18   :  { %151 = shalt.err (!%p148_p10)
}
  0x19   :  { %s152_s7 = scalar_lea.vmem %s29_s15, 16  ;;  %s156_s8 = scalar_lea.vmem %s29_s15, 32 }
  0x1a   :  { %p153_p11 = scmp.ne.s32.totalorder %s29_s15, %s152_s7  ;;  %p157_p12 = scmp.lt.s32.totalorder %s29_s15, %s29_s15 }
  0x1b   :  { %p158_p13 = scmp.lt.s32.totalorder %s156_s8, %s152_s7 }
  0x1d   :  { %p159_p0 = por %p158_p13, %p157_p12 }
  0x1f   :  { %p160_p1 = pnand %p159_p0, %p153_p11 }
  0x21   :  { %163 = shalt.err (!%p160_p1)
}
  0x22   :  { %31 = dma.hbm_to_vmem [thread:$0]  %s222_s2, 16, %s29_s15, [#allocation5]  }
  0x23   :  { %164 = dma.done.wait [#allocation3], 16  }
  0x24   :  { %165 = vsyncadd [#allocation3], 4294967280 }
  0x25   :  { %166 = dma.done.wait [#allocation5], 16  }
  0x26   :  { %167 = vsyncadd [#allocation5], 4294967280  ;;  %v106_v0 = vld [vmem:[%s220_s0] sm:$0xff]  }
  0x27   :  { %v107_v1 = vunpack.c.l.bf16 %v106_v0  ;;  %v108_v2 = vunpack.c.h.bf16 %v106_v0  ;;  %v99_v19 = vld [vmem:[#allocation2] ss:$0 sm:$0xff]  ;;  %v100_v23 = vld [vmem:[#allocation4] ss:$0 sm:$0xff] }
  0x29   :  { %42 = vadd.xlane.f32.xlu0 %v107_v1 }
  0x2d   :  { %44 = vadd.xlane.f32.xlu0 %v108_v2 }
  0xb6   :  { %v43_v3 = vpop.xlane.xlu0 %42 }
  0xb7   :  { %v47_v4 = vmul.f32 0.0078125, %v43_v3 }
  0xb9   :  { %v49_v5 = vsub.f32 %v107_v1, %v47_v4 }
  0xba   :  { %v45_v6 = vpop.xlane.xlu0 %44 }
  0xbb   :  { %v48_v7 = vmul.f32 0.0078125, %v45_v6  ;;  %v51_v8 = vmul.f32 %v49_v5, %v49_v5 }
  0xbd   :  { %v50_v9 = vsub.f32 %v108_v2, %v48_v7  ;;  %53 = vadd.xlane.f32.xlu1 %v51_v8 }
  0xbf   :  { %v52_v10 = vmul.f32 %v50_v9, %v50_v9 }
  0xc1   :  { %55 = vadd.xlane.f32.xlu1 %v52_v10 }
 0x14a   :  { %v54_v11 = vpop.xlane.xlu1 %53 }
 0x14b   :  { %v57_v12 = vmul.f32 0.0078125, %v54_v11 }
 0x14d   :  { %v59_v13 = vadd.f32 1e-12, %v57_v12 }
 0x14e   :  { %v56_v14 = vpop.xlane.xlu1 %55 }
 0x14f   :  { %116 = vrsqrt.f32 %v59_v13  ;;  %v58_v15 = vmul.f32 0.0078125, %v56_v14 }
 0x151   :  { %v60_v16 = vadd.f32 1e-12, %v58_v15 }
 0x153   :  { %118 = vrsqrt.f32 %v60_v16 }
 0x159   :  { %v117_v17 = vpop.eup %116 }
 0x15a   :  { %v63_v18 = vmul.f32 %v117_v17, %v49_v5 }
 0x15c   :  { %v72_v21 = vmul.f32 %v99_v19, %v63_v18 }
 0x15d   :  { %v119_v20 = vpop.eup %118 }
 0x15e   :  { %v64_v22 = vmul.f32 %v119_v20, %v50_v9  ;;  %v81_v25 = vadd.f32 %v100_v23, %v72_v21 }
 0x160   :  { %v73_v24 = vmul.f32 %v99_v19, %v64_v22 }
 0x162   :  { %v82_v26 = vadd.f32 %v100_v23, %v73_v24 }
 0x164   :  { %v112_v27 = vpack.c.bf16 %v82_v26, %v81_v25 }
 0x166   :  { %113 = vst [vmem:[%s223_s3] sm:$0xff] %v112_v27  }
 0x167   :  { %97 = vsyncpa [#allocation3], 1 }
 0x168   :  { %98 = vsyncpa [#allocation5], 1 }

// kernel: bert_ner_forward.8
= control target key start
LH: loop header
LB: loop body
LE: loop exit
PB: predicated region body
PF: predicated region fallthrough
CT: control target
= control target key end

     0   :  { %12 = vsyncpa [#allocation3], 0  ;;  %s1081_s24 = smov [#allocation2]   ;;  %s1299_s0 = inlined_call_operand.vmem [shape: bf16[16,128], index: 0, kind: input, shape index: {}]   ;;  %s1300_s1 = inlined_call_operand.vmem [shape: bf16[128,512], index: 1, kind: input, shape index: {}]   ;;  %s1301_s2 = inlined_call_operand.vmem [shape: f32[1,512], index: 2, kind: input, shape index: {}]   ;;  %s1302_s3 = inlined_call_operand.hbm [shape: bf16[512,128], index: 3, kind: input, shape index: {}]   ;;  %s1303_s4 = inlined_call_operand.vmem [shape: f32[1,128], index: 4, kind: input, shape index: {}]   ;;  %s1304_s5 = inlined_call_operand.vmem [shape: f32[1,128], index: 5, kind: input, shape index: {}]   ;;  %s1305_s6 = inlined_call_operand.vmem [shape: f32[1,128], index: 6, kind: input, shape index: {}]   ;;  %s1306_s7 = inlined_call_operand.vmem [shape: bf16[16,128], index: 7, kind: output, shape index: {}]  }
   0x1   :  { %s24_s25 = sshll.u32 %s1081_s24, 4  ;;  %s1057_s28 = scalar_lea.hbm %s1302_s3, 4096  ;;  %s25_s25 = int_to_ptr.vmem [resolvable:$true] %s24_s25 }
   0x2   :  { %p1058_p0 = scmp.ne.s32.totalorder %s1302_s3, %s1057_s28  ;;  %p1061_p1 = scmp.lt.u32.totalorder %s1057_s28, %s1302_s3 }
   0x4   :  { %p1063_p2 = pnand %p1061_p1, %p1058_p0 }
   0x6   :  { %1066 = shalt.err (!%p1063_p2)
}
   0x7   :  { %s1067_s10 = scalar_lea.vmem %s25_s25, 4096  ;;  %p1072_p4 = scmp.lt.s32.totalorder %s25_s25, %s25_s25 }
   0x8   :  { %p1068_p3 = scmp.ne.s32.totalorder %s25_s25, %s1067_s10  ;;  %p1073_p5 = scmp.lt.s32.totalorder %s1067_s10, %s1067_s10 }
   0xa   :  { %p1074_p6 = por %p1073_p5, %p1072_p4 }
   0xc   :  { %p1075_p7 = pnand %p1074_p6, %p1068_p3 }
   0xe   :  { %1078 = shalt.err (!%p1075_p7)
}
   0xf   :  { %s1082_s11 = smov 64   ;;  %s1083_s12 = smov 4  }
  0x10   :  { %30 = dma.hbm_to_vmem [thread:$0]  %s1302_s3, 4096, %s25_s25, [#allocation3], %s1082_s11, %s1082_s11, %s1083_s12  }
  0x11   :  { %1079 = dma.done.wait [#allocation3], 4096  }
  0x12   :  { %1080 = vsyncadd [#allocation3], 4294963200  ;;  %v1084_v0 = vmov 0   ;;  %v955_v1 = vld [vmem:[%s1300_s1 + $0x4] ss:$16 sps:$4 sm:$0xff]   ;;  %v1008_v38 = vld [vmem:[#allocation2 + $0x48] sm:$0xff]  }
  0x13   :  { %295 = vmatprep.mubr.bf16.mxu0 %v1084_v0  ;;  %338 = vmatprep.mubr.bf16.mxu1 %v1084_v0  ;;  %v957_v2 = vld [vmem:[%s1300_s1 + $0xc] ss:$16 sps:$4 sm:$0xff]   ;;  %v959_v3 = vld [vmem:[%s1300_s1] ss:$16 sps:$4 sm:$0xff]   ;;  %v960_v4 = vld [vmem:[%s1300_s1 + $0x8] ss:$16 sps:$4 sm:$0xff]  }
  0x14   :  { %263 = vmatprep.subr.bf16.mxu0 %v955_v1  ;;  %306 = vmatprep.subr.bf16.mxu1 %v957_v2  ;;  %v961_v5 = vld [vmem:[%s1300_s1 + $0x24] ss:$16 sps:$4 sm:$0xff]   ;;  %v963_v6 = vld [vmem:[%s1300_s1 + $0x2c] ss:$16 sps:$4 sm:$0xff]   ;;  %v965_v7 = vld [vmem:[%s1300_s1 + $0x20] ss:$16 sps:$4 sm:$0xff]   ;;  %v77_v2 = vlaneseq }
  0x15   :  { %264 = vmatpush1.bf16.msra.mxu0 %v959_v3  ;;  %307 = vmatpush1.bf16.msra.mxu1 %v960_v4  ;;  %v966_v8 = vld [vmem:[%s1300_s1 + $0x28] ss:$16 sps:$4 sm:$0xff]   ;;  %v967_v9 = vld [vmem:[%s1300_s1 + $0x44] ss:$16 sps:$4 sm:$0xff]   ;;  %v969_v10 = vld [vmem:[%s1300_s1 + $0x4c] ss:$16 sps:$4 sm:$0xff]  }
  0x16   :  { %265 = vmatprep.subr.bf16.mxu0 %v961_v5  ;;  %308 = vmatprep.subr.bf16.mxu1 %v963_v6  ;;  %v971_v11 = vld [vmem:[%s1300_s1 + $0x40] ss:$16 sps:$4 sm:$0xff]   ;;  %v972_v12 = vld [vmem:[%s1300_s1 + $0x48] ss:$16 sps:$4 sm:$0xff]   ;;  %v973_v13 = vld [vmem:[%s1300_s1 + $0x64] ss:$16 sps:$4 sm:$0xff]  }
  0x17   :  { %v975_v14 = vld [vmem:[%s1300_s1 + $0x6c] ss:$16 sps:$4 sm:$0xff]   ;;  %v977_v15 = vld [vmem:[%s1300_s1 + $0x60] ss:$16 sps:$4 sm:$0xff]   ;;  %v978_v16 = vld [vmem:[%s1300_s1 + $0x68] ss:$16 sps:$4 sm:$0xff]  }
  0x18   :  { %v979_v17 = vld [vmem:[%s1300_s1 + $0x84] ss:$16 sps:$4 sm:$0xff]   ;;  %v981_v18 = vld [vmem:[%s1300_s1 + $0x8c] ss:$16 sps:$4 sm:$0xff]   ;;  %v983_v19 = vld [vmem:[%s1300_s1 + $0x80] ss:$16 sps:$4 sm:$0xff]  }
  0x19   :  { %266 = vmatpush1.bf16.msra.mxu0 %v965_v7  ;;  %309 = vmatpush1.bf16.msra.mxu1 %v966_v8  ;;  %v984_v20 = vld [vmem:[%s1300_s1 + $0x88] ss:$16 sps:$4 sm:$0xff]   ;;  %v985_v21 = vld [vmem:[%s1300_s1 + $0xa4] ss:$16 sps:$4 sm:$0xff]   ;;  %v987_v22 = vld [vmem:[%s1300_s1 + $0xac] ss:$16 sps:$4 sm:$0xff]  }
  0x1a   :  { %267 = vmatprep.subr.bf16.mxu0 %v967_v9  ;;  %310 = vmatprep.subr.bf16.mxu1 %v969_v10  ;;  %v989_v23 = vld [vmem:[%s1300_s1 + $0xa0] ss:$16 sps:$4 sm:$0xff]   ;;  %v990_v24 = vld [vmem:[%s1300_s1 + $0xa8] ss:$16 sps:$4 sm:$0xff]   ;;  %v991_v25 = vld [vmem:[%s1300_s1 + $0xc4] ss:$16 sps:$4 sm:$0xff]  }
  0x1b   :  { %v993_v26 = vld [vmem:[%s1300_s1 + $0xcc] ss:$16 sps:$4 sm:$0xff]   ;;  %v995_v27 = vld [vmem:[%s1300_s1 + $0xc0] ss:$16 sps:$4 sm:$0xff]   ;;  %v996_v28 = vld [vmem:[%s1300_s1 + $0xc8] ss:$16 sps:$4 sm:$0xff]  }
  0x1c   :  { %v997_v29 = vld [vmem:[%s1300_s1 + $0xe4] ss:$16 sps:$4 sm:$0xff]   ;;  %v999_v30 = vld [vmem:[%s1300_s1 + $0xec] ss:$16 sps:$4 sm:$0xff]   ;;  %v1001_v31 = vld [vmem:[%s1300_s1 + $0xe0] ss:$16 sps:$4 sm:$0xff]  }
  0x1d   :  { %268 = vmatpush1.bf16.msra.mxu0 %v971_v11  ;;  %311 = vmatpush1.bf16.msra.mxu1 %v972_v12  ;;  %v1002_v32 = vld [vmem:[%s1300_s1 + $0xe8] ss:$16 sps:$4 sm:$0xff]   ;;  %v1236_v33 = vld [vmem:[%s1299_s0] sm:$0xff]   ;;  %v1012_v42 = vld [vmem:[#allocation2 + $0x50] sm:$0xff]   ;;  %v78_v3 = vshrl.u32 %v77_v2, 7 }
  0x1e   :  { %269 = vmatprep.subr.bf16.mxu0 %v973_v13  ;;  %312 = vmatprep.subr.bf16.mxu1 %v975_v14  ;;  %v1004_v34 = vld [vmem:[#allocation2 + $0x40] sm:$0xff]   ;;  %v1009_v39 = vld [vmem:[#allocation2 + $0xc8] sm:$0xff]   ;;  %v1013_v43 = vld [vmem:[#allocation2 + $0xd0] sm:$0xff]  }
  0x1f   :  { %v1005_v35 = vld [vmem:[#allocation2 + $0xc0] sm:$0xff]   ;;  %v1010_v40 = vld [vmem:[#allocation2 + $0x8] sm:$0xff]   ;;  %v1014_v44 = vld [vmem:[#allocation2 + $0x10] sm:$0xff]   ;;  %v79_v4 = vsub.s32 0, %v78_v3  ;;  %v87_v5 = vsub.s32 2, %v78_v3  ;;  %v83_v7 = vsub.s32 1, %v78_v3 }
  0x20   :  { %v1006_v36 = vld [vmem:[#allocation2] sm:$0xff]   ;;  %v1011_v41 = vld [vmem:[#allocation2 + $0x88] sm:$0xff]   ;;  %v1015_v45 = vld [vmem:[#allocation2 + $0x90] sm:$0xff]   ;;  %v91_v8 = vsub.s32 3, %v78_v3 }
  0x21   :  { %270 = vmatpush1.bf16.msra.mxu0 %v977_v15  ;;  %313 = vmatpush1.bf16.msra.mxu1 %v978_v16  ;;  %v1007_v37 = vld [vmem:[#allocation2 + $0x80] sm:$0xff]   ;;  %v1016_v46 = vld [vmem:[#allocation2 + $0x58] sm:$0xff]   ;;  %v1024_v54 = vld [vmem:[#allocation2 + $0x68] sm:$0xff]  }
  0x22   :  { %271 = vmatprep.subr.bf16.mxu0 %v979_v17  ;;  %314 = vmatprep.subr.bf16.mxu1 %v981_v18  ;;  %v1017_v47 = vld [vmem:[#allocation2 + $0xd8] sm:$0xff]   ;;  %v1020_v50 = vld [vmem:[#allocation2 + $0x60] sm:$0xff]   ;;  %v1025_v55 = vld [vmem:[#allocation2 + $0xe8] sm:$0xff]  }
  0x23   :  { %v1018_v48 = vld [vmem:[#allocation2 + $0x18] sm:$0xff]   ;;  %v1021_v51 = vld [vmem:[#allocation2 + $0xe0] sm:$0xff]   ;;  %v1026_v56 = vld [vmem:[#allocation2 + $0x28] sm:$0xff]  }
  0x24   :  { %v1019_v49 = vld [vmem:[#allocation2 + $0x98] sm:$0xff]   ;;  %v1022_v52 = vld [vmem:[#allocation2 + $0x20] sm:$0xff]   ;;  %v1027_v57 = vld [vmem:[#allocation2 + $0xa8] sm:$0xff]  }
  0x25   :  { %272 = vmatpush1.bf16.msra.mxu0 %v983_v19  ;;  %315 = vmatpush1.bf16.msra.mxu1 %v984_v20  ;;  %v1023_v53 = vld [vmem:[#allocation2 + $0xa0] sm:$0xff]   ;;  %v1028_v58 = vld [vmem:[#allocation2 + $0x70] sm:$0xff]   ;;  %v1032_v62 = vld [vmem:[#allocation2 + $0x78] sm:$0xff]  }
  0x26   :  { %273 = vmatprep.subr.bf16.mxu0 %v985_v21  ;;  %316 = vmatprep.subr.bf16.mxu1 %v987_v22  ;;  %v1029_v59 = vld [vmem:[#allocation2 + $0xf0] sm:$0xff]   ;;  %v1033_v63 = vld [vmem:[#allocation2 + $0xf8] sm:$0xff]   ;;  %v75_v6 = vld [vmem:[%s1301_s2] sm:$0xf] }
  0x27   :  { %v1030_v60 = vld [vmem:[#allocation2 + $0x30] sm:$0xff]   ;;  %v1034_v0 = vld [vmem:[#allocation2 + $0x38] sm:$0xff]   ;;  %v80_v9 = vrot.slane %v75_v6, %v79_v4  ;;  %v88_v10 = vrot.slane %v75_v6, %v87_v5  ;;  %v84_v11 = vrot.slane %v75_v6, %v83_v7  ;;  %v92_v12 = vrot.slane %v75_v6, %v91_v8 }
  0x28   :  { %v1031_v61 = vld [vmem:[#allocation2 + $0xb0] sm:$0xff]   ;;  %v1035_v1 = vld [vmem:[#allocation2 + $0xb8] sm:$0xff]  }
  0x29   :  { %274 = vmatpush1.bf16.msra.mxu0 %v989_v23  ;;  %317 = vmatpush1.bf16.msra.mxu1 %v990_v24 }
  0x2a   :  { %275 = vmatprep.subr.bf16.mxu0 %v991_v25  ;;  %318 = vmatprep.subr.bf16.mxu1 %v993_v26 }
  0x2d   :  { %276 = vmatpush1.bf16.msra.mxu0 %v995_v27  ;;  %319 = vmatpush1.bf16.msra.mxu1 %v996_v28 }
  0x2e   :  { %277 = vmatprep.subr.bf16.mxu0 %v997_v29  ;;  %320 = vmatprep.subr.bf16.mxu1 %v999_v30 }
  0x31   :  { %278 = vmatpush1.bf16.msra.mxu0 %v1001_v31  ;;  %321 = vmatpush1.bf16.msra.mxu1 %v1002_v32 }
  0x32   :  { %907 = vmatprep.subr.bf16.mxu0 %v1004_v34  ;;  %929 = vmatprep.subr.bf16.mxu1 %v1005_v35 }
  0x34   :  { %296 = vmatmul.mubr.bf16.vlgmr.msra.gmra.mrb[0].mxu0 %v1236_v33  ;;  %339 = vmatmul.mubr.bf16.vlgmr.msra.gmra.mrb[0].mxu1 %v1236_v33 }
  0x35   :  { %908 = vmatpush3.bf16.msra.mxu0 %v1006_v36  ;;  %930 = vmatpush3.bf16.msra.mxu1 %v1007_v37 }
  0x36   :  { %909 = vmatprep.subr.bf16.mxu0 %v1008_v38  ;;  %931 = vmatprep.subr.bf16.mxu1 %v1009_v39 }
  0x39   :  { %910 = vmatpush3.bf16.msra.mxu0 %v1010_v40  ;;  %932 = vmatpush3.bf16.msra.mxu1 %v1011_v41 }
  0x3a   :  { %911 = vmatprep.subr.bf16.mxu0 %v1012_v42  ;;  %933 = vmatprep.subr.bf16.mxu1 %v1013_v43 }
  0x3d   :  { %912 = vmatpush3.bf16.msra.mxu0 %v1014_v44  ;;  %934 = vmatpush3.bf16.msra.mxu1 %v1015_v45 }
  0x3e   :  { %913 = vmatprep.subr.bf16.mxu0 %v1016_v46  ;;  %935 = vmatprep.subr.bf16.mxu1 %v1017_v47 }
  0x41   :  { %914 = vmatpush3.bf16.msra.mxu0 %v1018_v48  ;;  %936 = vmatpush3.bf16.msra.mxu1 %v1019_v49 }
  0x42   :  { %915 = vmatprep.subr.bf16.mxu0 %v1020_v50  ;;  %937 = vmatprep.subr.bf16.mxu1 %v1021_v51 }
  0x45   :  { %916 = vmatpush3.bf16.msra.mxu0 %v1022_v52  ;;  %938 = vmatpush3.bf16.msra.mxu1 %v1023_v53 }
  0x46   :  { %917 = vmatprep.subr.bf16.mxu0 %v1024_v54  ;;  %939 = vmatprep.subr.bf16.mxu1 %v1025_v55 }
  0x49   :  { %918 = vmatpush3.bf16.msra.mxu0 %v1026_v56  ;;  %940 = vmatpush3.bf16.msra.mxu1 %v1027_v57 }
  0x4a   :  { %919 = vmatprep.subr.bf16.mxu0 %v1028_v58  ;;  %941 = vmatprep.subr.bf16.mxu1 %v1029_v59 }
  0x4d   :  { %920 = vmatpush3.bf16.msra.mxu0 %v1030_v60  ;;  %942 = vmatpush3.bf16.msra.mxu1 %v1031_v61 }
  0x4e   :  { %921 = vmatprep.subr.bf16.mxu0 %v1032_v62  ;;  %943 = vmatprep.subr.bf16.mxu1 %v1033_v63 }
  0x51   :  { %922 = vmatpush3.bf16.msra.mxu0 %v1034_v0  ;;  %944 = vmatpush3.bf16.msra.mxu1 %v1035_v1 }
 0x107   :  { %v297_v13 = vpop.f32.mrb[0].mxu0  ;;  %v340_v14 = vpop.f32.mrb[0].mxu1 }
 0x108   :  { %v1243_v15 = vadd.f32 %v297_v13, %v80_v9  ;;  %v1245_v16 = vadd.f32 %v340_v14, %v88_v10  ;;  %v299_v17 = vpop.f32.mrb[1].mxu0  ;;  %v342_v18 = vpop.f32.mrb[1].mxu1 }
 0x109   :  { %v1247_v19 = vadd.f32 %v299_v17, %v84_v11  ;;  %v1249_v20 = vadd.f32 %v342_v18, %v92_v12  ;;  %v301_v21 = vpop.f32.mrb[2].mxu0  ;;  %v344_v22 = vpop.f32.mrb[2].mxu1 }
 0x10a   :  { %v357_v23 = vmul.f32 0.044715, %v1243_v15  ;;  %v359_v24 = vmul.f32 0.044715, %v1245_v16  ;;  %v302_v25 = vadd.f32 %v301_v21, %v80_v9  ;;  %v345_v26 = vadd.f32 %v344_v22, %v88_v10  ;;  %v303_v27 = vpop.f32.mrb[3].mxu0  ;;  %v346_v28 = vpop.f32.mrb[3].mxu1 }
 0x10b   :  { %v358_v29 = vmul.f32 0.044715, %v1247_v19  ;;  %v360_v30 = vmul.f32 0.044715, %v1249_v20  ;;  %v1255_v31 = vadd.f32 %v303_v27, %v84_v11  ;;  %v1257_v32 = vadd.f32 %v346_v28, %v92_v12 }
 0x10c   :  { %v365_v34 = vmul.f32 %v357_v23, %v1243_v15  ;;  %v367_v35 = vmul.f32 %v359_v24, %v1245_v16  ;;  %v361_v36 = vmul.f32 0.044715, %v302_v25  ;;  %v363_v37 = vmul.f32 0.044715, %v345_v26 }
 0x10d   :  { %v366_v38 = vmul.f32 %v358_v29, %v1247_v19  ;;  %v368_v39 = vmul.f32 %v360_v30, %v1249_v20  ;;  %v362_v40 = vmul.f32 0.044715, %v1255_v31  ;;  %v364_v41 = vmul.f32 0.044715, %v1257_v32 }
 0x10e   :  { %v373_v42 = vmul.f32 %v365_v34, %v1243_v15  ;;  %v375_v43 = vmul.f32 %v367_v35, %v1245_v16  ;;  %v369_v44 = vmul.f32 %v361_v36, %v302_v25  ;;  %v371_v45 = vmul.f32 %v363_v37, %v345_v26 }
 0x10f   :  { %v374_v46 = vmul.f32 %v366_v38, %v1247_v19  ;;  %v376_v47 = vmul.f32 %v368_v39, %v1249_v20  ;;  %v370_v48 = vmul.f32 %v362_v40, %v1255_v31  ;;  %v372_v49 = vmul.f32 %v364_v41, %v1257_v32 }
 0x110   :  { %v381_v50 = vadd.f32 %v373_v42, %v1243_v15  ;;  %v383_v51 = vadd.f32 %v375_v43, %v1245_v16  ;;  %v377_v52 = vmul.f32 %v369_v44, %v302_v25  ;;  %v379_v53 = vmul.f32 %v371_v45, %v345_v26 }
 0x111   :  { %v378_v54 = vmul.f32 %v370_v48, %v1255_v31  ;;  %v380_v55 = vmul.f32 %v372_v49, %v1257_v32  ;;  %v382_v60 = vadd.f32 %v374_v46, %v1247_v19  ;;  %v384_v0 = vadd.f32 %v376_v47, %v1249_v20 }
 0x112   :  { %v389_v56 = vmul.f32 0.7978846, %v381_v50  ;;  %v391_v57 = vmul.f32 0.7978846, %v383_v51  ;;  %v385_v58 = vadd.f32 %v377_v52, %v302_v25  ;;  %v387_v59 = vadd.f32 %v379_v53, %v345_v26 }
 0x113   :  { %v386_v61 = vadd.f32 %v378_v54, %v1255_v31  ;;  %v390_v1 = vmul.f32 0.7978846, %v382_v60  ;;  %v388_v3 = vadd.f32 %v380_v55, %v1257_v32  ;;  %v392_v4 = vmul.f32 0.7978846, %v384_v0 }
 0x114   :  { %1037 = vtanh.f32 %v389_v56  ;;  %v393_v62 = vmul.f32 0.7978846, %v385_v58  ;;  %v395_v63 = vmul.f32 0.7978846, %v387_v59  ;;  %v349_v12 = vmul.f32 0.5, %v1243_v15 }
 0x115   :  { %1039 = vtanh.f32 %v391_v57  ;;  %v394_v2 = vmul.f32 0.7978846, %v386_v61  ;;  %v396_v5 = vmul.f32 0.7978846, %v388_v3  ;;  %v353_v13 = vmul.f32 0.5, %v302_v25 }
 0x116   :  { %1041 = vtanh.f32 %v393_v62  ;;  %v351_v18 = vmul.f32 0.5, %v1245_v16  ;;  %v355_v21 = vmul.f32 0.5, %v345_v26  ;;  %v350_v24 = vmul.f32 0.5, %v1247_v19 }
 0x117   :  { %1043 = vtanh.f32 %v395_v63  ;;  %v354_v34 = vmul.f32 0.5, %v1255_v31  ;;  %v352_v25 = vmul.f32 0.5, %v1249_v20  ;;  %v356_v38 = vmul.f32 0.5, %v1257_v32  ;;  %v863_v20 = vld [vmem:[%s1303_s4] ss:$0 sm:$0xff] }
 0x118   :  { %1045 = vtanh.f32 %v390_v1  ;;  %v770_v55 = vunpack.c.l.bf16 %v1236_v33  ;;  %v771_v62 = vunpack.c.h.bf16 %v1236_v33 }
 0x119   :  { %1047 = vtanh.f32 %v394_v2 }
 0x11a   :  { %1049 = vtanh.f32 %v392_v4 }
 0x11b   :  { %1051 = vtanh.f32 %v396_v5 }
 0x11e   :  { %v1038_v6 = vpop.eup %1037 }
 0x11f   :  { %v1040_v7 = vpop.eup %1039  ;;  %v405_v8 = vadd.f32 1.0, %v1038_v6 }
 0x120   :  { %v1042_v9 = vpop.eup %1041  ;;  %v407_v10 = vadd.f32 1.0, %v1040_v7 }
 0x121   :  { %v1044_v11 = vpop.eup %1043  ;;  %v409_v14 = vadd.f32 1.0, %v1042_v9  ;;  %v413_v28 = vmul.f32 %v405_v8, %v349_v12 }
 0x122   :  { %v1046_v17 = vpop.eup %1045  ;;  %v411_v22 = vadd.f32 1.0, %v1044_v11  ;;  %v415_v36 = vmul.f32 %v407_v10, %v351_v18 }
 0x123   :  { %v1048_v23 = vpop.eup %1047  ;;  %v406_v27 = vadd.f32 1.0, %v1046_v17  ;;  %v417_v29 = vmul.f32 %v409_v14, %v353_v13  ;;  %v896_v17 = vld [vmem:[%s1304_s5] ss:$0 sm:$0xff] }
 0x124   :  { %v1050_v30 = vpop.eup %1049  ;;  %v410_v35 = vadd.f32 1.0, %v1048_v23  ;;  %v419_v37 = vmul.f32 %v411_v22, %v355_v21  ;;  %v897_v23 = vld [vmem:[%s1305_s6] ss:$0 sm:$0xff] }
 0x125   :  { %v1052_v15 = vpop.eup %1051  ;;  %v408_v16 = vadd.f32 1.0, %v1050_v30  ;;  %v421_v26 = vpack.c.bf16 %v417_v29, %v413_v28  ;;  %v414_v39 = vmul.f32 %v406_v27, %v350_v24 }
 0x126   :  { %v418_v40 = vmul.f32 %v410_v35, %v354_v34  ;;  %v412_v41 = vadd.f32 1.0, %v1052_v15  ;;  %v423_v19 = vpack.c.bf16 %v419_v37, %v415_v36 }
 0x127   :  { %v416_v43 = vmul.f32 %v408_v16, %v352_v25 }
 0x128   :  { %v422_v42 = vpack.c.bf16 %v418_v40, %v414_v39  ;;  %v420_v44 = vmul.f32 %v412_v41, %v356_v38 }
 0x12a   :  { %720 = vmatprep.mubr.bf16.mxu0 %v422_v42  ;;  %v424_v45 = vpack.c.bf16 %v420_v44, %v416_v43 }
 0x12b   :  { %721 = vmatmul.mubr.bf16.vlgmr.msra.gmra.mrb[4].mxu0 %v421_v26 }
 0x12c   :  { %761 = vmatprep.mubr.bf16.mxu1 %v424_v45 }
 0x12d   :  { %762 = vmatmul.mubr.bf16.vlgmr.msra.gmra.mrb[4].mxu1 %v423_v19 }
 0x1fe   :  { %v923_v31 = vpop.f32.mrb[4].mxu0 }
 0x1ff   :  { %v924_v32 = vpop.f32.mrb[5].mxu0 }
 0x200   :  { %v945_v46 = vpop.f32.mrb[4].mxu1  ;;  %v925_v47 = vadd.f32 %v924_v32, %v923_v31  ;;  %v926_v48 = vpop.f32.mrb[6].mxu0 }
 0x201   :  { %v946_v49 = vpop.f32.mrb[5].mxu1  ;;  %v927_v50 = vpop.f32.mrb[7].mxu0 }
 0x202   :  { %v723_v51 = vadd.f32 %v925_v47, %v863_v20  ;;  %v947_v52 = vadd.f32 %v946_v49, %v945_v46  ;;  %v948_v53 = vpop.f32.mrb[6].mxu1  ;;  %v928_v54 = vadd.f32 %v927_v50, %v926_v48 }
 0x203   :  { %v949_v56 = vpop.f32.mrb[7].mxu1 }
 0x204   :  { %v764_v57 = vadd.f32 %v947_v52, %v723_v51  ;;  %v726_v58 = vadd.f32 %v928_v54, %v863_v20  ;;  %v950_v59 = vadd.f32 %v949_v56, %v948_v53 }
 0x206   :  { %v767_v60 = vadd.f32 %v950_v59, %v726_v58  ;;  %v772_v61 = vadd.f32 %v770_v55, %v764_v57 }
 0x208   :  { %774 = vadd.xlane.f32.xlu0 %v772_v61  ;;  %v773_v63 = vadd.f32 %v771_v62, %v767_v60 }
 0x20c   :  { %776 = vadd.xlane.f32.xlu0 %v773_v63 }
 0x295   :  { %v775_v0 = vpop.xlane.xlu0 %774 }
 0x296   :  { %v779_v1 = vmul.f32 0.0078125, %v775_v0 }
 0x298   :  { %v781_v2 = vsub.f32 %v772_v61, %v779_v1 }
 0x299   :  { %v777_v3 = vpop.xlane.xlu0 %776 }
 0x29a   :  { %v780_v4 = vmul.f32 0.0078125, %v777_v3  ;;  %v783_v5 = vmul.f32 %v781_v2, %v781_v2 }
 0x29c   :  { %v782_v6 = vsub.f32 %v773_v63, %v780_v4  ;;  %785 = vadd.xlane.f32.xlu1 %v783_v5 }
 0x29e   :  { %v784_v7 = vmul.f32 %v782_v6, %v782_v6 }
 0x2a0   :  { %787 = vadd.xlane.f32.xlu1 %v784_v7 }
 0x329   :  { %v786_v8 = vpop.xlane.xlu1 %785 }
 0x32a   :  { %v789_v9 = vmul.f32 0.0078125, %v786_v8 }
 0x32c   :  { %v791_v10 = vadd.f32 1e-12, %v789_v9 }
 0x32d   :  { %v788_v11 = vpop.xlane.xlu1 %787 }
 0x32e   :  { %1053 = vrsqrt.f32 %v791_v10  ;;  %v790_v12 = vmul.f32 0.0078125, %v788_v11 }
 0x330   :  { %v792_v33 = vadd.f32 1e-12, %v790_v12 }
 0x332   :  { %1055 = vrsqrt.f32 %v792_v33 }
 0x338   :  { %v1054_v13 = vpop.eup %1053 }
 0x339   :  { %v795_v14 = vmul.f32 %v1054_v13, %v781_v2 }
 0x33b   :  { %v804_v21 = vmul.f32 %v896_v17, %v795_v14 }
 0x33c   :  { %v1056_v18 = vpop.eup %1055 }
 0x33d   :  { %v796_v22 = vmul.f32 %v1056_v18, %v782_v6  ;;  %v813_v27 = vadd.f32 %v897_v23, %v804_v21 }
 0x33f   :  { %v805_v24 = vmul.f32 %v896_v17, %v796_v22 }
 0x341   :  { %v814_v28 = vadd.f32 %v897_v23, %v805_v24 }
 0x343   :  { %v905_v29 = vpack.c.bf16 %v814_v28, %v813_v27 }
 0x345   :  { %906 = vst [vmem:[%s1306_s7] sm:$0xff] %v905_v29  }
 0x346   :  { %829 = vsyncpa [#allocation3], 1 }

// kernel: bert_ner_forward.7
= control target key start
LH: loop header
LB: loop body
LE: loop exit
PB: predicated region body
PF: predicated region fallthrough
CT: control target
= control target key end

     0   :  { %12 = vsyncpa [#allocation3], 0  ;;  %s2392_s0 = inlined_call_operand.vmem [shape: bf16[2,8,128], index: 0, kind: input, shape index: {}]   ;;  %s2393_s1 = inlined_call_operand.vmem [shape: bf16[128,384], index: 1, kind: input, shape index: {}]   ;;  %s2394_s2 = inlined_call_operand.hbm [shape: f32[1,384], index: 2, kind: input, shape index: {}]   ;;  %s2395_s3 = inlined_call_operand.hbm [shape: bf16[128,128], index: 3, kind: input, shape index: {}]   ;;  %s2396_s4 = inlined_call_operand.hbm [shape: f32[1,128], index: 4, kind: input, shape index: {}]   ;;  %s2397_s5 = inlined_call_operand.hbm [shape: f32[1,128], index: 5, kind: input, shape index: {}]   ;;  %s2398_s6 = inlined_call_operand.hbm [shape: f32[1,128], index: 6, kind: input, shape index: {}]   ;;  %s2399_s7 = inlined_call_operand.vmem [shape: bf16[2,8,128], index: 7, kind: output, shape index: {}]  }
   0x1   :  { %13 = vsyncpa [#allocation5], 0 }
   0x2   :  { %14 = vsyncpa [#allocation8], 0  ;;  %s2040_s24 = smov 0  }
   0x3 LB: > { %s1987_s25 = smov [#allocation4]   ;;  %s2046_s27 = sadd.s32 4294967295, %s1985_s24   ;;  %s1985_s24 = sphi %s2040_s24, %s20_s24  }
   0x4   : > { %s229_s26 = sshll.u32 %s1987_s25, 4  ;;  %p1524_p0 = scmp.ge.s32.totalorder %s1985_s24, 1  ;;  %s2051_s26 = int_to_ptr.vmem [resolvable:$true] %s229_s26 }
   0x5   : > { %p203_p1 = scmp.lt.s32.totalorder %s1985_s24, 3  ;;  %p2400_p2 = scmp.eq.s32.totalorder %s2046_s27, 0 }
   0x6   : > { %s1988_s29 = smov [#allocation7]   ;;  %s1989_s9 = smov [#allocation2]  }
   0x7   : > { %p2053_p3 = pnand %p1524_p0, %p203_p1  ;;  %s254_s30 = sshll.u32 %s1988_s29, 4  ;;  %s2059_s30 = int_to_ptr.vmem [resolvable:$true] %s254_s30 }
   0x8   : > { %s219_s10 = sshll.u32 %s1989_s9, 4  ;;  %s1990_s11 = smov [#allocation6]   ;;  %s2067_s10 = int_to_ptr.vmem [resolvable:$true] %s219_s10 }
   0x9   : > { %s2402_s28 = scalar_select %p2053_p3, 1, 0 }
   0xa   : > { %p1722_p4 = pneg %p2053_p3  ;;  %s2069_s12 = sshll.u32 %s1990_s11, 4  ;;  %s244_s12 = int_to_ptr.vmem [resolvable:$true] %s2069_s12 }
   0xb   : > { %s1827_s15 = scalar_lea.hbm %s2395_s3, 1024 }
   0xc   : > { %p2063_p5 = pnand %p2400_p2, %p1722_p4  ;;  %p1828_p6 = scmp.ne.s32.totalorder %s2395_s3, %s1827_s15 }
   0xd   : > { %p1834_p10 = scmp.lt.u32.totalorder %s1827_s15, %s2395_s3 }
   0xe   : > { %p2079_p7 = pneg %p2063_p5 }
  0x10   : > { %p1830_p8 = pnand %p2079_p7, %p1828_p6 }
  0x12   : > { %p1831_p9 = pneg %p1830_p8 }
  0x14   : > { %p1836_p11 = pnand %p1834_p10, %p1831_p9 }
  0x16   : > { %1839 = shalt.err (!%p1836_p11)
}
  0x17   : > { %s1840_s21 = scalar_lea.vmem %s2051_s26, 1024  ;;  %p1848_p1 = scmp.lt.s32.totalorder %s2051_s26, %s2051_s26 }
  0x18   : > { %p1841_p12 = scmp.ne.s32.totalorder %s2051_s26, %s1840_s21  ;;  %p1849_p4 = scmp.lt.s32.totalorder %s1840_s21, %s1840_s21 }
  0x1a   : > { %p1843_p13 = pnand %p1841_p12, %p2079_p7  ;;  %p1850_p6 = por %p1849_p4, %p1848_p1 }
  0x1c   : > { %p1844_p0 = pneg %p1843_p13 }
  0x1e   : > { %p1851_p8 = pnand %p1850_p6, %p1844_p0 }
  0x20   : > { %1854 = shalt.err (!%p1851_p8)
}
  0x21   : > { %s1991_s22 = smov 64   ;;  %s1992_s23 = smov 4  }
  0x22   : > { %1728 = dma.hbm_to_vmem [thread:$0]  (!%p2063_p5), %s2395_s3, 1024, %s2051_s26, [#allocation5], %s1991_s22, %s1991_s22, %s1992_s23  }
  0x23   : > { %s1855_s13 = scalar_lea.hbm %s2397_s5, 16 }
  0x24   : > { %p1856_p9 = scmp.ne.s32.totalorder %s2397_s5, %s1855_s13  ;;  %p1862_p12 = scmp.lt.u32.totalorder %s1855_s13, %s2397_s5 }
  0x26   : > { %p1858_p10 = pnand %p1856_p9, %p2079_p7 }
  0x28   : > { %p1859_p11 = pneg %p1858_p10 }
  0x2a   : > { %p1864_p13 = pnand %p1862_p12, %p1859_p11 }
  0x2c   : > { %1867 = shalt.err (!%p1864_p13)
}
  0x2d   : > { %s1868_s26 = scalar_lea.vmem %s2059_s30, 16  ;;  %s1875_s19 = scalar_lea.vmem %s2059_s30, 32 }
  0x2e   : > { %p1869_p0 = scmp.ne.s32.totalorder %s2059_s30, %s1868_s26  ;;  %p1876_p6 = scmp.lt.s32.totalorder %s2059_s30, %s2059_s30 }
  0x2f   : > { %p1877_p8 = scmp.lt.s32.totalorder %s1875_s19, %s1868_s26 }
  0x30   : > { %p1871_p1 = pnand %p1869_p0, %p2079_p7 }
  0x31   : > { %p1878_p9 = por %p1877_p8, %p1876_p6 }
  0x32   : > { %p1872_p4 = pneg %p1871_p1 }
  0x34   : > { %p1879_p10 = pnand %p1878_p9, %p1872_p4 }
  0x36   : > { %1882 = shalt.err (!%p1879_p10)
}
  0x37   : > { %1734 = dma.hbm_to_vmem [thread:$0]  (!%p2063_p5), %s2397_s5, 16, %s2059_s30, [#allocation8]  }
  0x38   : > { %s1883_s25 = scalar_lea.hbm %s2394_s2, 48 }
  0x39   : > { %p1884_p11 = scmp.ne.s32.totalorder %s2394_s2, %s1883_s25  ;;  %p1890_p0 = scmp.lt.u32.totalorder %s1883_s25, %s2394_s2 }
  0x3b   : > { %p1886_p12 = pnand %p1884_p11, %p2079_p7 }
  0x3d   : > { %p1887_p13 = pneg %p1886_p12 }
  0x3f   : > { %p1892_p1 = pnand %p1890_p0, %p1887_p13 }
  0x41   : > { %1895 = shalt.err (!%p1892_p1)
}
  0x42   : > { %s1896_s30 = scalar_lea.vmem %s2067_s10, 48  ;;  %s1903_s14 = scalar_lea.vmem %s2067_s10, 64 }
  0x43   : > { %p1897_p4 = scmp.ne.s32.totalorder %s2067_s10, %s1896_s30  ;;  %p1904_p9 = scmp.lt.s32.totalorder %s2067_s10, %s2067_s10 }
  0x44   : > { %p1905_p10 = scmp.lt.s32.totalorder %s1903_s14, %s1896_s30 }
  0x45   : > { %p1899_p6 = pnand %p1897_p4, %p2079_p7 }
  0x46   : > { %p1906_p11 = por %p1905_p10, %p1904_p9 }
  0x47   : > { %p1900_p8 = pneg %p1899_p6 }
  0x49   : > { %p1907_p12 = pnand %p1906_p11, %p1900_p8 }
  0x4b   : > { %1910 = shalt.err (!%p1907_p12)
}
  0x4c   : > { %1725 = dma.hbm_to_vmem [thread:$0]  (!%p2063_p5), %s2394_s2, 48, %s2067_s10, [#allocation3]  }
  0x4d   : > { %s1911_s19 = scalar_lea.hbm %s2396_s4, 16 }
  0x4e   : > { %p1912_p13 = scmp.ne.s32.totalorder %s2396_s4, %s1911_s19  ;;  %p1918_p4 = scmp.lt.u32.totalorder %s1911_s19, %s2396_s4 }
  0x50   : > { %p1914_p0 = pnand %p1912_p13, %p2079_p7 }
  0x52   : > { %p1915_p1 = pneg %p1914_p0 }
  0x54   : > { %p1920_p6 = pnand %p1918_p4, %p1915_p1 }
  0x56   : > { %1923 = shalt.err (!%p1920_p6)
}
  0x57   : > { %s1924_s25 = scalar_lea.vmem %s244_s12, 16  ;;  %s1931_s10 = scalar_lea.vmem %s244_s12, 32 }
  0x58   : > { %p1925_p8 = scmp.ne.s32.totalorder %s244_s12, %s1924_s25  ;;  %p1932_p11 = scmp.lt.s32.totalorder %s244_s12, %s244_s12 }
  0x59   : > { %p1933_p12 = scmp.lt.s32.totalorder %s1931_s10, %s1924_s25 }
  0x5a   : > { %p1927_p9 = pnand %p1925_p8, %p2079_p7 }
  0x5b   : > { %p1934_p2 = por %p1933_p12, %p1932_p11 }
  0x5c   : > { %p1928_p10 = pneg %p1927_p9 }
  0x5e   : > { %p1935_p3 = pnand %p1934_p2, %p1928_p10 }
  0x60   : > { %1938 = shalt.err (!%p1935_p3)
}
  0x61   : > { %1731 = dma.hbm_to_vmem [thread:$0]  (!%p2063_p5), %s2396_s4, 16, %s244_s12, [#allocation5]  }
  0x62   : > { %s1993_s11 = smov [#allocation9]   ;;  %s1939_s15 = scalar_lea.hbm %s2398_s6, 16 }
  0x63   : > { %s265_s13 = sshll.u32 %s1993_s11, 4  ;;  %p1940_p13 = scmp.ne.s32.totalorder %s2398_s6, %s1939_s15  ;;  %s266_s13 = int_to_ptr.vmem [resolvable:$true] %s265_s13 }
  0x64   : > { %p1946_p0 = scmp.lt.u32.totalorder %s1939_s15, %s2398_s6 }
  0x65   : > { %p1942_p2 = pnand %p1940_p13, %p2079_p7 }
  0x67   : > { %p1943_p3 = pneg %p1942_p2 }
  0x69   : > { %p1948_p1 = pnand %p1946_p0, %p1943_p3 }
  0x6b   : > { %1951 = shalt.err (!%p1948_p1)
}
  0x6c   : > { %s1952_s12 = scalar_lea.vmem %s266_s13, 16  ;;  %s1959_s20 = scalar_lea.vmem %s266_s13, 32 }
  0x6d   : > { %p1953_p4 = scmp.ne.s32.totalorder %s266_s13, %s1952_s12  ;;  %p1960_p9 = scmp.lt.s32.totalorder %s266_s13, %s266_s13 }
  0x6e   : > { %p1961_p10 = scmp.lt.s32.totalorder %s1959_s20, %s1952_s12 }
  0x6f   : > { %p1955_p6 = pnand %p1953_p4, %p2079_p7 }
  0x70   : > { %p1962_p11 = por %p1961_p10, %p1960_p9 }
  0x71   : > { %p1956_p8 = pneg %p1955_p6 }
  0x73   : > { %p1963_p12 = pnand %p1962_p11, %p1956_p8 }
  0x75   : > { %1966 = shalt.err (!%p1963_p12)
}
  0x76   : > { %1737 = dma.hbm_to_vmem [thread:$0]  (!%p2063_p5), %s2398_s6, 16, %s266_s13, [#allocation8]  }
  0x77   : > { %p2405_p13 = scmp.ne.s32.totalorder %s2402_s28, 0 }
  0x78   : > { %p2406_p2 = scmp.eq.s32.totalorder (!%p2405_p13), %s2046_s27, 0 }
  0x79   : > { %285 = sbr.rel (%p2405_p13) target bundleno = 3363 (0xd23), region = 48 }
  0x80   : > { %1972 = dma.done.wait (%p2406_p2), [#allocation3], 48   ;;  %p2407_p7 = pmov %p2406_p2 }
  0x81   : > { %p2408_p3 = pmov %p2406_p2 }
  0x82   : > { %1974 = vsyncadd (%p2407_p7), [#allocation3], 4294967248 }
  0x83   : > { %1976 = dma.done.wait (%p2408_p3), [#allocation5], 1040   ;;  %p2409_p0 = pmov %p2406_p2 }
  0x85   : > { %1978 = vsyncadd (%p2409_p0), [#allocation5], 4294966256  ;;  %p2410_p1 = pmov %p2409_p0 }
  0x86   : > { %p2411_p5 = pmov %p2409_p0 }
  0x87   : > { %1980 = dma.done.wait (%p2410_p1), [#allocation8], 32  }
  0x88   : > { %1982 = vsyncadd (%p2411_p5), [#allocation8], 4294967264  ;;  %v1994_v0 = vmov 0   ;;  %v1769_v1 = vld [vmem:[%s2393_s1 + $0x4] ss:$12 sps:$4 sm:$0xff]   ;;  %p331_p4 = scmp.lt.s32.totalorder %s2046_s27, 1  ;;  %v375_v19 = vlaneseq }
  0x89   : > { %550 = vmatprep.mubr.bf16.mxu1 %v1994_v0  ;;  %v1771_v2 = vld [vmem:[%s2393_s1] ss:$12 sps:$4 sm:$0xff]   ;;  %518 = vmatprep.subr.bf16.mxu1 %v1769_v1  ;;  %v1772_v3 = vld [vmem:[%s2393_s1 + $0x1c] ss:$12 sps:$4 sm:$0xff]   ;;  %v1774_v4 = vld [vmem:[%s2393_s1 + $0x18] ss:$12 sps:$4 sm:$0xff]  }
  0x8a   : > { %519 = vmatpush1.bf16.msra.mxu1 %v1771_v2  ;;  %v1775_v5 = vld [vmem:[%s2393_s1 + $0x34] ss:$12 sps:$4 sm:$0xff]   ;;  %v1777_v6 = vld [vmem:[%s2393_s1 + $0x30] ss:$12 sps:$4 sm:$0xff]   ;;  %v1778_v7 = vld [vmem:[%s2393_s1 + $0x4c] ss:$12 sps:$4 sm:$0xff]  }
  0x8b   : > { %520 = vmatprep.subr.bf16.mxu1 %v1772_v3  ;;  %v1780_v8 = vld [vmem:[%s2393_s1 + $0x48] ss:$12 sps:$4 sm:$0xff]   ;;  %s2413_s27 = smov (!%p331_p4, %s2046_s27), 1  ;;  %v1781_v9 = vld [vmem:[%s2393_s1 + $0x64] ss:$12 sps:$4 sm:$0xff]   ;;  %v1995_v18 = vmov 0.0  }
  0x8c   : > { %v1783_v10 = vld [vmem:[%s2393_s1 + $0x60] ss:$12 sps:$4 sm:$0xff]   ;;  %v1784_v11 = vld [vmem:[%s2393_s1 + $0x7c] ss:$12 sps:$4 sm:$0xff]   ;;  %v1786_v12 = vld [vmem:[%s2393_s1 + $0x78] ss:$12 sps:$4 sm:$0xff]   ;;  %1642 = vmatprep.subr.mxu0 %v1995_v18 }
  0x8d   : > { %v1787_v13 = vld [vmem:[%s2393_s1 + $0x94] ss:$12 sps:$4 sm:$0xff]   ;;  %v1789_v14 = vld [vmem:[%s2393_s1 + $0x90] ss:$12 sps:$4 sm:$0xff]   ;;  %v1790_v15 = vld [vmem:[%s2393_s1 + $0xac] ss:$12 sps:$4 sm:$0xff]  }
  0x8e   : > { %521 = vmatpush1.bf16.msra.mxu1 %v1774_v4  ;;  %s1537_s13 = sshll.u32 %s2413_s27, 2  ;;  %v1792_v16 = vld [vmem:[%s2393_s1 + $0xa8] ss:$12 sps:$4 sm:$0xff]   ;;  %vm1996_vm0 = vmmov 0   ;;  %v376_v20 = vshrl.u32 %v375_v19, 7  ;;  %vm600_vm1 = vcmask 261120  }
  0x8f   : > { %522 = vmatprep.subr.bf16.mxu1 %v1775_v5  ;;  %s334_s17 = scalar_lea.vmem %s2392_s0, %s1537_s13  ;;  %1644 = vmatprep.mubr.msk.f32.mxu0 %vm1996_vm0, %v1995_v18  ;;  %v373_v22 = vld [vmem:[#allocation2] sm:$0x7]  ;;  %s1997_s26 = smov 96   ;;  %v1793_v33 = vld [vmem:[%s2393_s1 + $0x8] ss:$12 sps:$4 sm:$0xff]   ;;  %vm677_vm2 = vcmask 64512  }
  0x90   : > { %v2257_v17 = vld [vmem:[%s334_s17] sm:$0xf]  ;;  %v377_v21 = vsub.s32 0, %v376_v20  ;;  %v381_v23 = vsub.s32 1, %v376_v20  ;;  %v1795_v35 = vld [vmem:[%s2393_s1 + $0x38] ss:$12 sps:$4 sm:$0xff]   ;;  %s338_s19 = scalar_lea.vmem %s2399_s7, %s1537_s13 }
  0x91   : > { %v1794_v34 = vld [vmem:[%s2393_s1 + $0x20] ss:$12 sps:$4 sm:$0xff]   ;;  %v1796_v36 = vld [vmem:[%s2393_s1 + $0x50] ss:$12 sps:$4 sm:$0xff]   ;;  %v1797_v37 = vld [vmem:[%s2393_s1 + $0x68] ss:$12 sps:$4 sm:$0xff]  }
  0x92   : > { %523 = vmatpush1.bf16.msra.mxu1 %v1777_v6  ;;  %v378_v24 = vrot.slane %v373_v22, %v377_v21  ;;  %v382_v25 = vrot.slane %v373_v22, %v381_v23  ;;  %v1798_v38 = vld [vmem:[%s2393_s1 + $0x80] ss:$12 sps:$4 sm:$0xff]   ;;  %v1799_v39 = vld [vmem:[%s2393_s1 + $0x98] ss:$12 sps:$4 sm:$0xff]   ;;  %v1800_v40 = vld [vmem:[%s2393_s1 + $0xb0] ss:$12 sps:$4 sm:$0xff]  }
  0x93   : > { %524 = vmatprep.subr.bf16.mxu1 %v1778_v7  ;;  %v385_v49 = vsub.s32 2, %v376_v20  ;;  %s1998_s15 = smov 64   ;;  %s1999_s16 = smov 32   ;;  %vm1271_vm3 = vcmask 523264   ;;  %vm1273_vm4 = vcmask 785408  }
  0x95   : > { %v386_v51 = vrot.slane %v373_v22, %v385_v49  ;;  %v1805_v49 = vld [vmem:[#allocation4 + $0x20] sm:$0xff]  }
  0x96   : > { %525 = vmatpush1.bf16.msra.mxu1 %v1780_v8 }
  0x97   : > { %526 = vmatprep.subr.bf16.mxu1 %v1781_v9 }
  0x9a   : > { %527 = vmatpush1.bf16.msra.mxu1 %v1783_v10 }
  0x9b   : > { %528 = vmatprep.subr.bf16.mxu1 %v1784_v11 }
  0x9e   : > { %529 = vmatpush1.bf16.msra.mxu1 %v1786_v12 }
  0x9f   : > { %530 = vmatprep.subr.bf16.mxu1 %v1787_v13 }
  0xa2   : > { %531 = vmatpush1.bf16.msra.mxu1 %v1789_v14 }
  0xa3   : > { %532 = vmatprep.subr.bf16.mxu1 %v1790_v15 }
  0xa6   : > { %533 = vmatpush1.bf16.msra.mxu1 %v1792_v16 }
  0xa7   : > { %1622 = vmatprep.subr.bf16.mxu1 %v1995_v18 }
  0xa9   : > { %551 = vmatmul.mubr.bf16.vlgmr.msra.gmra.mrb[0].mxu1 %v2257_v17 }
  0xaa   : > { %1638 = vmatprep.mubr.msk.bf16.mxu1 %vm1996_vm0, %v1995_v18  ;;  %1623 = vmatpush3.bf16.msra.mxu1 %v1793_v33 }
  0xab   : > { %1624 = vmatprep.subr.bf16.mxu1 %v1995_v18 }
  0xae   : > { %1625 = vmatpush3.bf16.msra.mxu1 %v1794_v34 }
  0xaf   : > { %1626 = vmatprep.subr.bf16.mxu1 %v1995_v18 }
  0xb2   : > { %1627 = vmatpush3.bf16.msra.mxu1 %v1795_v35 }
  0xb3   : > { %1628 = vmatprep.subr.bf16.mxu1 %v1995_v18 }
  0xb6   : > { %1629 = vmatpush3.bf16.msra.mxu1 %v1796_v36 }
  0xb7   : > { %1630 = vmatprep.subr.bf16.mxu1 %v1995_v18 }
  0xba   : > { %1631 = vmatpush3.bf16.msra.mxu1 %v1797_v37 }
  0xbb   : > { %1632 = vmatprep.subr.bf16.mxu1 %v1995_v18 }
  0xbe   : > { %1633 = vmatpush3.bf16.msra.mxu1 %v1798_v38 }
  0xbf   : > { %1634 = vmatprep.subr.bf16.mxu1 %v1995_v18 }
  0xc2   : > { %1635 = vmatpush3.bf16.msra.mxu1 %v1799_v39 }
  0xc3   : > { %1636 = vmatprep.subr.bf16.mxu1 %v1995_v18 }
  0xc6   : > { %1637 = vmatpush3.bf16.msra.mxu1 %v1800_v40 }
  0xc9   : > { %1639 = vmatmul.mubr.bf16.vlgmr.msra.gmra.mrb[4].mxu1 %v2257_v17 }
 0x17c   : > { %v552_v26 = vpop.f32.mrb[0].mxu1 }
 0x17d   : > { %v553_v27 = vadd.f32 %v552_v26, %v378_v24  ;;  %v554_v28 = vpop.f32.mrb[1].mxu1 }
 0x17e   : > { %v2266_v29 = vadd.f32 %v554_v28, %v382_v25  ;;  %v556_v30 = vpop.f32.mrb[2].mxu1 }
 0x17f   : > { %v557_v31 = vpop.f32.mrb[3].mxu1  ;;  %v2272_v32 = vmul.f32 0.17677669, %v553_v27 }
 0x180   : > { %764 = vrot.lane.b32.xlu1 %v2266_v29, %s1997_s26  ;;  %1643 = vmatpush3.xpose.msk.msra.mxu0 %vm600_vm1, %v2266_v29 }
 0x181   : > { %1647 = vmatprep.subr.mxu0 %v1995_v18 }
 0x183   : > { %1645 = vmatmul.mubr.msk.f32.vlgmr.msra.gmra.mrb[0].mxu0 %vm600_vm1, %v2272_v32 }
 0x184   : > { %762 = vrot.lane.b32.xlu1 %v2272_v32, %s1997_s26  ;;  %1649 = vmatprep.mubr.msk.f32.mxu0 %vm1996_vm0, %v1995_v18 }
 0x19c   : > { %v593_v50 = vpop.f32.mrb[4].mxu1 }
 0x19d   : > { %v1640_v52 = vpop.f32.mrb[5].mxu1  ;;  %v2315_v54 = vadd.f32 %v593_v50, %v386_v51  ;;  %v1806_v50 = vld [vmem:[#allocation4 + $0x28] sm:$0xff]   ;;  %v1807_v51 = vld [vmem:[#allocation4 + $0x30] sm:$0xff]  }
 0x19e   : > { %v596_v53 = vpop.f32.mrb[6].mxu1  ;;  %v1808_v52 = vld [vmem:[#allocation4 + $0x38] sm:$0xff]  }
 0x19f   : > { %v1641_v55 = vpop.f32.mrb[7].mxu1  ;;  %1648 = vmatpush3.msra.mxu0 %v2315_v54 }
 0x1a0   : > { %1652 = vmatprep.subr.mxu0 %v1995_v18 }
 0x1f2   : > { %v765_v58 = vpop.permute.xlu1 %764 }
 0x1f6   : > { %v763_v60 = vpop.permute.xlu1 %762 }
 0x256   : > { %v673_v41 = vpop.f32.mrb[0].mxu0 }
 0x257   : > { %v1646_v42 = vpop.f32.mrb[1].mxu0  ;;  %v678_v43 = vsel %vm677_vm2, %v673_v41, -inf }
 0x258   : > { %679 = vmax.xlane.f32.xlu0 %v678_v43 }
 0x2e5   : > { %v680_v44 = vpop.xlane.xlu0 %679 }
 0x2e6   : > { %v681_v45 = vsub.f32 %v673_v41, %v680_v44 }
 0x2e8   : > { %v682_v46 = vmul.f32 1.442695, %v681_v45  ;;  %v1801_v45 = vld [vmem:[#allocation4] sm:$0xff]  }
 0x2ea   : > { %1809 = vpow2.f32 %v682_v46  ;;  %v1802_v46 = vld [vmem:[#allocation4 + $0x8] sm:$0xff]  }
 0x2f4   : > { %v1810_v47 = vpop.eup %1809 }
 0x2f5   : > { %v684_v48 = vsel %vm677_vm2, %v1810_v47, 0.0 }
 0x2f6   : > { %685 = vadd.xlane.f32.xlu0 %v684_v48  ;;  %v1804_v48 = vld [vmem:[#allocation4 + $0x18] sm:$0xff]  }
 0x383   : > { %v686_v56 = vpop.xlane.xlu0 %685 }
 0x384   : > { %1811 = vrcp.f32 %v686_v56 }
 0x38e   : > { %v1812_v57 = vpop.eup %1811 }
 0x38f   : > { %v688_v59 = vmul.f32 %v1812_v57, %v1810_v47  ;;  %v1803_v47 = vld [vmem:[#allocation4 + $0x10] sm:$0xff]  }
 0x391   : > { %1650 = vmatmul.mubr.msk.f32.vlgmr.msra.gmra.mrb[2].mxu0 %vm677_vm2, %v688_v59 }
 0x392   : > { %1653 = vmatpush3.xpose.msk.msra.mxu0 %vm600_vm1, %v765_v58  ;;  %1654 = vmatprep.mubr.msk.f32.mxu0 %vm1996_vm0, %v1995_v18 }
 0x393   : > { %1657 = vmatprep.subr.mxu0 %v1995_v18 }
 0x395   : > { %1655 = vmatmul.mubr.msk.f32.vlgmr.msra.gmra.mrb[4].mxu0 %vm600_vm1, %v763_v60 }
 0x396   : > { %1659 = vmatprep.mubr.msk.f32.mxu0 %vm1996_vm0, %v1995_v18 }
 0x464   : > { %v2327_v61 = vpop.f32.mrb[2].mxu0 }
 0x465   : > { %v1651_v62 = vpop.f32.mrb[3].mxu0 }
 0x468   : > { %v836_v63 = vpop.f32.mrb[4].mxu0 }
 0x469   : > { %v1656_v0 = vpop.f32.mrb[5].mxu0  ;;  %v840_v1 = vsel %vm677_vm2, %v836_v63, -inf }
 0x46a   : > { %841 = vmax.xlane.f32.xlu0 %v840_v1 }
 0x480   : > { %852 = vrot.lane.b32.xlu0 %v2315_v54, %s1997_s26 }
 0x484   : > { %930 = vrot.lane.b32.xlu0 %v2266_v29, %s1998_s15 }
 0x488   : > { %928 = vrot.lane.b32.xlu0 %v2272_v32, %s1998_s15 }
 0x4f7   : > { %v842_v2 = vpop.xlane.xlu0 %841 }
 0x4f8   : > { %v843_v3 = vsub.f32 %v836_v63, %v842_v2  ;;  %v1575_v63 = vld [vmem:[#allocation6] ss:$0 sm:$0xff] }
 0x4fa   : > { %v844_v4 = vmul.f32 1.442695, %v843_v3 }
 0x4fb   : > { %v853_v5 = vpop.permute.xlu0 %852 }
 0x4fc   : > { %1813 = vpow2.f32 %v844_v4  ;;  %1658 = vmatpush3.msra.mxu0 %v853_v5 }
 0x4fd   : > { %1662 = vmatprep.subr.mxu0 %v1995_v18 }
 0x4ff   : > { %v931_v10 = vpop.permute.xlu0 %930 }
 0x503   : > { %v929_v12 = vpop.permute.xlu0 %928 }
 0x506   : > { %v1814_v6 = vpop.eup %1813 }
 0x507   : > { %v846_v7 = vsel %vm677_vm2, %v1814_v6, 0.0 }
 0x508   : > { %847 = vadd.xlane.f32.xlu1 %v846_v7 }
 0x519   : > { %1017 = vrot.lane.b32.xlu1 %v2315_v54, %s1998_s15 }
 0x51d   : > { %1095 = vrot.lane.b32.xlu1 %v2266_v29, %s1999_s16 }
 0x595   : > { %v848_v8 = vpop.xlane.xlu1 %847 }
 0x596   : > { %1815 = vrcp.f32 %v848_v8 }
 0x599   : > { %v1018_v13 = vpop.permute.xlu1 %1017 }
 0x59d   : > { %v1096_v26 = vpop.permute.xlu1 %1095 }
 0x5a0   : > { %v1816_v9 = vpop.eup %1815 }
 0x5a1   : > { %v850_v11 = vmul.f32 %v1816_v9, %v1814_v6 }
 0x5a3   : > { %1660 = vmatmul.mubr.msk.f32.vlgmr.msra.gmra.mrb[6].mxu0 %vm677_vm2, %v850_v11 }
 0x5a4   : > { %1663 = vmatpush3.xpose.msk.msra.mxu0 %vm600_vm1, %v931_v10  ;;  %1664 = vmatprep.mubr.msk.f32.mxu0 %vm1996_vm0, %v1995_v18 }
 0x5a5   : > { %1667 = vmatprep.subr.mxu0 %v1995_v18 }
 0x5a7   : > { %1665 = vmatmul.mubr.msk.f32.vlgmr.msra.gmra.mrb[8].mxu0 %vm600_vm1, %v929_v12 }
 0x5a8   : > { %1668 = vmatpush3.msra.mxu0 %v1018_v13  ;;  %1669 = vmatprep.mubr.msk.f32.mxu0 %vm1996_vm0, %v1995_v18  ;;  %v1584_v13 = vld [vmem:[#allocation7] ss:$0 sm:$0xff] }
 0x5a9   : > { %1672 = vmatprep.subr.mxu0 %v1995_v18 }
 0x676   : > { %v924_v14 = vpop.f32.mrb[6].mxu0 }
 0x677   : > { %v1661_v15 = vpop.f32.mrb[7].mxu0 }
 0x67a   : > { %v1002_v16 = vpop.f32.mrb[8].mxu0 }
 0x67b   : > { %v1666_v19 = vpop.f32.mrb[9].mxu0  ;;  %v1006_v20 = vsel %vm677_vm2, %v1002_v16, -inf }
 0x67c   : > { %1007 = vmax.xlane.f32.xlu0 %v1006_v20 }
 0x709   : > { %v1008_v21 = vpop.xlane.xlu0 %1007 }
 0x70a   : > { %v1009_v22 = vsub.f32 %v1002_v16, %v1008_v21 }
 0x70c   : > { %v1010_v23 = vmul.f32 1.442695, %v1009_v22 }
 0x70e   : > { %1817 = vpow2.f32 %v1010_v23 }
 0x718   : > { %v1818_v24 = vpop.eup %1817 }
 0x719   : > { %v1012_v25 = vsel %vm677_vm2, %v1818_v24, 0.0 }
 0x71a   : > { %1013 = vadd.xlane.f32.xlu1 %v1012_v25 }
 0x72b   : > { %1093 = vrot.lane.b32.xlu1 %v2272_v32, %s1999_s16 }
 0x7a7   : > { %v1014_v27 = vpop.xlane.xlu1 %1013 }
 0x7a8   : > { %1819 = vrcp.f32 %v1014_v27 }
 0x7ab   : > { %v1094_v30 = vpop.permute.xlu1 %1093 }
 0x7b2   : > { %v1820_v28 = vpop.eup %1819 }
 0x7b3   : > { %v1016_v29 = vmul.f32 %v1820_v28, %v1818_v24 }
 0x7b5   : > { %1670 = vmatmul.mubr.msk.f32.vlgmr.msra.gmra.mrb[10].mxu0 %vm677_vm2, %v1016_v29 }
 0x7b6   : > { %1673 = vmatpush3.xpose.msk.msra.mxu0 %vm600_vm1, %v1096_v26  ;;  %1674 = vmatprep.mubr.msk.f32.mxu0 %vm1996_vm0, %v1995_v18 }
 0x7b7   : > { %1677 = vmatprep.subr.mxu0 %v1995_v18 }
 0x7b9   : > { %1675 = vmatmul.mubr.msk.f32.vlgmr.msra.gmra.mrb[12].mxu0 %vm600_vm1, %v1094_v30 }
 0x7ba   : > { %1679 = vmatprep.mubr.msk.f32.mxu0 %vm1996_vm0, %v1995_v18 }
 0x888   : > { %v1089_v31 = vpop.f32.mrb[10].mxu0 }
 0x889   : > { %v1671_v32 = vpop.f32.mrb[11].mxu0 }
 0x88c   : > { %v1167_v33 = vpop.f32.mrb[12].mxu0 }
 0x88d   : > { %v1676_v34 = vpop.f32.mrb[13].mxu0  ;;  %v1171_v35 = vsel %vm677_vm2, %v1167_v33, -inf }
 0x88e   : > { %1172 = vmax.xlane.f32.xlu0 %v1171_v35 }
 0x8a4   : > { %1182 = vrot.lane.b32.xlu0 %v2315_v54, %s1999_s16 }
 0x8a8   : > { %1259 = vrot.lane.b32.xlu0 %v924_v14, %s1999_s16  ;;  %v1585_v14 = vld [vmem:[#allocation9] ss:$0 sm:$0xff] }
 0x8ac   : > { %1263 = vrot.lane.b32.xlu0 %v1089_v31, %s1998_s15 }
 0x91b   : > { %v1173_v36 = vpop.xlane.xlu0 %1172 }
 0x91c   : > { %v1174_v37 = vsub.f32 %v1167_v33, %v1173_v36 }
 0x91e   : > { %v1175_v38 = vmul.f32 1.442695, %v1174_v37 }
 0x91f   : > { %v1183_v39 = vpop.permute.xlu0 %1182 }
 0x920   : > { %1821 = vpow2.f32 %v1175_v38  ;;  %1678 = vmatpush3.msra.mxu0 %v1183_v39 }
 0x921   : > { %1682 = vmatprep.subr.bf16.mxu0 %v1995_v18 }
 0x923   : > { %v1260_v55 = vpop.permute.xlu0 %1259 }
 0x924   : > { %v1270_v57 = vsel %vm600_vm1, %v2327_v61, %v1260_v55 }
 0x927   : > { %v1264_v56 = vpop.permute.xlu0 %1263 }
 0x928   : > { %v1272_v58 = vsel %vm1271_vm3, %v1270_v57, %v1264_v56 }
 0x92a   : > { %v1822_v40 = vpop.eup %1821 }
 0x92b   : > { %v1177_v41 = vsel %vm677_vm2, %v1822_v40, 0.0 }
 0x92c   : > { %1178 = vadd.xlane.f32.xlu1 %v1177_v41 }
 0x9b9   : > { %v1179_v42 = vpop.xlane.xlu1 %1178 }
 0x9ba   : > { %1823 = vrcp.f32 %v1179_v42 }
 0x9c4   : > { %v1824_v43 = vpop.eup %1823 }
 0x9c5   : > { %v1181_v44 = vmul.f32 %v1824_v43, %v1822_v40 }
 0x9c7   : > { %1680 = vmatmul.mubr.msk.f32.vlgmr.msra.gmra.mrb[14].mxu0 %vm677_vm2, %v1181_v44 }
 0x9c8   : > { %1698 = vmatprep.mubr.msk.bf16.mxu0 %vm1996_vm0, %v1995_v18  ;;  %1683 = vmatpush3.bf16.msra.mxu0 %v1801_v45 }
 0x9c9   : > { %1684 = vmatprep.subr.bf16.mxu0 %v1995_v18 }
 0x9cc   : > { %1685 = vmatpush3.bf16.msra.mxu0 %v1802_v46 }
 0x9cd   : > { %1686 = vmatprep.subr.bf16.mxu0 %v1995_v18 }
 0x9d0   : > { %1687 = vmatpush3.bf16.msra.mxu0 %v1803_v47 }
 0x9d1   : > { %1688 = vmatprep.subr.bf16.mxu0 %v1995_v18 }
 0x9d4   : > { %1689 = vmatpush3.bf16.msra.mxu0 %v1804_v48 }
 0x9d5   : > { %1690 = vmatprep.subr.bf16.mxu0 %v1995_v18 }
 0x9d8   : > { %1691 = vmatpush3.bf16.msra.mxu0 %v1805_v49 }
 0x9d9   : > { %1692 = vmatprep.subr.bf16.mxu0 %v1995_v18 }
 0x9dc   : > { %1693 = vmatpush3.bf16.msra.mxu0 %v1806_v50 }
 0x9dd   : > { %1694 = vmatprep.subr.bf16.mxu0 %v1995_v18 }
 0x9e0   : > { %1695 = vmatpush3.bf16.msra.mxu0 %v1807_v51 }
 0x9e1   : > { %1696 = vmatprep.subr.bf16.mxu0 %v1995_v18  ;;  %v1387_v18 = vunpack.c.l.bf16 %v2257_v17 }
 0x9e4   : > { %1697 = vmatpush3.bf16.msra.mxu0 %v1808_v52 }
 0xa9a   : > { %v1254_v53 = vpop.f32.mrb[14].mxu0 }
 0xa9b   : > { %1267 = vrot.lane.b32.xlu0 %v1254_v53, %s1997_s26  ;;  %v1681_v54 = vpop.f32.mrb[15].mxu0 }
 0xb0d   : > { %v1268_v59 = vpop.permute.xlu0 %1267 }
 0xb0e   : > { %v1274_v60 = vsel %vm1273_vm4, %v1272_v58, %v1268_v59 }
 0xb0f   : > { %v1275_v62 = vpack.c.bf16 %v1274_v60, %v1274_v60 }
 0xb11   : > { %1699 = vmatmul.mubr.bf16.vlgmr.msra.gmra.mrb[16].mxu0 %v1275_v62 }
 0xbe4   : > { %v1381_v0 = vpop.f32.mrb[16].mxu0 }
 0xbe5   : > { %v1382_v1 = vadd.f32 %v1575_v63, %v1381_v0  ;;  %v1700_v2 = vpop.f32.mrb[17].mxu0 }
 0xbe6   : > { %v1384_v3 = vpop.f32.mrb[18].mxu0 }
 0xbe7   : > { %v1701_v4 = vpop.f32.mrb[19].mxu0  ;;  %v1388_v5 = vadd.f32 %v1387_v18, %v1382_v1 }
 0xbe9   : > { %1389 = vadd.xlane.f32.xlu1 %v1388_v5 }
 0xc76   : > { %v1390_v6 = vpop.xlane.xlu1 %1389 }
 0xc77   : > { %v1392_v7 = vmul.f32 0.0078125, %v1390_v6 }
 0xc79   : > { %v1393_v8 = vsub.f32 %v1388_v5, %v1392_v7 }
 0xc7b   : > { %v1394_v61 = vmul.f32 %v1393_v8, %v1393_v8 }
 0xc7d   : > { %1395 = vadd.xlane.f32.xlu0 %v1394_v61 }
 0xd0a   : > { %v1396_v9 = vpop.xlane.xlu0 %1395 }
 0xd0b   : > { %v1397_v10 = vmul.f32 0.0078125, %v1396_v9 }
 0xd0d   : > { %v1398_v11 = vadd.f32 1e-12, %v1397_v10 }
 0xd0f   : > { %1825 = vrsqrt.f32 %v1398_v11 }
 0xd19   : > { %v1826_v12 = vpop.eup %1825 }
 0xd1a   : > { %v1400_v17 = vmul.f32 %v1826_v12, %v1393_v8 }
 0xd1c   : > { %v1408_v15 = vmul.f32 %v1584_v13, %v1400_v17 }
 0xd1e   : > { %v1416_v16 = vadd.f32 %v1585_v14, %v1408_v15 }
 0xd20   : > { %v1417_v19 = vpack.c.bf16 %v1416_v16, %v1416_v16 }
 0xd22   : > { %1418 = vst [vmem:[%s338_s19] sm:$0xf] %v1417_v19 }
 0xd23 PF: > { %s20_s24 = sadd.s32 1, %s1985_s24  }
 0xd24   : > { %p17_p6 = scmp.ge.s32.totalorder %s20_s24, 4  }
 0xd26   :  { %19 = sbr.rel (!%p17_p6) target bundleno = 3 (0x3), region = 99 }
 0xd2d   :  { %1438 = vsyncpa [#allocation3], 1 }
 0xd2e   :  { %1440 = vsyncpa [#allocation3 + $0x1], 1 }
 0xd2f   :  { %1441 = vsyncpa [#allocation5], 1 }
 0xd30   :  { %1442 = vsyncpa [#allocation8], 1 }

// kernel: bert_ner_forward.9
= control target key start
LH: loop header
LB: loop body
LE: loop exit
PB: predicated region body
PF: predicated region fallthrough
CT: control target
= control target key end

     0   :  { %s1703_s24 = smov 0   ;;  %s1938_s0 = inlined_call_operand.vmem [shape: bf16[2,8,128], index: 0, kind: input, shape index: {}]   ;;  %s1939_s1 = inlined_call_operand.vmem [shape: bf16[128,384], index: 1, kind: input, shape index: {}]   ;;  %s1940_s2 = inlined_call_operand.vmem [shape: f32[1,384], index: 2, kind: input, shape index: {}]   ;;  %s1941_s3 = inlined_call_operand.vmem [shape: bf16[128,128], index: 3, kind: input, shape index: {}]   ;;  %s1942_s4 = inlined_call_operand.vmem [shape: f32[1,128], index: 4, kind: input, shape index: {}]   ;;  %s1943_s5 = inlined_call_operand.vmem [shape: f32[1,128], index: 5, kind: input, shape index: {}]   ;;  %s1944_s6 = inlined_call_operand.vmem [shape: f32[1,128], index: 6, kind: input, shape index: {}]   ;;  %s1945_s7 = inlined_call_operand.vmem [shape: bf16[2,8,128], index: 7, kind: output, shape index: {}]  }
   0x1 LB: > { %s1407_s25 = sadd.s32 4294967295, %s1655_s24   ;;  %p1411_p0 = scmp.ge.s32.totalorder %s1655_s24, 1  ;;  %s1655_s24 = sphi %s1703_s24, %s17_s24  }
   0x2   : > { %p236_p1 = scmp.lt.s32.totalorder %s1655_s24, 3 }
   0x4   : > { %p237_p2 = pnand %p1411_p0, %p236_p1 }
   0x5   : > { %v1591_v0 = vld [vmem:[%s1939_s1 + $0x4] ss:$12 sps:$4 sm:$0xff] (!%p237_p2)   ;;  %v1593_v1 = vld [vmem:[%s1939_s1] ss:$12 sps:$4 sm:$0xff] (!%p237_p2)   ;;  %v1657_v2 = vmov (!%p237_p2), 0   ;;  %p266_p3 = scmp.lt.s32.totalorder (!%p237_p2), %s1407_s25, 1  ;;  %v310_v19 = vlaneseq (!%p237_p2) }
   0x6   : > { %240 = sbr.rel (%p237_p2) target bundleno = 3232 (0xca0), region = 48  ;;  %485 = vmatprep.mubr.bf16.mxu1 (!%p237_p2), %v1657_v2  ;;  %453 = vmatprep.subr.bf16.mxu1 (!%p237_p2), %v1591_v0  ;;  %v1594_v3 = vld [vmem:[%s1939_s1 + $0x1c] ss:$12 sps:$4 sm:$0xff] (!%p237_p2)   ;;  %v1596_v4 = vld [vmem:[%s1939_s1 + $0x18] ss:$12 sps:$4 sm:$0xff] (!%p237_p2)   ;;  %v1658_v18 = vmov (!%p237_p2), 0.0  }
   0x7   : > { %454 = vmatpush1.bf16.msra.mxu1 (!%p237_p2), %v1593_v1  ;;  %v1597_v5 = vld [vmem:[%s1939_s1 + $0x34] ss:$12 sps:$4 sm:$0xff] (!%p237_p2)   ;;  %v1599_v6 = vld [vmem:[%s1939_s1 + $0x30] ss:$12 sps:$4 sm:$0xff] (!%p237_p2)   ;;  %v1600_v7 = vld [vmem:[%s1939_s1 + $0x4c] ss:$12 sps:$4 sm:$0xff] (!%p237_p2)   ;;  %1517 = vmatprep.subr.mxu0 (!%p237_p2), %v1658_v18 }
   0x8   : > { %455 = vmatprep.subr.bf16.mxu1 (!%p237_p2), %v1594_v3  ;;  %v1602_v8 = vld [vmem:[%s1939_s1 + $0x48] ss:$12 sps:$4 sm:$0xff] (!%p237_p2)   ;;  %v1603_v9 = vld [vmem:[%s1939_s1 + $0x64] ss:$12 sps:$4 sm:$0xff] (!%p237_p2)   ;;  %v1605_v10 = vld [vmem:[%s1939_s1 + $0x60] ss:$12 sps:$4 sm:$0xff] (!%p237_p2)  }
   0x9   : > { %v1606_v11 = vld [vmem:[%s1939_s1 + $0x7c] ss:$12 sps:$4 sm:$0xff] (!%p237_p2)   ;;  %v1608_v12 = vld [vmem:[%s1939_s1 + $0x78] ss:$12 sps:$4 sm:$0xff] (!%p237_p2)   ;;  %v1609_v13 = vld [vmem:[%s1939_s1 + $0x94] ss:$12 sps:$4 sm:$0xff] (!%p237_p2)  }
   0xa   : > { %v1611_v14 = vld [vmem:[%s1939_s1 + $0x90] ss:$12 sps:$4 sm:$0xff] (!%p237_p2)   ;;  %v1612_v15 = vld [vmem:[%s1939_s1 + $0xac] ss:$12 sps:$4 sm:$0xff] (!%p237_p2)   ;;  %v1614_v16 = vld [vmem:[%s1939_s1 + $0xa8] ss:$12 sps:$4 sm:$0xff] (!%p237_p2)  }
   0xb   : > { %456 = vmatpush1.bf16.msra.mxu1 (!%p237_p2), %v1596_v4  ;;  %vm1659_vm0 = vmmov (!%p237_p2), 0   ;;  %v311_v20 = vshrl.u32 (!%p237_p2), %v310_v19, 7  ;;  %v308_v22 = vld [vmem:[%s1940_s2] sm:$0x7] (!%p237_p2)  ;;  %vm535_vm1 = vcmask (!%p237_p2), 261120   ;;  %s1660_s20 = smov (!%p237_p2), 96  }
   0xc   : > { %457 = vmatprep.subr.bf16.mxu1 (!%p237_p2), %v1597_v5  ;;  %1519 = vmatprep.mubr.msk.f32.mxu0 (!%p237_p2), %vm1659_vm0, %v1658_v18  ;;  %v1615_v33 = vld [vmem:[%s1939_s1 + $0x8] ss:$12 sps:$4 sm:$0xff] (!%p237_p2)   ;;  %v1616_v34 = vld [vmem:[%s1939_s1 + $0x20] ss:$12 sps:$4 sm:$0xff] (!%p237_p2)   ;;  %v1617_v35 = vld [vmem:[%s1939_s1 + $0x38] ss:$12 sps:$4 sm:$0xff] (!%p237_p2)  }
   0xd   : > { %s1947_s25 = smov (!%p266_p3, %s1407_s25), 1  ;;  %v312_v21 = vsub.s32 0, %v311_v20  ;;  %v316_v23 = vsub.s32 1, %v311_v20  ;;  %v1618_v36 = vld [vmem:[%s1939_s1 + $0x50] ss:$12 sps:$4 sm:$0xff]   ;;  %vm612_vm2 = vcmask 64512  }
   0xe   : > { %s1412_s12 = sshll.u32 %s1947_s25, 2  ;;  %v1619_v37 = vld [vmem:[%s1939_s1 + $0x68] ss:$12 sps:$4 sm:$0xff]   ;;  %v1620_v38 = vld [vmem:[%s1939_s1 + $0x80] ss:$12 sps:$4 sm:$0xff]   ;;  %v320_v49 = vsub.s32 2, %v311_v20 }
   0xf   : > { %458 = vmatpush1.bf16.msra.mxu1 %v1599_v6  ;;  %s269_s17 = scalar_lea.vmem %s1938_s0, %s1412_s12  ;;  %v313_v24 = vrot.slane %v308_v22, %v312_v21  ;;  %v317_v25 = vrot.slane %v308_v22, %v316_v23  ;;  %v1621_v39 = vld [vmem:[%s1939_s1 + $0x98] ss:$12 sps:$4 sm:$0xff]   ;;  %v1622_v40 = vld [vmem:[%s1939_s1 + $0xb0] ss:$12 sps:$4 sm:$0xff]   ;;  %s1662_s18 = smov 32   ;;  %vm1206_vm3 = vcmask 523264  }
  0x10   : > { %459 = vmatprep.subr.bf16.mxu1 %v1600_v7  ;;  %v1767_v17 = vld [vmem:[%s269_s17] sm:$0xf]  ;;  %v321_v51 = vrot.slane %v308_v22, %v320_v49  ;;  %s1661_s17 = smov 64   ;;  %vm1208_vm4 = vcmask 785408   ;;  %s273_s26 = scalar_lea.vmem %s1945_s7, %s1412_s12 }
  0x11   : > { %v1627_v49 = vld [vmem:[%s1941_s3 + $0x20] sm:$0xff]  }
  0x13   : > { %460 = vmatpush1.bf16.msra.mxu1 %v1602_v8 }
  0x14   : > { %461 = vmatprep.subr.bf16.mxu1 %v1603_v9 }
  0x17   : > { %462 = vmatpush1.bf16.msra.mxu1 %v1605_v10 }
  0x18   : > { %463 = vmatprep.subr.bf16.mxu1 %v1606_v11 }
  0x1b   : > { %464 = vmatpush1.bf16.msra.mxu1 %v1608_v12 }
  0x1c   : > { %465 = vmatprep.subr.bf16.mxu1 %v1609_v13 }
  0x1f   : > { %466 = vmatpush1.bf16.msra.mxu1 %v1611_v14 }
  0x20   : > { %467 = vmatprep.subr.bf16.mxu1 %v1612_v15 }
  0x23   : > { %468 = vmatpush1.bf16.msra.mxu1 %v1614_v16 }
  0x24   : > { %1497 = vmatprep.subr.bf16.mxu1 %v1658_v18 }
  0x26   : > { %486 = vmatmul.mubr.bf16.vlgmr.msra.gmra.mrb[0].mxu1 %v1767_v17 }
  0x27   : > { %1513 = vmatprep.mubr.msk.bf16.mxu1 %vm1659_vm0, %v1658_v18  ;;  %1498 = vmatpush3.bf16.msra.mxu1 %v1615_v33 }
  0x28   : > { %1499 = vmatprep.subr.bf16.mxu1 %v1658_v18 }
  0x2b   : > { %1500 = vmatpush3.bf16.msra.mxu1 %v1616_v34 }
  0x2c   : > { %1501 = vmatprep.subr.bf16.mxu1 %v1658_v18 }
  0x2f   : > { %1502 = vmatpush3.bf16.msra.mxu1 %v1617_v35 }
  0x30   : > { %1503 = vmatprep.subr.bf16.mxu1 %v1658_v18 }
  0x33   : > { %1504 = vmatpush3.bf16.msra.mxu1 %v1618_v36 }
  0x34   : > { %1505 = vmatprep.subr.bf16.mxu1 %v1658_v18 }
  0x37   : > { %1506 = vmatpush3.bf16.msra.mxu1 %v1619_v37 }
  0x38   : > { %1507 = vmatprep.subr.bf16.mxu1 %v1658_v18 }
  0x3b   : > { %1508 = vmatpush3.bf16.msra.mxu1 %v1620_v38 }
  0x3c   : > { %1509 = vmatprep.subr.bf16.mxu1 %v1658_v18 }
  0x3f   : > { %1510 = vmatpush3.bf16.msra.mxu1 %v1621_v39 }
  0x40   : > { %1511 = vmatprep.subr.bf16.mxu1 %v1658_v18 }
  0x43   : > { %1512 = vmatpush3.bf16.msra.mxu1 %v1622_v40 }
  0x46   : > { %1514 = vmatmul.mubr.bf16.vlgmr.msra.gmra.mrb[4].mxu1 %v1767_v17 }
  0xf9   : > { %v487_v26 = vpop.f32.mrb[0].mxu1 }
  0xfa   : > { %v488_v27 = vadd.f32 %v487_v26, %v313_v24  ;;  %v489_v28 = vpop.f32.mrb[1].mxu1 }
  0xfb   : > { %v1779_v29 = vadd.f32 %v489_v28, %v317_v25  ;;  %v491_v30 = vpop.f32.mrb[2].mxu1 }
  0xfc   : > { %v492_v31 = vpop.f32.mrb[3].mxu1  ;;  %v1785_v32 = vmul.f32 0.17677669, %v488_v27 }
  0xfd   : > { %699 = vrot.lane.b32.xlu1 %v1779_v29, %s1660_s20  ;;  %1518 = vmatpush3.xpose.msk.msra.mxu0 %vm535_vm1, %v1779_v29 }
  0xfe   : > { %1522 = vmatprep.subr.mxu0 %v1658_v18 }
 0x100   : > { %1520 = vmatmul.mubr.msk.f32.vlgmr.msra.gmra.mrb[0].mxu0 %vm535_vm1, %v1785_v32 }
 0x101   : > { %697 = vrot.lane.b32.xlu1 %v1785_v32, %s1660_s20  ;;  %1524 = vmatprep.mubr.msk.f32.mxu0 %vm1659_vm0, %v1658_v18 }
 0x119   : > { %v528_v50 = vpop.f32.mrb[4].mxu1 }
 0x11a   : > { %v1515_v52 = vpop.f32.mrb[5].mxu1  ;;  %v1828_v54 = vadd.f32 %v528_v50, %v321_v51  ;;  %v1628_v50 = vld [vmem:[%s1941_s3 + $0x28] sm:$0xff]   ;;  %v1629_v51 = vld [vmem:[%s1941_s3 + $0x30] sm:$0xff]  }
 0x11b   : > { %v531_v53 = vpop.f32.mrb[6].mxu1  ;;  %v1630_v52 = vld [vmem:[%s1941_s3 + $0x38] sm:$0xff]  }
 0x11c   : > { %v1516_v55 = vpop.f32.mrb[7].mxu1  ;;  %1523 = vmatpush3.msra.mxu0 %v1828_v54 }
 0x11d   : > { %1527 = vmatprep.subr.mxu0 %v1658_v18 }
 0x16f   : > { %v700_v58 = vpop.permute.xlu1 %699 }
 0x173   : > { %v698_v60 = vpop.permute.xlu1 %697 }
 0x1d3   : > { %v608_v41 = vpop.f32.mrb[0].mxu0 }
 0x1d4   : > { %v1521_v42 = vpop.f32.mrb[1].mxu0  ;;  %v613_v43 = vsel %vm612_vm2, %v608_v41, -inf }
 0x1d5   : > { %614 = vmax.xlane.f32.xlu0 %v613_v43 }
 0x262   : > { %v615_v44 = vpop.xlane.xlu0 %614 }
 0x263   : > { %v616_v45 = vsub.f32 %v608_v41, %v615_v44 }
 0x265   : > { %v617_v46 = vmul.f32 1.442695, %v616_v45  ;;  %v1623_v45 = vld [vmem:[%s1941_s3] sm:$0xff]  }
 0x267   : > { %1631 = vpow2.f32 %v617_v46  ;;  %v1624_v46 = vld [vmem:[%s1941_s3 + $0x8] sm:$0xff]  }
 0x271   : > { %v1632_v47 = vpop.eup %1631 }
 0x272   : > { %v619_v48 = vsel %vm612_vm2, %v1632_v47, 0.0 }
 0x273   : > { %620 = vadd.xlane.f32.xlu0 %v619_v48  ;;  %v1626_v48 = vld [vmem:[%s1941_s3 + $0x18] sm:$0xff]  }
 0x300   : > { %v621_v56 = vpop.xlane.xlu0 %620 }
 0x301   : > { %1633 = vrcp.f32 %v621_v56 }
 0x30b   : > { %v1634_v57 = vpop.eup %1633 }
 0x30c   : > { %v623_v59 = vmul.f32 %v1634_v57, %v1632_v47  ;;  %v1625_v47 = vld [vmem:[%s1941_s3 + $0x10] sm:$0xff]  }
 0x30e   : > { %1525 = vmatmul.mubr.msk.f32.vlgmr.msra.gmra.mrb[2].mxu0 %vm612_vm2, %v623_v59 }
 0x30f   : > { %1528 = vmatpush3.xpose.msk.msra.mxu0 %vm535_vm1, %v700_v58  ;;  %1529 = vmatprep.mubr.msk.f32.mxu0 %vm1659_vm0, %v1658_v18 }
 0x310   : > { %1532 = vmatprep.subr.mxu0 %v1658_v18 }
 0x312   : > { %1530 = vmatmul.mubr.msk.f32.vlgmr.msra.gmra.mrb[4].mxu0 %vm535_vm1, %v698_v60 }
 0x313   : > { %1534 = vmatprep.mubr.msk.f32.mxu0 %vm1659_vm0, %v1658_v18 }
 0x3e1   : > { %v1840_v61 = vpop.f32.mrb[2].mxu0 }
 0x3e2   : > { %v1526_v62 = vpop.f32.mrb[3].mxu0 }
 0x3e3   : > { %v1450_v62 = vld [vmem:[%s1942_s4] ss:$0 sm:$0xff] }
 0x3e5   : > { %v771_v63 = vpop.f32.mrb[4].mxu0 }
 0x3e6   : > { %v1531_v0 = vpop.f32.mrb[5].mxu0  ;;  %v775_v1 = vsel %vm612_vm2, %v771_v63, -inf }
 0x3e7   : > { %776 = vmax.xlane.f32.xlu0 %v775_v1 }
 0x3fd   : > { %787 = vrot.lane.b32.xlu0 %v1828_v54, %s1660_s20 }
 0x401   : > { %865 = vrot.lane.b32.xlu0 %v1779_v29, %s1661_s17 }
 0x405   : > { %863 = vrot.lane.b32.xlu0 %v1785_v32, %s1661_s17 }
 0x474   : > { %v777_v2 = vpop.xlane.xlu0 %776 }
 0x475   : > { %v778_v3 = vsub.f32 %v771_v63, %v777_v2  ;;  %v1322_v63 = vunpack.c.l.bf16 %v1767_v17  ;;  %v1459_v17 = vld [vmem:[%s1943_s5] ss:$0 sm:$0xff] }
 0x477   : > { %v779_v4 = vmul.f32 1.442695, %v778_v3 }
 0x478   : > { %v788_v5 = vpop.permute.xlu0 %787 }
 0x479   : > { %1635 = vpow2.f32 %v779_v4  ;;  %1533 = vmatpush3.msra.mxu0 %v788_v5 }
 0x47a   : > { %1537 = vmatprep.subr.mxu0 %v1658_v18 }
 0x47c   : > { %v866_v10 = vpop.permute.xlu0 %865 }
 0x480   : > { %v864_v12 = vpop.permute.xlu0 %863 }
 0x483   : > { %v1636_v6 = vpop.eup %1635 }
 0x484   : > { %v781_v7 = vsel %vm612_vm2, %v1636_v6, 0.0 }
 0x485   : > { %782 = vadd.xlane.f32.xlu1 %v781_v7 }
 0x496   : > { %952 = vrot.lane.b32.xlu1 %v1828_v54, %s1661_s17 }
 0x49a   : > { %1030 = vrot.lane.b32.xlu1 %v1779_v29, %s1662_s18 }
 0x512   : > { %v783_v8 = vpop.xlane.xlu1 %782 }
 0x513   : > { %1637 = vrcp.f32 %v783_v8 }
 0x516   : > { %v953_v13 = vpop.permute.xlu1 %952 }
 0x51a   : > { %v1031_v26 = vpop.permute.xlu1 %1030 }
 0x51d   : > { %v1638_v9 = vpop.eup %1637 }
 0x51e   : > { %v785_v11 = vmul.f32 %v1638_v9, %v1636_v6 }
 0x520   : > { %1535 = vmatmul.mubr.msk.f32.vlgmr.msra.gmra.mrb[6].mxu0 %vm612_vm2, %v785_v11 }
 0x521   : > { %1538 = vmatpush3.xpose.msk.msra.mxu0 %vm535_vm1, %v866_v10  ;;  %1539 = vmatprep.mubr.msk.f32.mxu0 %vm1659_vm0, %v1658_v18 }
 0x522   : > { %1542 = vmatprep.subr.mxu0 %v1658_v18 }
 0x524   : > { %1540 = vmatmul.mubr.msk.f32.vlgmr.msra.gmra.mrb[8].mxu0 %vm535_vm1, %v864_v12 }
 0x525   : > { %1543 = vmatpush3.msra.mxu0 %v953_v13  ;;  %1544 = vmatprep.mubr.msk.f32.mxu0 %vm1659_vm0, %v1658_v18 }
 0x526   : > { %1547 = vmatprep.subr.mxu0 %v1658_v18 }
 0x5f3   : > { %v859_v14 = vpop.f32.mrb[6].mxu0 }
 0x5f4   : > { %v1536_v15 = vpop.f32.mrb[7].mxu0 }
 0x5f7   : > { %v937_v16 = vpop.f32.mrb[8].mxu0 }
 0x5f8   : > { %v1541_v19 = vpop.f32.mrb[9].mxu0  ;;  %v941_v20 = vsel %vm612_vm2, %v937_v16, -inf }
 0x5f9   : > { %942 = vmax.xlane.f32.xlu0 %v941_v20 }
 0x686   : > { %v943_v21 = vpop.xlane.xlu0 %942 }
 0x687   : > { %v944_v22 = vsub.f32 %v937_v16, %v943_v21 }
 0x689   : > { %v945_v23 = vmul.f32 1.442695, %v944_v22 }
 0x68b   : > { %1639 = vpow2.f32 %v945_v23 }
 0x695   : > { %v1640_v24 = vpop.eup %1639 }
 0x696   : > { %v947_v25 = vsel %vm612_vm2, %v1640_v24, 0.0 }
 0x697   : > { %948 = vadd.xlane.f32.xlu1 %v947_v25 }
 0x6a8   : > { %1028 = vrot.lane.b32.xlu1 %v1785_v32, %s1662_s18 }
 0x724   : > { %v949_v27 = vpop.xlane.xlu1 %948 }
 0x725   : > { %1641 = vrcp.f32 %v949_v27 }
 0x728   : > { %v1029_v30 = vpop.permute.xlu1 %1028 }
 0x72f   : > { %v1642_v28 = vpop.eup %1641 }
 0x730   : > { %v951_v29 = vmul.f32 %v1642_v28, %v1640_v24 }
 0x732   : > { %1545 = vmatmul.mubr.msk.f32.vlgmr.msra.gmra.mrb[10].mxu0 %vm612_vm2, %v951_v29 }
 0x733   : > { %1548 = vmatpush3.xpose.msk.msra.mxu0 %vm535_vm1, %v1031_v26  ;;  %1549 = vmatprep.mubr.msk.f32.mxu0 %vm1659_vm0, %v1658_v18 }
 0x734   : > { %1552 = vmatprep.subr.mxu0 %v1658_v18 }
 0x736   : > { %1550 = vmatmul.mubr.msk.f32.vlgmr.msra.gmra.mrb[12].mxu0 %vm535_vm1, %v1029_v30 }
 0x737   : > { %1554 = vmatprep.mubr.msk.f32.mxu0 %vm1659_vm0, %v1658_v18 }
 0x805   : > { %v1024_v31 = vpop.f32.mrb[10].mxu0 }
 0x806   : > { %v1546_v32 = vpop.f32.mrb[11].mxu0 }
 0x809   : > { %v1102_v33 = vpop.f32.mrb[12].mxu0 }
 0x80a   : > { %v1551_v34 = vpop.f32.mrb[13].mxu0  ;;  %v1106_v35 = vsel %vm612_vm2, %v1102_v33, -inf }
 0x80b   : > { %1107 = vmax.xlane.f32.xlu0 %v1106_v35 }
 0x821   : > { %1117 = vrot.lane.b32.xlu0 %v1828_v54, %s1662_s18 }
 0x825   : > { %1194 = vrot.lane.b32.xlu0 %v859_v14, %s1662_s18  ;;  %v1460_v14 = vld [vmem:[%s1944_s6] ss:$0 sm:$0xff] }
 0x829   : > { %1198 = vrot.lane.b32.xlu0 %v1024_v31, %s1661_s17 }
 0x898   : > { %v1108_v36 = vpop.xlane.xlu0 %1107 }
 0x899   : > { %v1109_v37 = vsub.f32 %v1102_v33, %v1108_v36 }
 0x89b   : > { %v1110_v38 = vmul.f32 1.442695, %v1109_v37 }
 0x89c   : > { %v1118_v39 = vpop.permute.xlu0 %1117 }
 0x89d   : > { %1643 = vpow2.f32 %v1110_v38  ;;  %1553 = vmatpush3.msra.mxu0 %v1118_v39 }
 0x89e   : > { %1557 = vmatprep.subr.bf16.mxu0 %v1658_v18 }
 0x8a0   : > { %v1195_v55 = vpop.permute.xlu0 %1194 }
 0x8a1   : > { %v1205_v57 = vsel %vm535_vm1, %v1840_v61, %v1195_v55 }
 0x8a4   : > { %v1199_v56 = vpop.permute.xlu0 %1198 }
 0x8a5   : > { %v1207_v58 = vsel %vm1206_vm3, %v1205_v57, %v1199_v56 }
 0x8a7   : > { %v1644_v40 = vpop.eup %1643 }
 0x8a8   : > { %v1112_v41 = vsel %vm612_vm2, %v1644_v40, 0.0 }
 0x8a9   : > { %1113 = vadd.xlane.f32.xlu1 %v1112_v41 }
 0x936   : > { %v1114_v42 = vpop.xlane.xlu1 %1113 }
 0x937   : > { %1645 = vrcp.f32 %v1114_v42 }
 0x941   : > { %v1646_v43 = vpop.eup %1645 }
 0x942   : > { %v1116_v44 = vmul.f32 %v1646_v43, %v1644_v40 }
 0x944   : > { %1555 = vmatmul.mubr.msk.f32.vlgmr.msra.gmra.mrb[14].mxu0 %vm612_vm2, %v1116_v44 }
 0x945   : > { %1573 = vmatprep.mubr.msk.bf16.mxu0 %vm1659_vm0, %v1658_v18  ;;  %1558 = vmatpush3.bf16.msra.mxu0 %v1623_v45 }
 0x946   : > { %1559 = vmatprep.subr.bf16.mxu0 %v1658_v18 }
 0x949   : > { %1560 = vmatpush3.bf16.msra.mxu0 %v1624_v46 }
 0x94a   : > { %1561 = vmatprep.subr.bf16.mxu0 %v1658_v18 }
 0x94d   : > { %1562 = vmatpush3.bf16.msra.mxu0 %v1625_v47 }
 0x94e   : > { %1563 = vmatprep.subr.bf16.mxu0 %v1658_v18 }
 0x951   : > { %1564 = vmatpush3.bf16.msra.mxu0 %v1626_v48 }
 0x952   : > { %1565 = vmatprep.subr.bf16.mxu0 %v1658_v18 }
 0x955   : > { %1566 = vmatpush3.bf16.msra.mxu0 %v1627_v49 }
 0x956   : > { %1567 = vmatprep.subr.bf16.mxu0 %v1658_v18 }
 0x959   : > { %1568 = vmatpush3.bf16.msra.mxu0 %v1628_v50 }
 0x95a   : > { %1569 = vmatprep.subr.bf16.mxu0 %v1658_v18 }
 0x95d   : > { %1570 = vmatpush3.bf16.msra.mxu0 %v1629_v51 }
 0x95e   : > { %1571 = vmatprep.subr.bf16.mxu0 %v1658_v18 }
 0x961   : > { %1572 = vmatpush3.bf16.msra.mxu0 %v1630_v52 }
 0xa17   : > { %v1189_v53 = vpop.f32.mrb[14].mxu0 }
 0xa18   : > { %1202 = vrot.lane.b32.xlu0 %v1189_v53, %s1660_s20  ;;  %v1556_v54 = vpop.f32.mrb[15].mxu0 }
 0xa8a   : > { %v1203_v59 = vpop.permute.xlu0 %1202 }
 0xa8b   : > { %v1209_v60 = vsel %vm1208_vm4, %v1207_v58, %v1203_v59 }
 0xa8c   : > { %v1210_v18 = vpack.c.bf16 %v1209_v60, %v1209_v60 }
 0xa8e   : > { %1574 = vmatmul.mubr.bf16.vlgmr.msra.gmra.mrb[16].mxu0 %v1210_v18 }
 0xb61   : > { %v1316_v0 = vpop.f32.mrb[16].mxu0 }
 0xb62   : > { %v1317_v1 = vadd.f32 %v1450_v62, %v1316_v0  ;;  %v1575_v2 = vpop.f32.mrb[17].mxu0 }
 0xb63   : > { %v1319_v3 = vpop.f32.mrb[18].mxu0 }
 0xb64   : > { %v1576_v4 = vpop.f32.mrb[19].mxu0  ;;  %v1323_v5 = vadd.f32 %v1322_v63, %v1317_v1 }
 0xb66   : > { %1324 = vadd.xlane.f32.xlu1 %v1323_v5 }
 0xbf3   : > { %v1325_v61 = vpop.xlane.xlu1 %1324 }
 0xbf4   : > { %v1327_v6 = vmul.f32 0.0078125, %v1325_v61 }
 0xbf6   : > { %v1328_v7 = vsub.f32 %v1323_v5, %v1327_v6 }
 0xbf8   : > { %v1329_v8 = vmul.f32 %v1328_v7, %v1328_v7 }
 0xbfa   : > { %1330 = vadd.xlane.f32.xlu0 %v1329_v8 }
 0xc87   : > { %v1331_v9 = vpop.xlane.xlu0 %1330 }
 0xc88   : > { %v1332_v10 = vmul.f32 0.0078125, %v1331_v9 }
 0xc8a   : > { %v1333_v11 = vadd.f32 1e-12, %v1332_v10 }
 0xc8c   : > { %1647 = vrsqrt.f32 %v1333_v11 }
 0xc96   : > { %v1648_v12 = vpop.eup %1647 }
 0xc97   : > { %v1335_v13 = vmul.f32 %v1648_v12, %v1328_v7 }
 0xc99   : > { %v1343_v15 = vmul.f32 %v1459_v17, %v1335_v13 }
 0xc9b   : > { %v1351_v16 = vadd.f32 %v1460_v14, %v1343_v15 }
 0xc9d   : > { %v1352_v19 = vpack.c.bf16 %v1351_v16, %v1351_v16 }
 0xc9f   : > { %1353 = vst [vmem:[%s273_s26] sm:$0xf] %v1352_v19 }
 0xca0 PF: > { %s17_s24 = sadd.s32 1, %s1655_s24  }
 0xca1   : > { %p14_p4 = scmp.ge.s32.totalorder %s17_s24, 4  }
 0xca3   :  { %16 = sbr.rel (!%p14_p4) target bundleno = 1 (0x1), region = 78 }

// kernel: bert_ner_forward.11
= control target key start
LH: loop header
LB: loop body
LE: loop exit
PB: predicated region body
PF: predicated region fallthrough
CT: control target
= control target key end

     0   :  { %v227_v0 = vmov 0.0   ;;  %vm228_vm0 = vmmov 0   ;;  %s282_s1 = inlined_call_operand.vmem [shape: bf16[128,128], index: 1, kind: input, shape index: {}]   ;;  %s283_s0 = inlined_call_operand.vmem [shape: bf16[16,128], index: 0, kind: input, shape index: {}]   ;;  %s284_s2 = inlined_call_operand.vmem [shape: f32[1,128], index: 2, kind: input, shape index: {}]   ;;  %s285_s3 = inlined_call_operand.vmem [shape: bf16[16,128], index: 3, kind: output, shape index: {}]  }
   0x1   :  { %196 = vmatprep.subr.bf16.mxu0 %v227_v0  ;;  %v218_v1 = vld [vmem:[%s282_s1] sm:$0xff]   ;;  %212 = vmatprep.mubr.msk.bf16.mxu0 %vm228_vm0, %v227_v0  ;;  %v219_v2 = vld [vmem:[%s282_s1 + $0x8] sm:$0xff]   ;;  %v220_v3 = vld [vmem:[%s282_s1 + $0x10] sm:$0xff]  }
   0x2   :  { %197 = vmatpush3.bf16.msra.mxu0 %v218_v1  ;;  %v221_v4 = vld [vmem:[%s282_s1 + $0x18] sm:$0xff]   ;;  %v222_v5 = vld [vmem:[%s282_s1 + $0x20] sm:$0xff]   ;;  %v223_v6 = vld [vmem:[%s282_s1 + $0x28] sm:$0xff]  }
   0x3   :  { %198 = vmatprep.subr.bf16.mxu0 %v227_v0  ;;  %v224_v7 = vld [vmem:[%s282_s1 + $0x30] sm:$0xff]   ;;  %v225_v8 = vld [vmem:[%s282_s1 + $0x38] sm:$0xff]   ;;  %v226_v9 = vld [vmem:[%s283_s0] sm:$0xff]  }
   0x4   :  { %v177_v11 = vld [vmem:[%s284_s2] ss:$0 sm:$0xff] }
   0x6   :  { %199 = vmatpush3.bf16.msra.mxu0 %v219_v2 }
   0x7   :  { %200 = vmatprep.subr.bf16.mxu0 %v227_v0 }
   0xa   :  { %201 = vmatpush3.bf16.msra.mxu0 %v220_v3 }
   0xb   :  { %202 = vmatprep.subr.bf16.mxu0 %v227_v0 }
   0xe   :  { %203 = vmatpush3.bf16.msra.mxu0 %v221_v4 }
   0xf   :  { %204 = vmatprep.subr.bf16.mxu0 %v227_v0 }
  0x12   :  { %205 = vmatpush3.bf16.msra.mxu0 %v222_v5 }
  0x13   :  { %206 = vmatprep.subr.bf16.mxu0 %v227_v0 }
  0x16   :  { %207 = vmatpush3.bf16.msra.mxu0 %v223_v6 }
  0x17   :  { %208 = vmatprep.subr.bf16.mxu0 %v227_v0 }
  0x1a   :  { %209 = vmatpush3.bf16.msra.mxu0 %v224_v7 }
  0x1b   :  { %210 = vmatprep.subr.bf16.mxu0 %v227_v0 }
  0x1e   :  { %211 = vmatpush3.bf16.msra.mxu0 %v225_v8 }
  0x21   :  { %213 = vmatmul.mubr.bf16.vlgmr.msra.gmra.mrb[0].mxu0 %v226_v9 }
  0xf4   :  { %v129_v10 = vpop.f32.mrb[0].mxu0 }
  0xf5   :  { %v214_v12 = vpop.f32.mrb[1].mxu0  ;;  %v152_v14 = vadd.f32 %v177_v11, %v129_v10 }
  0xf6   :  { %v132_v13 = vpop.f32.mrb[2].mxu0 }
  0xf7   :  { %v153_v15 = vadd.f32 %v177_v11, %v132_v13  ;;  %v215_v16 = vpop.f32.mrb[3].mxu0 }
  0xf9   :  { %v185_v17 = vpack.c.bf16 %v153_v15, %v152_v14 }
  0xfb   :  { %186 = vst [vmem:[%s285_s3] sm:$0xff] %v185_v17  }

// kernel: bert_ner_forward.10
= control target key start
LH: loop header
LB: loop body
LE: loop exit
PB: predicated region body
PF: predicated region fallthrough
CT: control target
= control target key end

     0   :  { %v1039_v1 = vmov 0   ;;  %s1338_s1 = inlined_call_operand.vmem [shape: bf16[128,512], index: 1, kind: input, shape index: {}]   ;;  %s1339_s0 = inlined_call_operand.vmem [shape: bf16[16,128], index: 0, kind: input, shape index: {}]   ;;  %s1340_s3 = inlined_call_operand.vmem [shape: bf16[512,128], index: 3, kind: input, shape index: {}]   ;;  %s1341_s2 = inlined_call_operand.vmem [shape: f32[1,512], index: 2, kind: input, shape index: {}]   ;;  %s1342_s4 = inlined_call_operand.vmem [shape: f32[1,128], index: 4, kind: input, shape index: {}]   ;;  %s1343_s5 = inlined_call_operand.vmem [shape: f32[1,128], index: 5, kind: input, shape index: {}]   ;;  %s1344_s6 = inlined_call_operand.vmem [shape: f32[1,128], index: 6, kind: input, shape index: {}]   ;;  %s1345_s7 = inlined_call_operand.vmem [shape: bf16[16,128], index: 7, kind: output, shape index: {}]  }
   0x1   :  { %v937_v0 = vld [vmem:[%s1338_s1 + $0x4] ss:$16 sps:$4 sm:$0xff]   ;;  %281 = vmatprep.mubr.bf16.mxu0 %v1039_v1  ;;  %324 = vmatprep.mubr.bf16.mxu1 %v1039_v1  ;;  %v939_v2 = vld [vmem:[%s1338_s1 + $0xc] ss:$16 sps:$4 sm:$0xff]   ;;  %v941_v3 = vld [vmem:[%s1338_s1] ss:$16 sps:$4 sm:$0xff]  }
   0x2   :  { %249 = vmatprep.subr.bf16.mxu0 %v937_v0  ;;  %v942_v4 = vld [vmem:[%s1338_s1 + $0x8] ss:$16 sps:$4 sm:$0xff]   ;;  %292 = vmatprep.subr.bf16.mxu1 %v939_v2  ;;  %v943_v5 = vld [vmem:[%s1338_s1 + $0x24] ss:$16 sps:$4 sm:$0xff]   ;;  %v945_v6 = vld [vmem:[%s1338_s1 + $0x2c] ss:$16 sps:$4 sm:$0xff]   ;;  %v63_v2 = vlaneseq }
   0x3   :  { %250 = vmatpush1.bf16.msra.mxu0 %v941_v3  ;;  %293 = vmatpush1.bf16.msra.mxu1 %v942_v4  ;;  %v947_v7 = vld [vmem:[%s1338_s1 + $0x20] ss:$16 sps:$4 sm:$0xff]   ;;  %v948_v8 = vld [vmem:[%s1338_s1 + $0x28] ss:$16 sps:$4 sm:$0xff]   ;;  %v949_v9 = vld [vmem:[%s1338_s1 + $0x44] ss:$16 sps:$4 sm:$0xff]  }
   0x4   :  { %251 = vmatprep.subr.bf16.mxu0 %v943_v5  ;;  %294 = vmatprep.subr.bf16.mxu1 %v945_v6  ;;  %v951_v10 = vld [vmem:[%s1338_s1 + $0x4c] ss:$16 sps:$4 sm:$0xff]   ;;  %v953_v11 = vld [vmem:[%s1338_s1 + $0x40] ss:$16 sps:$4 sm:$0xff]   ;;  %v954_v12 = vld [vmem:[%s1338_s1 + $0x48] ss:$16 sps:$4 sm:$0xff]  }
   0x5   :  { %v955_v13 = vld [vmem:[%s1338_s1 + $0x64] ss:$16 sps:$4 sm:$0xff]   ;;  %v957_v14 = vld [vmem:[%s1338_s1 + $0x6c] ss:$16 sps:$4 sm:$0xff]   ;;  %v959_v15 = vld [vmem:[%s1338_s1 + $0x60] ss:$16 sps:$4 sm:$0xff]  }
   0x6   :  { %v960_v16 = vld [vmem:[%s1338_s1 + $0x68] ss:$16 sps:$4 sm:$0xff]   ;;  %v961_v17 = vld [vmem:[%s1338_s1 + $0x84] ss:$16 sps:$4 sm:$0xff]   ;;  %v963_v18 = vld [vmem:[%s1338_s1 + $0x8c] ss:$16 sps:$4 sm:$0xff]  }
   0x7   :  { %252 = vmatpush1.bf16.msra.mxu0 %v947_v7  ;;  %295 = vmatpush1.bf16.msra.mxu1 %v948_v8  ;;  %v965_v19 = vld [vmem:[%s1338_s1 + $0x80] ss:$16 sps:$4 sm:$0xff]   ;;  %v966_v20 = vld [vmem:[%s1338_s1 + $0x88] ss:$16 sps:$4 sm:$0xff]   ;;  %v967_v21 = vld [vmem:[%s1338_s1 + $0xa4] ss:$16 sps:$4 sm:$0xff]  }
   0x8   :  { %253 = vmatprep.subr.bf16.mxu0 %v949_v9  ;;  %296 = vmatprep.subr.bf16.mxu1 %v951_v10  ;;  %v969_v22 = vld [vmem:[%s1338_s1 + $0xac] ss:$16 sps:$4 sm:$0xff]   ;;  %v971_v23 = vld [vmem:[%s1338_s1 + $0xa0] ss:$16 sps:$4 sm:$0xff]   ;;  %v972_v24 = vld [vmem:[%s1338_s1 + $0xa8] ss:$16 sps:$4 sm:$0xff]  }
   0x9   :  { %v973_v25 = vld [vmem:[%s1338_s1 + $0xc4] ss:$16 sps:$4 sm:$0xff]   ;;  %v975_v26 = vld [vmem:[%s1338_s1 + $0xcc] ss:$16 sps:$4 sm:$0xff]   ;;  %v977_v27 = vld [vmem:[%s1338_s1 + $0xc0] ss:$16 sps:$4 sm:$0xff]  }
   0xa   :  { %v978_v28 = vld [vmem:[%s1338_s1 + $0xc8] ss:$16 sps:$4 sm:$0xff]   ;;  %v979_v29 = vld [vmem:[%s1338_s1 + $0xe4] ss:$16 sps:$4 sm:$0xff]   ;;  %v981_v30 = vld [vmem:[%s1338_s1 + $0xec] ss:$16 sps:$4 sm:$0xff]  }
   0xb   :  { %254 = vmatpush1.bf16.msra.mxu0 %v953_v11  ;;  %297 = vmatpush1.bf16.msra.mxu1 %v954_v12  ;;  %v983_v31 = vld [vmem:[%s1338_s1 + $0xe0] ss:$16 sps:$4 sm:$0xff]   ;;  %v984_v32 = vld [vmem:[%s1338_s1 + $0xe8] ss:$16 sps:$4 sm:$0xff]   ;;  %v64_v3 = vshrl.u32 %v63_v2, 7 }
   0xc   :  { %255 = vmatprep.subr.bf16.mxu0 %v955_v13  ;;  %298 = vmatprep.subr.bf16.mxu1 %v957_v14  ;;  %v1179_v33 = vld [vmem:[%s1339_s0] sm:$0xff]   ;;  %v990_v38 = vld [vmem:[%s1340_s3 + $0x48] sm:$0xff]   ;;  %v994_v42 = vld [vmem:[%s1340_s3 + $0x50] sm:$0xff]  }
   0xd   :  { %v986_v34 = vld [vmem:[%s1340_s3 + $0x40] sm:$0xff]   ;;  %v991_v39 = vld [vmem:[%s1340_s3 + $0xc8] sm:$0xff]   ;;  %v995_v43 = vld [vmem:[%s1340_s3 + $0xd0] sm:$0xff]   ;;  %v65_v4 = vsub.s32 0, %v64_v3  ;;  %v73_v5 = vsub.s32 2, %v64_v3  ;;  %v69_v7 = vsub.s32 1, %v64_v3 }
   0xe   :  { %v987_v35 = vld [vmem:[%s1340_s3 + $0xc0] sm:$0xff]   ;;  %v992_v40 = vld [vmem:[%s1340_s3 + $0x8] sm:$0xff]   ;;  %v996_v44 = vld [vmem:[%s1340_s3 + $0x10] sm:$0xff]   ;;  %v77_v8 = vsub.s32 3, %v64_v3 }
   0xf   :  { %256 = vmatpush1.bf16.msra.mxu0 %v959_v15  ;;  %299 = vmatpush1.bf16.msra.mxu1 %v960_v16  ;;  %v988_v36 = vld [vmem:[%s1340_s3] sm:$0xff]   ;;  %v993_v41 = vld [vmem:[%s1340_s3 + $0x88] sm:$0xff]   ;;  %v997_v45 = vld [vmem:[%s1340_s3 + $0x90] sm:$0xff]  }
  0x10   :  { %257 = vmatprep.subr.bf16.mxu0 %v961_v17  ;;  %300 = vmatprep.subr.bf16.mxu1 %v963_v18  ;;  %v989_v37 = vld [vmem:[%s1340_s3 + $0x80] sm:$0xff]   ;;  %v998_v46 = vld [vmem:[%s1340_s3 + $0x58] sm:$0xff]   ;;  %v1006_v54 = vld [vmem:[%s1340_s3 + $0x68] sm:$0xff]  }
  0x11   :  { %v999_v47 = vld [vmem:[%s1340_s3 + $0xd8] sm:$0xff]   ;;  %v1002_v50 = vld [vmem:[%s1340_s3 + $0x60] sm:$0xff]   ;;  %v1007_v55 = vld [vmem:[%s1340_s3 + $0xe8] sm:$0xff]  }
  0x12   :  { %v1000_v48 = vld [vmem:[%s1340_s3 + $0x18] sm:$0xff]   ;;  %v1003_v51 = vld [vmem:[%s1340_s3 + $0xe0] sm:$0xff]   ;;  %v1008_v56 = vld [vmem:[%s1340_s3 + $0x28] sm:$0xff]  }
  0x13   :  { %258 = vmatpush1.bf16.msra.mxu0 %v965_v19  ;;  %301 = vmatpush1.bf16.msra.mxu1 %v966_v20  ;;  %v1001_v49 = vld [vmem:[%s1340_s3 + $0x98] sm:$0xff]   ;;  %v1004_v52 = vld [vmem:[%s1340_s3 + $0x20] sm:$0xff]   ;;  %v1009_v57 = vld [vmem:[%s1340_s3 + $0xa8] sm:$0xff]  }
  0x14   :  { %259 = vmatprep.subr.bf16.mxu0 %v967_v21  ;;  %302 = vmatprep.subr.bf16.mxu1 %v969_v22  ;;  %v1005_v53 = vld [vmem:[%s1340_s3 + $0xa0] sm:$0xff]   ;;  %v1010_v58 = vld [vmem:[%s1340_s3 + $0x70] sm:$0xff]   ;;  %v1014_v62 = vld [vmem:[%s1340_s3 + $0x78] sm:$0xff]  }
  0x15   :  { %v1011_v59 = vld [vmem:[%s1340_s3 + $0xf0] sm:$0xff]   ;;  %v1015_v63 = vld [vmem:[%s1340_s3 + $0xf8] sm:$0xff]   ;;  %v61_v6 = vld [vmem:[%s1341_s2] sm:$0xf] }
  0x16   :  { %v1012_v60 = vld [vmem:[%s1340_s3 + $0x30] sm:$0xff]   ;;  %v1016_v0 = vld [vmem:[%s1340_s3 + $0x38] sm:$0xff]   ;;  %v66_v9 = vrot.slane %v61_v6, %v65_v4  ;;  %v74_v10 = vrot.slane %v61_v6, %v73_v5  ;;  %v70_v11 = vrot.slane %v61_v6, %v69_v7  ;;  %v78_v12 = vrot.slane %v61_v6, %v77_v8 }
  0x17   :  { %260 = vmatpush1.bf16.msra.mxu0 %v971_v23  ;;  %303 = vmatpush1.bf16.msra.mxu1 %v972_v24  ;;  %v1013_v61 = vld [vmem:[%s1340_s3 + $0xb0] sm:$0xff]   ;;  %v1017_v1 = vld [vmem:[%s1340_s3 + $0xb8] sm:$0xff]  }
  0x18   :  { %261 = vmatprep.subr.bf16.mxu0 %v973_v25  ;;  %304 = vmatprep.subr.bf16.mxu1 %v975_v26 }
  0x1b   :  { %262 = vmatpush1.bf16.msra.mxu0 %v977_v27  ;;  %305 = vmatpush1.bf16.msra.mxu1 %v978_v28 }
  0x1c   :  { %263 = vmatprep.subr.bf16.mxu0 %v979_v29  ;;  %306 = vmatprep.subr.bf16.mxu1 %v981_v30 }
  0x1f   :  { %264 = vmatpush1.bf16.msra.mxu0 %v983_v31  ;;  %307 = vmatpush1.bf16.msra.mxu1 %v984_v32 }
  0x20   :  { %892 = vmatprep.subr.bf16.mxu0 %v986_v34  ;;  %914 = vmatprep.subr.bf16.mxu1 %v987_v35 }
  0x22   :  { %282 = vmatmul.mubr.bf16.vlgmr.msra.gmra.mrb[0].mxu0 %v1179_v33  ;;  %325 = vmatmul.mubr.bf16.vlgmr.msra.gmra.mrb[0].mxu1 %v1179_v33 }
  0x23   :  { %893 = vmatpush3.bf16.msra.mxu0 %v988_v36  ;;  %915 = vmatpush3.bf16.msra.mxu1 %v989_v37 }
  0x24   :  { %894 = vmatprep.subr.bf16.mxu0 %v990_v38  ;;  %916 = vmatprep.subr.bf16.mxu1 %v991_v39 }
  0x27   :  { %895 = vmatpush3.bf16.msra.mxu0 %v992_v40  ;;  %917 = vmatpush3.bf16.msra.mxu1 %v993_v41 }
  0x28   :  { %896 = vmatprep.subr.bf16.mxu0 %v994_v42  ;;  %918 = vmatprep.subr.bf16.mxu1 %v995_v43 }
  0x2b   :  { %897 = vmatpush3.bf16.msra.mxu0 %v996_v44  ;;  %919 = vmatpush3.bf16.msra.mxu1 %v997_v45 }
  0x2c   :  { %898 = vmatprep.subr.bf16.mxu0 %v998_v46  ;;  %920 = vmatprep.subr.bf16.mxu1 %v999_v47 }
  0x2f   :  { %899 = vmatpush3.bf16.msra.mxu0 %v1000_v48  ;;  %921 = vmatpush3.bf16.msra.mxu1 %v1001_v49 }
  0x30   :  { %900 = vmatprep.subr.bf16.mxu0 %v1002_v50  ;;  %922 = vmatprep.subr.bf16.mxu1 %v1003_v51 }
  0x33   :  { %901 = vmatpush3.bf16.msra.mxu0 %v1004_v52  ;;  %923 = vmatpush3.bf16.msra.mxu1 %v1005_v53 }
  0x34   :  { %902 = vmatprep.subr.bf16.mxu0 %v1006_v54  ;;  %924 = vmatprep.subr.bf16.mxu1 %v1007_v55 }
  0x37   :  { %903 = vmatpush3.bf16.msra.mxu0 %v1008_v56  ;;  %925 = vmatpush3.bf16.msra.mxu1 %v1009_v57 }
  0x38   :  { %904 = vmatprep.subr.bf16.mxu0 %v1010_v58  ;;  %926 = vmatprep.subr.bf16.mxu1 %v1011_v59 }
  0x3b   :  { %905 = vmatpush3.bf16.msra.mxu0 %v1012_v60  ;;  %927 = vmatpush3.bf16.msra.mxu1 %v1013_v61 }
  0x3c   :  { %906 = vmatprep.subr.bf16.mxu0 %v1014_v62  ;;  %928 = vmatprep.subr.bf16.mxu1 %v1015_v63 }
  0x3f   :  { %907 = vmatpush3.bf16.msra.mxu0 %v1016_v0  ;;  %929 = vmatpush3.bf16.msra.mxu1 %v1017_v1 }
  0xf5   :  { %v283_v13 = vpop.f32.mrb[0].mxu0  ;;  %v326_v14 = vpop.f32.mrb[0].mxu1 }
  0xf6   :  { %v1282_v15 = vadd.f32 %v283_v13, %v66_v9  ;;  %v1284_v16 = vadd.f32 %v326_v14, %v74_v10  ;;  %v285_v17 = vpop.f32.mrb[1].mxu0  ;;  %v328_v18 = vpop.f32.mrb[1].mxu1 }
  0xf7   :  { %v1286_v19 = vadd.f32 %v285_v17, %v70_v11  ;;  %v1288_v20 = vadd.f32 %v328_v18, %v78_v12  ;;  %v287_v21 = vpop.f32.mrb[2].mxu0  ;;  %v330_v22 = vpop.f32.mrb[2].mxu1 }
  0xf8   :  { %v343_v23 = vmul.f32 0.044715, %v1282_v15  ;;  %v345_v24 = vmul.f32 0.044715, %v1284_v16  ;;  %v288_v25 = vadd.f32 %v287_v21, %v66_v9  ;;  %v331_v26 = vadd.f32 %v330_v22, %v74_v10  ;;  %v289_v27 = vpop.f32.mrb[3].mxu0  ;;  %v332_v28 = vpop.f32.mrb[3].mxu1 }
  0xf9   :  { %v344_v29 = vmul.f32 0.044715, %v1286_v19  ;;  %v346_v30 = vmul.f32 0.044715, %v1288_v20  ;;  %v1294_v31 = vadd.f32 %v289_v27, %v70_v11  ;;  %v1296_v32 = vadd.f32 %v332_v28, %v78_v12 }
  0xfa   :  { %v351_v34 = vmul.f32 %v343_v23, %v1282_v15  ;;  %v353_v35 = vmul.f32 %v345_v24, %v1284_v16  ;;  %v347_v36 = vmul.f32 0.044715, %v288_v25  ;;  %v349_v37 = vmul.f32 0.044715, %v331_v26 }
  0xfb   :  { %v352_v38 = vmul.f32 %v344_v29, %v1286_v19  ;;  %v354_v39 = vmul.f32 %v346_v30, %v1288_v20  ;;  %v348_v40 = vmul.f32 0.044715, %v1294_v31  ;;  %v350_v41 = vmul.f32 0.044715, %v1296_v32 }
  0xfc   :  { %v359_v42 = vmul.f32 %v351_v34, %v1282_v15  ;;  %v361_v43 = vmul.f32 %v353_v35, %v1284_v16  ;;  %v355_v44 = vmul.f32 %v347_v36, %v288_v25  ;;  %v357_v45 = vmul.f32 %v349_v37, %v331_v26 }
  0xfd   :  { %v360_v46 = vmul.f32 %v352_v38, %v1286_v19  ;;  %v362_v47 = vmul.f32 %v354_v39, %v1288_v20  ;;  %v356_v48 = vmul.f32 %v348_v40, %v1294_v31  ;;  %v358_v49 = vmul.f32 %v350_v41, %v1296_v32 }
  0xfe   :  { %v367_v50 = vadd.f32 %v359_v42, %v1282_v15  ;;  %v369_v51 = vadd.f32 %v361_v43, %v1284_v16  ;;  %v363_v52 = vmul.f32 %v355_v44, %v288_v25  ;;  %v365_v53 = vmul.f32 %v357_v45, %v331_v26 }
  0xff   :  { %v364_v54 = vmul.f32 %v356_v48, %v1294_v31  ;;  %v366_v55 = vmul.f32 %v358_v49, %v1296_v32  ;;  %v368_v60 = vadd.f32 %v360_v46, %v1286_v19  ;;  %v370_v0 = vadd.f32 %v362_v47, %v1288_v20 }
 0x100   :  { %v375_v56 = vmul.f32 0.7978846, %v367_v50  ;;  %v377_v57 = vmul.f32 0.7978846, %v369_v51  ;;  %v371_v58 = vadd.f32 %v363_v52, %v288_v25  ;;  %v373_v59 = vadd.f32 %v365_v53, %v331_v26 }
 0x101   :  { %v372_v61 = vadd.f32 %v364_v54, %v1294_v31  ;;  %v376_v1 = vmul.f32 0.7978846, %v368_v60  ;;  %v374_v3 = vadd.f32 %v366_v55, %v1296_v32  ;;  %v378_v4 = vmul.f32 0.7978846, %v370_v0 }
 0x102   :  { %1019 = vtanh.f32 %v375_v56  ;;  %v379_v62 = vmul.f32 0.7978846, %v371_v58  ;;  %v381_v63 = vmul.f32 0.7978846, %v373_v59  ;;  %v335_v12 = vmul.f32 0.5, %v1282_v15 }
 0x103   :  { %1021 = vtanh.f32 %v377_v57  ;;  %v380_v2 = vmul.f32 0.7978846, %v372_v61  ;;  %v382_v5 = vmul.f32 0.7978846, %v374_v3  ;;  %v339_v13 = vmul.f32 0.5, %v288_v25 }
 0x104   :  { %1023 = vtanh.f32 %v379_v62  ;;  %v337_v18 = vmul.f32 0.5, %v1284_v16  ;;  %v341_v21 = vmul.f32 0.5, %v331_v26  ;;  %v336_v24 = vmul.f32 0.5, %v1286_v19 }
 0x105   :  { %1025 = vtanh.f32 %v381_v63  ;;  %v340_v34 = vmul.f32 0.5, %v1294_v31  ;;  %v338_v25 = vmul.f32 0.5, %v1288_v20  ;;  %v342_v38 = vmul.f32 0.5, %v1296_v32  ;;  %v848_v20 = vld [vmem:[%s1342_s4] ss:$0 sm:$0xff] }
 0x106   :  { %1027 = vtanh.f32 %v376_v1  ;;  %v756_v55 = vunpack.c.l.bf16 %v1179_v33  ;;  %v757_v62 = vunpack.c.h.bf16 %v1179_v33 }
 0x107   :  { %1029 = vtanh.f32 %v380_v2 }
 0x108   :  { %1031 = vtanh.f32 %v378_v4 }
 0x109   :  { %1033 = vtanh.f32 %v382_v5 }
 0x10c   :  { %v1020_v6 = vpop.eup %1019 }
 0x10d   :  { %v1022_v7 = vpop.eup %1021  ;;  %v391_v8 = vadd.f32 1.0, %v1020_v6 }
 0x10e   :  { %v1024_v9 = vpop.eup %1023  ;;  %v393_v10 = vadd.f32 1.0, %v1022_v7 }
 0x10f   :  { %v1026_v11 = vpop.eup %1025  ;;  %v395_v14 = vadd.f32 1.0, %v1024_v9  ;;  %v399_v28 = vmul.f32 %v391_v8, %v335_v12 }
 0x110   :  { %v1028_v17 = vpop.eup %1027  ;;  %v397_v22 = vadd.f32 1.0, %v1026_v11  ;;  %v401_v36 = vmul.f32 %v393_v10, %v337_v18 }
 0x111   :  { %v1030_v23 = vpop.eup %1029  ;;  %v392_v27 = vadd.f32 1.0, %v1028_v17  ;;  %v403_v29 = vmul.f32 %v395_v14, %v339_v13  ;;  %v881_v17 = vld [vmem:[%s1343_s5] ss:$0 sm:$0xff] }
 0x112   :  { %v1032_v30 = vpop.eup %1031  ;;  %v396_v35 = vadd.f32 1.0, %v1030_v23  ;;  %v405_v37 = vmul.f32 %v397_v22, %v341_v21  ;;  %v882_v23 = vld [vmem:[%s1344_s6] ss:$0 sm:$0xff] }
 0x113   :  { %v1034_v15 = vpop.eup %1033  ;;  %v394_v16 = vadd.f32 1.0, %v1032_v30  ;;  %v407_v26 = vpack.c.bf16 %v403_v29, %v399_v28  ;;  %v400_v39 = vmul.f32 %v392_v27, %v336_v24 }
 0x114   :  { %v404_v40 = vmul.f32 %v396_v35, %v340_v34  ;;  %v398_v41 = vadd.f32 1.0, %v1034_v15  ;;  %v409_v19 = vpack.c.bf16 %v405_v37, %v401_v36 }
 0x115   :  { %v402_v43 = vmul.f32 %v394_v16, %v338_v25 }
 0x116   :  { %v408_v42 = vpack.c.bf16 %v404_v40, %v400_v39  ;;  %v406_v44 = vmul.f32 %v398_v41, %v342_v38 }
 0x118   :  { %706 = vmatprep.mubr.bf16.mxu0 %v408_v42  ;;  %v410_v45 = vpack.c.bf16 %v406_v44, %v402_v43 }
 0x119   :  { %707 = vmatmul.mubr.bf16.vlgmr.msra.gmra.mrb[4].mxu0 %v407_v26 }
 0x11a   :  { %747 = vmatprep.mubr.bf16.mxu1 %v410_v45 }
 0x11b   :  { %748 = vmatmul.mubr.bf16.vlgmr.msra.gmra.mrb[4].mxu1 %v409_v19 }
 0x1ec   :  { %v908_v31 = vpop.f32.mrb[4].mxu0 }
 0x1ed   :  { %v909_v32 = vpop.f32.mrb[5].mxu0 }
 0x1ee   :  { %v930_v46 = vpop.f32.mrb[4].mxu1  ;;  %v910_v47 = vadd.f32 %v909_v32, %v908_v31  ;;  %v911_v48 = vpop.f32.mrb[6].mxu0 }
 0x1ef   :  { %v931_v49 = vpop.f32.mrb[5].mxu1  ;;  %v912_v50 = vpop.f32.mrb[7].mxu0 }
 0x1f0   :  { %v709_v51 = vadd.f32 %v910_v47, %v848_v20  ;;  %v932_v52 = vadd.f32 %v931_v49, %v930_v46  ;;  %v933_v53 = vpop.f32.mrb[6].mxu1  ;;  %v913_v54 = vadd.f32 %v912_v50, %v911_v48 }
 0x1f1   :  { %v934_v56 = vpop.f32.mrb[7].mxu1 }
 0x1f2   :  { %v750_v57 = vadd.f32 %v932_v52, %v709_v51  ;;  %v712_v58 = vadd.f32 %v913_v54, %v848_v20  ;;  %v935_v59 = vadd.f32 %v934_v56, %v933_v53 }
 0x1f4   :  { %v753_v60 = vadd.f32 %v935_v59, %v712_v58  ;;  %v758_v61 = vadd.f32 %v756_v55, %v750_v57 }
 0x1f6   :  { %760 = vadd.xlane.f32.xlu0 %v758_v61  ;;  %v759_v63 = vadd.f32 %v757_v62, %v753_v60 }
 0x1fa   :  { %762 = vadd.xlane.f32.xlu0 %v759_v63 }
 0x283   :  { %v761_v0 = vpop.xlane.xlu0 %760 }
 0x284   :  { %v765_v1 = vmul.f32 0.0078125, %v761_v0 }
 0x286   :  { %v767_v2 = vsub.f32 %v758_v61, %v765_v1 }
 0x287   :  { %v763_v3 = vpop.xlane.xlu0 %762 }
 0x288   :  { %v766_v4 = vmul.f32 0.0078125, %v763_v3  ;;  %v769_v5 = vmul.f32 %v767_v2, %v767_v2 }
 0x28a   :  { %v768_v6 = vsub.f32 %v759_v63, %v766_v4  ;;  %771 = vadd.xlane.f32.xlu1 %v769_v5 }
 0x28c   :  { %v770_v7 = vmul.f32 %v768_v6, %v768_v6 }
 0x28e   :  { %773 = vadd.xlane.f32.xlu1 %v770_v7 }
 0x317   :  { %v772_v8 = vpop.xlane.xlu1 %771 }
 0x318   :  { %v775_v9 = vmul.f32 0.0078125, %v772_v8 }
 0x31a   :  { %v777_v10 = vadd.f32 1e-12, %v775_v9 }
 0x31b   :  { %v774_v11 = vpop.xlane.xlu1 %773 }
 0x31c   :  { %1035 = vrsqrt.f32 %v777_v10  ;;  %v776_v12 = vmul.f32 0.0078125, %v774_v11 }
 0x31e   :  { %v778_v33 = vadd.f32 1e-12, %v776_v12 }
 0x320   :  { %1037 = vrsqrt.f32 %v778_v33 }
 0x326   :  { %v1036_v13 = vpop.eup %1035 }
 0x327   :  { %v781_v14 = vmul.f32 %v1036_v13, %v767_v2 }
 0x329   :  { %v790_v21 = vmul.f32 %v881_v17, %v781_v14 }
 0x32a   :  { %v1038_v18 = vpop.eup %1037 }
 0x32b   :  { %v782_v22 = vmul.f32 %v1038_v18, %v768_v6  ;;  %v799_v27 = vadd.f32 %v882_v23, %v790_v21 }
 0x32d   :  { %v791_v24 = vmul.f32 %v881_v17, %v782_v22 }
 0x32f   :  { %v800_v28 = vadd.f32 %v882_v23, %v791_v24 }
 0x331   :  { %v890_v29 = vpack.c.bf16 %v800_v28, %v799_v27 }
 0x333   :  { %891 = vst [vmem:[%s1345_s7] sm:$0xff] %v890_v29  }

</bundles_post_ra>
